<compile_context>
chip_gen: v6e
topology: v6e:2x2x1
jax: 0.10.0
libtpu: 0.0.40
codegen_flags: <defaults>
</compile_context>

<pallas_src>
import functools

import jax
import jax.numpy as jnp
from jax import lax
from jax.experimental import pallas as pl
from jax.experimental.pallas import tpu as pltpu


def _round_up(x, m):
    return (x + m - 1) // m * m


def _vmem_capacity_bytes():
    # Generation-aware VMEM capacity (128 MiB on v5e/v6e, 64 MiB/TC on v7x).
    try:
        info = pltpu.get_tpu_info()
        return int(getattr(info, "vmem_capacity_bytes", 64 << 20))
    except Exception:
        return 64 << 20          # conservative (v7x-sized) default


def _pick_cout_tile(cpad, n_batch):
    # cpad is a multiple of 128 so every tile keeps output stores lane-dense.
    tco = cpad
    for t in (512, 256, 128):
        if cpad % t == 0:
            tco = t
            break
    # v7x megacore: make sure the parallel grid has >= 2 steps.
    if n_batch * (cpad // tco) < 2 and cpad >= 256 and (cpad // 2) % 128 == 0:
        tco = cpad // 2
    return tco


# ----------------------------------------------------------------------------
# Direct convolution kernel (any stride, via phase decomposition).
# The zero-padded, phase-decomposed image of one batch element lives in VMEM
# as (s*s*Lp, Cin); each of the k*k taps contributes one shifted-slab matmul
# to a single local f32 accumulation chain.  The epilogue (shift + residual +
# ReLU) is folded into the single cropped output store.
# ----------------------------------------------------------------------------
def _direct_conv_kernel(x_ref, w_ref, sh_ref, *rest, k, s, wpp, lp, ho, wo,
                        has_res):
    if has_res:
        res_ref, o_ref = rest
    else:
        (o_ref,) = rest

    my = ho * wpp
    tco = w_ref.shape[-1]

    # Single accumulation chain over the k*k taps: no output-block RMW passes
    # (lets v7x accumulate in the MRB; on v5e/v6e the adds fold into the
    # result-FIFO drain).
    acc = None
    for kh in range(k):
        for kw in range(k):
            t = kh * k + kw
            d = ((kh % s) * s + (kw % s)) * lp + (kh // s) * wpp + (kw // s)
            lhs = x_ref[0, pl.ds(d, my), :]                    # (My, Cin) bf16
            c = jnp.dot(lhs, w_ref[t], preferred_element_type=jnp.float32)
            acc = c if acc is None else acc + c

    acc = acc + sh_ref[...]                                    # folded bias/BN
    # Crop the over-wide rows in VMEM (no HBM crop pass), fuse residual + ReLU
    # into the single full-lane store.
    y = acc.reshape(ho, wpp, tco)[:, :wo, :]
    if has_res:
        y = y + res_ref[0].astype(jnp.float32)
    o_ref[0] = jnp.maximum(y, 0.0)


def _direct_plan(N, H, W, Cin, layer):
    k, s, pad = layer["k"], layer["stride"], layer["pad"]
    cpad = layer["cpad"]
    Ho = (H + 2 * pad - k) // s + 1
    Wo = (W + 2 * pad - k) // s + 1
    off = (k - 1) // s                       # max per-axis tap offset in phase
    Wpp = _round_up(Wo + off, 8)             # sublane-aligned row pitch
    Hpp = Ho + off + 1                       # +1 guard row keeps reads in-bounds
    Lp = Hpp * Wpp
    tco = _pick_cout_tile(cpad, N)

    # VMEM footprint using physically padded (sublane/lane) tile sizes.
    x_b = _round_up(s * s * Lp, 16) * _round_up(Cin, 128) * 2
    w_b = k * k * _round_up(Cin, 16) * tco * 2
    o_b = Ho * _round_up(Wo, 8) * tco * 4
    r_b = Ho * _round_up(Wo, 16) * tco * 2 if layer["residual"] else 0
    acc_b = _round_up(Ho * Wpp, 8) * tco * 4
    footprint = 2 * (x_b + w_b + tco * 4 + o_b + r_b) + 2 * acc_b
    return dict(Ho=Ho, Wo=Wo, Hpp=Hpp, Wpp=Wpp, Lp=Lp, tco=tco,
                x_b=x_b, w_b=w_b, footprint=footprint)


def _conv_direct(x_nhwc, layer, plan):
    N, H, W, Cin = x_nhwc.shape
    k, s, pad = layer["k"], layer["stride"], layer["pad"]
    cpad = layer["cpad"]
    Ho, Wo = plan["Ho"], plan["Wo"]
    Hpp, Wpp, Lp = plan["Hpp"], plan["Wpp"], plan["Lp"]
    tco = plan["tco"]
    n_ct = cpad // tco
    has_res = layer["residual"]

    # Zero-padded, stride-phase-decomposed image (1x data, no 9x im2col),
    # flattened to rows of Cin, built directly in bf16.
    xp = jnp.pad(x_nhwc.astype(jnp.bfloat16),
                 ((0, 0), (pad, pad), (pad, pad), (0, 0)))
    phases = []
    for i in range(s):
        for j in range(s):
            ph = xp[:, i::s, j::s, :]
            ph = ph[:, :Hpp, :Wpp, :]
            ph = jnp.pad(ph, ((0, 0), (0, Hpp - ph.shape[1]),
                              (0, Wpp - ph.shape[2]), (0, 0)))
            phases.append(ph)
    xph = jnp.stack(phases, axis=1).reshape(N, s * s * Lp, Cin)

    # Adaptive grid order: the bigger block sits on the outer (slow) axis so it
    # stays resident and is not re-DMAed on every inner step.
    if plan["w_b"] >= plan["x_b"]:
        grid = (n_ct, N)
        jm = lambda j, n: j
        nm = lambda j, n: n
        x_reads, w_reads = n_ct, 1
    else:
        grid = (N, n_ct)
        jm = lambda n, j: j
        nm = lambda n, j: n
        x_reads, w_reads = 1, N

    in_specs = [
        pl.BlockSpec((1, s * s * Lp, Cin), lambda *a: (nm(*a), 0, 0)),
        pl.BlockSpec((k * k, Cin, tco), lambda *a: (0, 0, jm(*a))),
        pl.BlockSpec((1, tco), lambda *a: (0, jm(*a))),
    ]
    args = [xph, layer["w_taps"], layer["shift"]]
    if has_res:
        res = jnp.pad(x_nhwc, ((0, 0), (0, 0), (0, 0), (0, cpad - Cin)))
        args.append(res.astype(jnp.bfloat16))          # bf16 residual stream
        in_specs.append(
            pl.BlockSpec((1, Ho, Wo, tco), lambda *a: (nm(*a), 0, 0, jm(*a))))

    cap = _vmem_capacity_bytes()
    vmem_limit = int(min(max(2 * plan["footprint"], 32 << 20), cap // 2))

    flops = 2 * N * Ho * Wpp * (k * k * Cin) * cpad
    bytes_accessed = (xph.size * 2 * x_reads
                      + layer["w_taps"].size * 2 * w_reads
                      + N * Ho * Wo * cpad * 4
                      + (N * Ho * Wo * cpad * 2 if has_res else 0))

    out = pl.pallas_call(
        functools.partial(_direct_conv_kernel, k=k, s=s, wpp=Wpp, lp=Lp,
                          ho=Ho, wo=Wo, has_res=has_res),
        out_shape=jax.ShapeDtypeStruct((N, Ho, Wo, cpad), jnp.float32),
        grid_spec=pltpu.PrefetchScalarGridSpec(
            num_scalar_prefetch=0,
            grid=grid,
            in_specs=in_specs,
            out_specs=pl.BlockSpec((1, Ho, Wo, tco),
                                   lambda *a: (nm(*a), 0, 0, jm(*a))),
        ),
        compiler_params=pltpu.CompilerParams(
            dimension_semantics=("parallel", "parallel"),
            vmem_limit_bytes=vmem_limit),
        cost_estimate=pl.CostEstimate(flops=int(flops), transcendentals=0,
                                      bytes_accessed=int(bytes_accessed)),
    )(*args)
    return out                       # (N, Ho, Wo, cpad) f32, lane-padded channels


# ----------------------------------------------------------------------------
# Fallback: im2col + tiled matmul with fused epilogue, for feature maps too
# large to keep resident in VMEM.
# ----------------------------------------------------------------------------
def _matmul_kernel(x_ref, w_ref, sh_ref, *rest, has_res, nk):
    if has_res:
        res_ref, o_ref = rest
    else:
        (o_ref,) = rest

    def epilogue(y):
        y = y + sh_ref[...]
        if has_res:
            y = y + res_ref[...].astype(jnp.float32)
        return jnp.maximum(y, 0.0)

    if nk == 1:
        o_ref[...] = epilogue(jnp.dot(x_ref[...], w_ref[...],
                                      preferred_element_type=jnp.float32))
        return

    kk = pl.program_id(2)
    contrib = jnp.dot(x_ref[...], w_ref[...], preferred_element_type=jnp.float32)

    @pl.when(kk == 0)
    def _():
        o_ref[...] = contrib

    @pl.when(kk > 0)
    def _():
        o_ref[...] += contrib

    @pl.when(kk == nk - 1)
    def _():
        o_ref[...] = epilogue(o_ref[...])


def _im2col(xpad, k, stride, Ho, Wo):
    N, _, _, C = xpad.shape
    cols = []
    for kh in range(k):
        for kw in range(k):
            cols.append(xpad[:, kh:kh + (Ho - 1) * stride + 1:stride,
                             kw:kw + (Wo - 1) * stride + 1:stride, :])
    p = jnp.stack(cols, axis=3)                 # (N, Ho, Wo, k*k, C)
    return p.reshape(N * Ho * Wo, k * k * C)


def _conv_im2col(x_nhwc, layer):
    # TODO(synk): this fallback still materializes the k*k-amplified patches
    # array in HBM; an in-kernel gather would avoid the bandwidth blowup.
    N, H, W, Cin = x_nhwc.shape
    k, s, pad = layer["k"], layer["stride"], layer["pad"]
    cpad = layer["cpad"]
    Ho = (H + 2 * pad - k) // s + 1
    Wo = (W + 2 * pad - k) // s + 1
    has_res = layer["residual"]

    xp = jnp.pad(x_nhwc.astype(jnp.bfloat16),
                 ((0, 0), (pad, pad), (pad, pad), (0, 0)))
    patches = _im2col(xp, k, s, Ho, Wo)         # (M, K) bf16
    M, K = patches.shape
    cap = _vmem_capacity_bytes()

    tn = 512 if cpad % 512 == 0 else (256 if cpad % 256 == 0 else 128)
    tk_cap = 2048 if cap <= (96 << 20) else 4096          # v7x-safe K tile
    tk = K if K <= tk_cap else tk_cap
    tm = min(512, _round_up(M, 8))
    Mp, Kp = _round_up(M, tm), _round_up(K, tk)
    nk = Kp // tk
    if Mp != M or Kp != K:
        patches = jnp.pad(patches, ((0, Mp - M), (0, Kp - K)))
    w_flat = layer["w_flat"]
    if Kp != K:
        w_flat = jnp.pad(w_flat, ((0, Kp - K), (0, 0)))

    in_specs = [
        pl.BlockSpec((tm, tk), lambda i, j, kk: (i, kk)),
        pl.BlockSpec((tk, tn), lambda i, j, kk: (kk, j)),
        pl.BlockSpec((1, tn), lambda i, j, kk: (0, j)),
    ]
    args = [patches, w_flat, layer["shift"]]
    if has_res:
        res = jnp.pad(x_nhwc, ((0, 0), (0, 0), (0, 0), (0, cpad - Cin)))
        res = res.reshape(N * H * W, cpad).astype(jnp.bfloat16)
        if Mp != M:
            res = jnp.pad(res, ((0, Mp - M), (0, 0)))
        in_specs.append(pl.BlockSpec((tm, tn), lambda i, j, kk: (i, j)))
        args.append(res)

    footprint = 2 * (tm * tk * 2 + tk * tn * 2 + tn * 4
                     + (tm * tn * 2 if has_res else 0) + tm * tn * 4)
    vmem_limit = int(min(max(2 * footprint, 32 << 20), cap // 2))
    flops = 2 * Mp * Kp * cpad
    bytes_accessed = (patches.size * 2 + w_flat.size * 2 * (cpad // tn)
                      + Mp * cpad * 4 + (args[-1].size * 2 if has_res else 0))

    out = pl.pallas_call(
        functools.partial(_matmul_kernel, has_res=has_res, nk=nk),
        out_shape=jax.ShapeDtypeStruct((Mp, cpad), jnp.float32),
        grid_spec=pltpu.PrefetchScalarGridSpec(
            num_scalar_prefetch=0,
            grid=(Mp // tm, cpad // tn, nk),
            in_specs=in_specs,
            out_specs=pl.BlockSpec((tm, tn), lambda i, j, kk: (i, j)),
        ),
        compiler_params=pltpu.CompilerParams(
            dimension_semantics=("parallel", "parallel", "arbitrary"),
            vmem_limit_bytes=vmem_limit),
        cost_estimate=pl.CostEstimate(flops=int(flops), transcendentals=0,
                                      bytes_accessed=int(bytes_accessed)),
    )(*args)
    return out[:M].reshape(N, Ho, Wo, cpad)


# ----------------------------------------------------------------------------
# Module forward: Conv2d -> BatchNorm2d -> (+= x if residual) -> ReLU.
# ----------------------------------------------------------------------------
def conv2d_bn_relu(x_nchw, layer):
    x = jnp.transpose(x_nchw, (0, 2, 3, 1)).astype(jnp.float32)   # NCHW -> NHWC
    N, H, W, Cin = x.shape
    k, s = layer["k"], layer["stride"]
    cout = layer["cout"]
    if layer["residual"]:
        assert s == 1 and Cin == cout and 2 * layer["pad"] == k - 1, \
            "residual requires a shape-preserving conv"

    plan = _direct_plan(N, H, W, Cin, layer)
    cap = _vmem_capacity_bytes()
    if plan["footprint"] <= (cap * 45) // 100:
        out = _conv_direct(x, layer, plan)
    else:
        out = _conv_im2col(x, layer)
    out = out[..., :cout]                     # drop lane padding (fuses with transpose)
    return jnp.transpose(out, (0, 3, 1, 2))   # NHWC -> NCHW


# ----------------------------------------------------------------------------
# Parameters (PyTorch layouts) and pre-processing (fold BN scale into weights,
# pad output channels to a lane-dense multiple of 128).
# ----------------------------------------------------------------------------
def make_conv_bn_params(key, cin, cout, k, stride, pad, residual):
    kw_, kb, kbeta, kmean = jax.random.split(key, 4)
    std = (2.0 / (cin * k * k)) ** 0.5
    return dict(
        w=jax.random.normal(kw_, (cout, cin, k, k), jnp.float32) * std,  # OIHW
        b=jax.random.normal(kb, (cout,), jnp.float32) * 0.02,
        gamma=jnp.ones((cout,), jnp.float32),
        beta=jax.random.normal(kbeta, (cout,), jnp.float32) * 0.02,
        mean=jax.random.normal(kmean, (cout,), jnp.float32) * 0.02,
        var=jnp.ones((cout,), jnp.float32) * 0.9,
        eps=1e-5, k=k, stride=stride, pad=pad, residual=residual)


def prepare_layer(p):
    # TODO(synk): BatchNorm is folded in inference mode (running statistics);
    # training-mode batch statistics are not implemented.
    # TODO(synk): optional fp8 weight/activation quantization for v7x MXU.
    k = p["k"]
    cout, cin = p["w"].shape[0], p["w"].shape[1]
    cpad = _round_up(cout, 128)                                   # lane-dense
    scale = p["gamma"] / jnp.sqrt(p["var"] + p["eps"])            # (Cout,)
    shift = p["beta"] + (p["b"] - p["mean"]) * scale              # (Cout,)
    w = jnp.transpose(p["w"], (2, 3, 1, 0)) * scale[None, None, None, :]
    w = jnp.pad(w, ((0, 0), (0, 0), (0, 0), (0, cpad - cout)))
    w_taps = w.reshape(k * k, cin, cpad).astype(jnp.bfloat16)
    shift = jnp.pad(shift, (0, cpad - cout)).reshape(1, cpad).astype(jnp.float32)
    return dict(k=k, stride=p["stride"], pad=p["pad"], residual=p["residual"],
                cout=cout, cpad=cpad, w_taps=w_taps,
                w_flat=w_taps.reshape(k * k * cin, cpad), shift=shift)


def conv2d_bn_relu_reference(x_nchw, p):
    s, pad = p["stride"], p["pad"]
    y = lax.conv_general_dilated(
        x_nchw, p["w"], window_strides=(s, s),
        padding=[(pad, pad), (pad, pad)],
        dimension_numbers=("NCHW", "OIHW", "NCHW"),
        precision=lax.Precision.HIGHEST)
    y = y + p["b"][None, :, None, None]
    scale = p["gamma"] / jnp.sqrt(p["var"] + p["eps"])
    y = ((y - p["mean"][None, :, None, None]) * scale[None, :, None, None]
         + p["beta"][None, :, None, None])
    if p["residual"]:
        y = y + x_nchw
    return jnp.maximum(y, 0.0)


if __name__ == "__main__":
    key = jax.random.PRNGKey(0)
    kx, k1, k2 = jax.random.split(key, 3)
    x = jax.random.normal(kx, (2, 32, 16, 16), jnp.float32)        # NCHW

    # 1) Residual 3x3 / stride-1 block (direct fused tap-accumulation kernel).
    p1 = make_conv_bn_params(k1, 32, 32, k=3, stride=1, pad=1, residual=True)
    l1 = prepare_layer(p1)
    out1 = jax.block_until_ready(conv2d_bn_relu(x, l1))
    ref1 = conv2d_bn_relu_reference(x, p1)
    assert out1.shape == (2, 32, 16, 16), out1.shape
    assert bool(jnp.all(jnp.isfinite(out1)))
    assert float(jnp.max(jnp.abs(out1 - ref1))) < 0.15

    # 2) Stride-2 downsampling block (phase-decomposed direct kernel, no HBM
    #    im2col).
    p2 = make_conv_bn_params(k2, 32, 64, k=3, stride=2, pad=1, residual=False)
    l2 = prepare_layer(p2)
    out2 = jax.block_until_ready(conv2d_bn_relu(x, l2))
    ref2 = conv2d_bn_relu_reference(x, p2)
    assert out2.shape == (2, 64, 8, 8), out2.shape
    assert bool(jnp.all(jnp.isfinite(out2)))
    assert float(jnp.max(jnp.abs(out2 - ref2))) < 0.15

    print("KERNEL_OK")
</pallas_src>

<mosaic_0001>
module attributes {stable_mosaic.version = 11 : i64} {
  func.func @_direct_conv_kernel(%arg0: i32, %arg1: i32, %arg2: memref<1x456x32xbf16, #tpu.memory_space<vmem>>, %arg3: memref<9x32x128xbf16, #tpu.memory_space<vmem>>, %arg4: memref<1x128xf32, #tpu.memory_space<vmem>>, %arg5: memref<1x16x16x128xbf16, #tpu.memory_space<vmem>>, %arg6: memref<1x16x16x128xf32, #tpu.memory_space<vmem>>) attributes {dimension_semantics = [#tpu.dimension_semantics<parallel>, #tpu.dimension_semantics<parallel>], iteration_bounds = array<i64: 2, 1>, scalar_prefetch = 0 : i64, scratch_operands = 0 : i64, tpu.core_type = #tpu.core_type<tc>, window_params = [{transform_indices = @transform_0, window_bounds = array<i64: 1, 456, 32>}, {transform_indices = @transform_1, window_bounds = array<i64: 9, 32, 128>}, {transform_indices = @transform_2, window_bounds = array<i64: 1, 128>}, {transform_indices = @transform_3, window_bounds = array<i64: 1, 16, 16, 128>}, {transform_indices = @transform_4, window_bounds = array<i64: 1, 16, 16, 128>}]} {
    %c0 = arith.constant 0 : index
    %c0_0 = arith.constant 0 : index
    %c0_1 = arith.constant 0 : index
    %0 = vector.load %arg2[%c0, %c0_0, %c0_1] : memref<1x456x32xbf16, #tpu.memory_space<vmem>>, vector<1x384x32xbf16>
    %1 = vector.shape_cast %0 : vector<1x384x32xbf16> to vector<384x32xbf16>
    %c0_2 = arith.constant 0 : index
    %c0_3 = arith.constant 0 : index
    %c0_4 = arith.constant 0 : index
    %2 = vector.load %arg3[%c0_2, %c0_3, %c0_4] : memref<9x32x128xbf16, #tpu.memory_space<vmem>>, vector<1x32x128xbf16>
    %3 = vector.shape_cast %2 : vector<1x32x128xbf16> to vector<32x128xbf16>
    %cst = arith.constant dense<0.000000e+00> : vector<384x128xf32>
    %4 = tpu.matmul %1, %3, %cst {dimension_numbers = #tpu.dot_dimension_numbers<[1], [0], [0], [1], [0, 0, 1, 1], [], []>} : vector<384x32xbf16>, vector<32x128xbf16>, vector<384x128xf32> -> vector<384x128xf32>
    %c0_5 = arith.constant 0 : index
    %c1 = arith.constant 1 : index
    %c0_6 = arith.constant 0 : index
    %5 = vector.load %arg2[%c0_5, %c1, %c0_6] : memref<1x456x32xbf16, #tpu.memory_space<vmem>>, vector<1x384x32xbf16>
    %6 = vector.shape_cast %5 : vector<1x384x32xbf16> to vector<384x32xbf16>
    %c1_7 = arith.constant 1 : index
    %c0_8 = arith.constant 0 : index
    %c0_9 = arith.constant 0 : index
    %7 = vector.load %arg3[%c1_7, %c0_8, %c0_9] : memref<9x32x128xbf16, #tpu.memory_space<vmem>>, vector<1x32x128xbf16>
    %8 = vector.shape_cast %7 : vector<1x32x128xbf16> to vector<32x128xbf16>
    %cst_10 = arith.constant dense<0.000000e+00> : vector<384x128xf32>
    %9 = tpu.matmul %6, %8, %cst_10 {dimension_numbers = #tpu.dot_dimension_numbers<[1], [0], [0], [1], [0, 0, 1, 1], [], []>} : vector<384x32xbf16>, vector<32x128xbf16>, vector<384x128xf32> -> vector<384x128xf32>
    %10 = arith.addf %4, %9 : vector<384x128xf32>
    %c0_11 = arith.constant 0 : index
    %c2 = arith.constant 2 : index
    %c0_12 = arith.constant 0 : index
    %11 = vector.load %arg2[%c0_11, %c2, %c0_12] : memref<1x456x32xbf16, #tpu.memory_space<vmem>>, vector<1x384x32xbf16>
    %12 = vector.shape_cast %11 : vector<1x384x32xbf16> to vector<384x32xbf16>
    %c2_13 = arith.constant 2 : index
    %c0_14 = arith.constant 0 : index
    %c0_15 = arith.constant 0 : index
    %13 = vector.load %arg3[%c2_13, %c0_14, %c0_15] : memref<9x32x128xbf16, #tpu.memory_space<vmem>>, vector<1x32x128xbf16>
    %14 = vector.shape_cast %13 : vector<1x32x128xbf16> to vector<32x128xbf16>
    %cst_16 = arith.constant dense<0.000000e+00> : vector<384x128xf32>
    %15 = tpu.matmul %12, %14, %cst_16 {dimension_numbers = #tpu.dot_dimension_numbers<[1], [0], [0], [1], [0, 0, 1, 1], [], []>} : vector<384x32xbf16>, vector<32x128xbf16>, vector<384x128xf32> -> vector<384x128xf32>
    %16 = arith.addf %10, %15 : vector<384x128xf32>
    %c0_17 = arith.constant 0 : index
    %c24 = arith.constant 24 : index
    %c0_18 = arith.constant 0 : index
    %17 = vector.load %arg2[%c0_17, %c24, %c0_18] : memref<1x456x32xbf16, #tpu.memory_space<vmem>>, vector<1x384x32xbf16>
    %18 = vector.shape_cast %17 : vector<1x384x32xbf16> to vector<384x32xbf16>
    %c3 = arith.constant 3 : index
    %c0_19 = arith.constant 0 : index
    %c0_20 = arith.constant 0 : index
    %19 = vector.load %arg3[%c3, %c0_19, %c0_20] : memref<9x32x128xbf16, #tpu.memory_space<vmem>>, vector<1x32x128xbf16>
    %20 = vector.shape_cast %19 : vector<1x32x128xbf16> to vector<32x128xbf16>
    %cst_21 = arith.constant dense<0.000000e+00> : vector<384x128xf32>
    %21 = tpu.matmul %18, %20, %cst_21 {dimension_numbers = #tpu.dot_dimension_numbers<[1], [0], [0], [1], [0, 0, 1, 1], [], []>} : vector<384x32xbf16>, vector<32x128xbf16>, vector<384x128xf32> -> vector<384x128xf32>
    %22 = arith.addf %16, %21 : vector<384x128xf32>
    %c0_22 = arith.constant 0 : index
    %c25 = arith.constant 25 : index
    %c0_23 = arith.constant 0 : index
    %23 = vector.load %arg2[%c0_22, %c25, %c0_23] : memref<1x456x32xbf16, #tpu.memory_space<vmem>>, vector<1x384x32xbf16>
    %24 = vector.shape_cast %23 : vector<1x384x32xbf16> to vector<384x32xbf16>
    %c4 = arith.constant 4 : index
    %c0_24 = arith.constant 0 : index
    %c0_25 = arith.constant 0 : index
    %25 = vector.load %arg3[%c4, %c0_24, %c0_25] : memref<9x32x128xbf16, #tpu.memory_space<vmem>>, vector<1x32x128xbf16>
    %26 = vector.shape_cast %25 : vector<1x32x128xbf16> to vector<32x128xbf16>
    %cst_26 = arith.constant dense<0.000000e+00> : vector<384x128xf32>
    %27 = tpu.matmul %24, %26, %cst_26 {dimension_numbers = #tpu.dot_dimension_numbers<[1], [0], [0], [1], [0, 0, 1, 1], [], []>} : vector<384x32xbf16>, vector<32x128xbf16>, vector<384x128xf32> -> vector<384x128xf32>
    %28 = arith.addf %22, %27 : vector<384x128xf32>
    %c0_27 = arith.constant 0 : index
    %c26 = arith.constant 26 : index
    %c0_28 = arith.constant 0 : index
    %29 = vector.load %arg2[%c0_27, %c26, %c0_28] : memref<1x456x32xbf16, #tpu.memory_space<vmem>>, vector<1x384x32xbf16>
    %30 = vector.shape_cast %29 : vector<1x384x32xbf16> to vector<384x32xbf16>
    %c5 = arith.constant 5 : index
    %c0_29 = arith.constant 0 : index
    %c0_30 = arith.constant 0 : index
    %31 = vector.load %arg3[%c5, %c0_29, %c0_30] : memref<9x32x128xbf16, #tpu.memory_space<vmem>>, vector<1x32x128xbf16>
    %32 = vector.shape_cast %31 : vector<1x32x128xbf16> to vector<32x128xbf16>
    %cst_31 = arith.constant dense<0.000000e+00> : vector<384x128xf32>
    %33 = tpu.matmul %30, %32, %cst_31 {dimension_numbers = #tpu.dot_dimension_numbers<[1], [0], [0], [1], [0, 0, 1, 1], [], []>} : vector<384x32xbf16>, vector<32x128xbf16>, vector<384x128xf32> -> vector<384x128xf32>
    %34 = arith.addf %28, %33 : vector<384x128xf32>
    %c0_32 = arith.constant 0 : index
    %c48 = arith.constant 48 : index
    %c0_33 = arith.constant 0 : index
    %35 = vector.load %arg2[%c0_32, %c48, %c0_33] : memref<1x456x32xbf16, #tpu.memory_space<vmem>>, vector<1x384x32xbf16>
    %36 = vector.shape_cast %35 : vector<1x384x32xbf16> to vector<384x32xbf16>
    %c6 = arith.constant 6 : index
    %c0_34 = arith.constant 0 : index
    %c0_35 = arith.constant 0 : index
    %37 = vector.load %arg3[%c6, %c0_34, %c0_35] : memref<9x32x128xbf16, #tpu.memory_space<vmem>>, vector<1x32x128xbf16>
    %38 = vector.shape_cast %37 : vector<1x32x128xbf16> to vector<32x128xbf16>
    %cst_36 = arith.constant dense<0.000000e+00> : vector<384x128xf32>
    %39 = tpu.matmul %36, %38, %cst_36 {dimension_numbers = #tpu.dot_dimension_numbers<[1], [0], [0], [1], [0, 0, 1, 1], [], []>} : vector<384x32xbf16>, vector<32x128xbf16>, vector<384x128xf32> -> vector<384x128xf32>
    %40 = arith.addf %34, %39 : vector<384x128xf32>
    %c0_37 = arith.constant 0 : index
    %c49 = arith.constant 49 : index
    %c0_38 = arith.constant 0 : index
    %41 = vector.load %arg2[%c0_37, %c49, %c0_38] : memref<1x456x32xbf16, #tpu.memory_space<vmem>>, vector<1x384x32xbf16>
    %42 = vector.shape_cast %41 : vector<1x384x32xbf16> to vector<384x32xbf16>
    %c7 = arith.constant 7 : index
    %c0_39 = arith.constant 0 : index
    %c0_40 = arith.constant 0 : index
    %43 = vector.load %arg3[%c7, %c0_39, %c0_40] : memref<9x32x128xbf16, #tpu.memory_space<vmem>>, vector<1x32x128xbf16>
    %44 = vector.shape_cast %43 : vector<1x32x128xbf16> to vector<32x128xbf16>
    %cst_41 = arith.constant dense<0.000000e+00> : vector<384x128xf32>
    %45 = tpu.matmul %42, %44, %cst_41 {dimension_numbers = #tpu.dot_dimension_numbers<[1], [0], [0], [1], [0, 0, 1, 1], [], []>} : vector<384x32xbf16>, vector<32x128xbf16>, vector<384x128xf32> -> vector<384x128xf32>
    %46 = arith.addf %40, %45 : vector<384x128xf32>
    %c0_42 = arith.constant 0 : index
    %c50 = arith.constant 50 : index
    %c0_43 = arith.constant 0 : index
    %47 = vector.load %arg2[%c0_42, %c50, %c0_43] : memref<1x456x32xbf16, #tpu.memory_space<vmem>>, vector<1x384x32xbf16>
    %48 = vector.shape_cast %47 : vector<1x384x32xbf16> to vector<384x32xbf16>
    %c8 = arith.constant 8 : index
    %c0_44 = arith.constant 0 : index
    %c0_45 = arith.constant 0 : index
    %49 = vector.load %arg3[%c8, %c0_44, %c0_45] : memref<9x32x128xbf16, #tpu.memory_space<vmem>>, vector<1x32x128xbf16>
    %50 = vector.shape_cast %49 : vector<1x32x128xbf16> to vector<32x128xbf16>
    %cst_46 = arith.constant dense<0.000000e+00> : vector<384x128xf32>
    %51 = tpu.matmul %48, %50, %cst_46 {dimension_numbers = #tpu.dot_dimension_numbers<[1], [0], [0], [1], [0, 0, 1, 1], [], []>} : vector<384x32xbf16>, vector<32x128xbf16>, vector<384x128xf32> -> vector<384x128xf32>
    %52 = arith.addf %46, %51 : vector<384x128xf32>
    %c0_47 = arith.constant 0 : index
    %c0_48 = arith.constant 0 : index
    %53 = vector.load %arg4[%c0_47, %c0_48] : memref<1x128xf32, #tpu.memory_space<vmem>>, vector<1x128xf32>
    %54 = vector.broadcast %53 : vector<1x128xf32> to vector<384x128xf32>
    %55 = arith.addf %52, %54 : vector<384x128xf32>
    %56 = vector.shape_cast %55 : vector<384x128xf32> to vector<16x24x128xf32>
    %57 = vector.extract_strided_slice %56 {offsets = [0, 0, 0], sizes = [16, 16, 128], strides = [1, 1, 1]} : vector<16x24x128xf32> to vector<16x16x128xf32>
    %c0_49 = arith.constant 0 : index
    %c0_50 = arith.constant 0 : index
    %c0_51 = arith.constant 0 : index
    %c0_52 = arith.constant 0 : index
    %58 = vector.load %arg5[%c0_49, %c0_50, %c0_51, %c0_52] : memref<1x16x16x128xbf16, #tpu.memory_space<vmem>>, vector<1x16x16x128xbf16>
    %59 = vector.shape_cast %58 : vector<1x16x16x128xbf16> to vector<16x16x128xbf16>
    %60 = arith.extf %59 : vector<16x16x128xbf16> to vector<16x16x128xf32>
    %61 = arith.addf %57, %60 : vector<16x16x128xf32>
    %cst_53 = arith.constant 0.000000e+00 : f32
    %62 = vector.broadcast %cst_53 : f32 to vector<16x16x128xf32>
    %63 = arith.maximumf %61, %62 : vector<16x16x128xf32>
    %c0_54 = arith.constant 0 : index
    %c0_55 = arith.constant 0 : index
    %c0_56 = arith.constant 0 : index
    %c0_57 = arith.constant 0 : index
    %64 = vector.load %arg6[%c0_54, %c0_55, %c0_56, %c0_57] : memref<1x16x16x128xf32, #tpu.memory_space<vmem>>, vector<1x16x16x128xf32>
    %65 = vector.shape_cast %64 : vector<1x16x16x128xf32> to vector<16x16x128xf32>
    %66 = vector.shape_cast %63 : vector<16x16x128xf32> to vector<1x16x16x128xf32>
    tpu.vector_store %arg6[%c0_54, %c0_55, %c0_56, %c0_57], %66 {strides = array<i32>} : memref<1x16x16x128xf32, #tpu.memory_space<vmem>>, vector<1x16x16x128xf32>,
    return
  }
  func.func @transform_0(%arg0: i32, %arg1: i32) -> (i32, i32, i32) {
    %c0_i32 = arith.constant 0 : i32
    %c0_i32_0 = arith.constant 0 : i32
    %c0_i32_1 = arith.constant 0 : i32
    return %arg0, %c0_i32, %c0_i32_0 : i32, i32, i32
  }
  func.func @transform_1(%arg0: i32, %arg1: i32) -> (i32, i32, i32) {
    %c0_i32 = arith.constant 0 : i32
    %c0_i32_0 = arith.constant 0 : i32
    %c0_i32_1 = arith.constant 0 : i32
    return %c0_i32, %c0_i32_0, %arg1 : i32, i32, i32
  }
  func.func @transform_2(%arg0: i32, %arg1: i32) -> (i32, i32) {
    %c0_i32 = arith.constant 0 : i32
    %c0_i32_0 = arith.constant 0 : i32
    return %c0_i32, %arg1 : i32, i32
  }
  func.func @transform_3(%arg0: i32, %arg1: i32) -> (i32, i32, i32, i32) {
    %c0_i32 = arith.constant 0 : i32
    %c0_i32_0 = arith.constant 0 : i32
    %c0_i32_1 = arith.constant 0 : i32
    return %arg0, %c0_i32, %c0_i32_0, %arg1 : i32, i32, i32, i32
  }
  func.func @transform_4(%arg0: i32, %arg1: i32) -> (i32, i32, i32, i32) {
    %c0_i32 = arith.constant 0 : i32
    %c0_i32_0 = arith.constant 0 : i32
    %c0_i32_1 = arith.constant 0 : i32
    return %arg0, %c0_i32, %c0_i32_0, %arg1 : i32, i32, i32, i32
  }
}

</mosaic_0001>

<bundles_post_ra>
// kernel: tpu_custom_call.1
= control target key start
LH: loop header
LB: loop body
LE: loop exit
PB: predicated region body
PF: predicated region fallthrough
CT: control target
= control target key end

     0   :  { %9 = vsyncpa [#allocation3], 0  ;;  %s8097_s0 = inlined_call_operand.vmem [shape: bf16[2,456,32], index: 0, kind: input, shape index: {}]   ;;  %s8098_s1 = inlined_call_operand.vmem [shape: bf16[9,32,128], index: 1, kind: input, shape index: {}]   ;;  %s8099_s2 = inlined_call_operand.vmem [shape: f32[1,128], index: 2, kind: input, shape index: {}]   ;;  %s8100_s3 = inlined_call_operand.vmem [shape: bf16[2,16,16,128], index: 3, kind: input, shape index: {}]   ;;  %s8101_s4 = inlined_call_operand.hbm [shape: f32[2,16,16,128], index: 4, kind: output, shape index: {}]  }
   0x1   :  { %11 = vsyncpa [#allocation3 + $0x1], 0  ;;  %s6591_s15 = smov 0   ;;  %s6593_s16 = smov 0  }
   0x2   :  { %s6595_s17 = smov 0   ;;  %s6597_s18 = smov 0  }
   0x3   :  { %s6599_s19 = smov 0   ;;  %s6601_s20 = smov 0  }
   0x4 LB: > { %s5087_s21 = sadd.s32 4294967295, %s6561_s20   ;;  %s5088_s22 = sadd.s32 4294967294, %s6561_s20   ;;  %s6561_s20 = sphi %s6601_s20, %s17_s20   ;;  %s6557_s19 = sphi %s6599_s19, %s8123_s19   ;;  %s6553_s18 = sphi %s6597_s18, %s8122_s18   ;;  %s6549_s17 = sphi %s6595_s17, %s8121_s17   ;;  %s6545_s16 = sphi %s6593_s16, %s8120_s16   ;;  %s6541_s15 = sphi %s6591_s15, %s8119_s15  }
   0x5   : > { %s29_s23 = sadd.s32 1, %s6557_s19  ;;  %s144_s24 = sadd.s32 1, %s6549_s17 }
   0x6   : > { %p31_p0 = scmp.ge.s32.totalorder %s29_s23, 2  ;;  %p154_p1 = scmp.ne.s32.totalorder %s6549_s17, %s6545_s16 }
   0x7   : > { %p155_p2 = scmp.eq.s32.totalorder %s5087_s21, 1  ;;  %p160_p3 = scmp.ne.s32.totalorder %s6545_s16, %s6541_s15 }
   0x8   : > { %s8125_s23 = smov (%p31_p0, %s29_s23), 0  ;;  %p161_p5 = scmp.eq.s32.totalorder %s5088_s22, 1 }
   0x9   : > { %p6631_p4 = por %p155_p2, %p154_p1  ;;  %s139_s26 = ssub.s32 %s6557_s19, %s8125_s23 }
   0xa   : > { %p5093_p6 = scmp.ge.s32.totalorder %s6561_s20, 1  ;;  %p142_p7 = scmp.eq.s32.totalorder %s139_s26, 0 }
   0xb   : > { %p6638_p8 = por %p161_p5, %p160_p3  ;;  %p211_p9 = scmp.lt.s32.totalorder %s6561_s20, 3 }
   0xc   : > { %s6644_s28 = scalar_select %p142_p7, %s6549_s17, %s144_s24  }
   0xd   : > { %p212_p10 = pnand %p5093_p6, %p211_p9 }
   0xf   : > { %215 = sbr.rel (%p212_p10) target bundleno = 684 (0x2ac), region = 36 }
  0x14   : > { %v6341_v0 = vld [vmem:[%s8098_s1 + $0x18] sm:$0xff]   ;;  %p252_p11 = scmp.lt.s32.totalorder %s6553_s18, 1  ;;  %v6342_v1 = vld [vmem:[%s8098_s1 + $0x10] sm:$0xff]   ;;  %v6659_v2 = vld [vmem:[%s8098_s1 + $0x8] sm:$0xff]   ;;  %vm454_vm0 = vsmask.f32 7424 }
  0x15   : > { %6279 = vmatprep.subr.bf16.mxu1 %v6341_v0  ;;  %5811 = vmatprep.subr.bf16.mxu0 %v6341_v0  ;;  %v6350_v3 = vld [vmem:[%s8098_s1 + $0x28] sm:$0xff]   ;;  %vm663_vm1 = vcmask 261120   ;;  %v6364_v27 = vld [vmem:[%s8098_s1 + $0x20] sm:$0xff]   ;;  %vm1223_vm2 = vcmask 1046528   ;;  %s5497_s8 = sshll.u32 %s6553_s18, 12 }
  0x16   : > { %s6654_s7 = scalar_select %p252_p11, %s6553_s18, 1  ;;  %6281 = vmatpush3.bf16.msra.mxu1 %v6341_v0  ;;  %5812 = vmatpush3.bf16.msra.mxu0 %v6341_v0  ;;  %v6361_v38 = vld [vmem:[%s8098_s1] sm:$0xff]  }
  0x17   : > { %6280 = vmatprep.subr.bf16.mxu1 %v6342_v1  ;;  %5813 = vmatprep.subr.bf16.mxu0 %v6342_v1  ;;  %s8045_s12 = scalar_lea.hbm %s8101_s4, %s5497_s8  ;;  %s6563_s18 = smov [#allocation2]  }
  0x18   : > { %s6283_s10 = smul.u32 228, %s6654_s7 }
  0x1a   : > { %s6668_s21 = scalar_lea.vmem %s8097_s0, %s6283_s10  ;;  %6282 = vmatpush3.bf16.msra.mxu1 %v6342_v1  ;;  %5814 = vmatpush3.bf16.msra.mxu0 %v6342_v1 }
  0x1b   : > { %v273_v4 = vld [vmem:[%s6668_s21] sm:$0xf]  ;;  %v6672_v5 = vld [vmem:[%s6668_s21 + $0x4] sm:$0xf]  ;;  %v6678_v7 = vld [vmem:[%s6668_s21 + $0x8] sm:$0xff]   ;;  %5863 = vmatprep.subr.bf16.mxu1 %v6659_v2  ;;  %5915 = vmatprep.subr.bf16.mxu0 %v6350_v3 }
  0x1c   : > { %v6675_v6 = vcombine.low %v273_v4, %v6672_v5  ;;  %v463_v10 = vshll.u32 %v6678_v7, 16  ;;  %v467_v11 = vshrl.u32 %v6678_v7, 16  ;;  %v6686_v12 = vld [vmem:[%s6668_s21 + $0x60] sm:$0xff]   ;;  %v6689_v13 = vld [vmem:[%s6668_s21 + $0x68] sm:$0xff]   ;;  %v6692_v14 = vld [vmem:[%s6668_s21 + $0x10] sm:$0xff]  }
  0x1d   : > { %v551_v17 = vshll.u32 %v6686_v12, 16  ;;  %v555_v18 = vshrl.u32 %v6686_v12, 16  ;;  %v559_v19 = vshll.u32 %v6689_v13, 16  ;;  %v563_v20 = vshrl.u32 %v6689_v13, 16  ;;  %v6700_v22 = vld [vmem:[%s6668_s21 + $0x70] sm:$0xff]   ;;  %v6705_v26 = vld [vmem:[%s6668_s21 + $0x18] sm:$0xff]  }
  0x1e   : > { %v456_v8 = vshrl.u32 %v6675_v6, 16  ;;  %v458_v9 = vshll.u32 %v6675_v6, 16  ;;  %v465_v16 = vrot.slane %v463_v10, 1  ;;  %v471_v21 = vshll.u32 %v6692_v14, 16  ;;  %v6716_v35 = vld [vmem:[%s6668_s21 + $0x78] sm:$0xff]   ;;  %v6720_v37 = vld [vmem:[%s6668_s21 + $0x20] sm:$0xff]  }
  0x1f   : > { %v6702_v25 = vrot.slane %v551_v17, 1  ;;  %v561_v28 = vrot.slane %v559_v19, 1  ;;  %v567_v30 = vshll.u32 %v6700_v22, 16  ;;  %v475_v31 = vshrl.u32 %v6692_v14, 16  ;;  %v6728_v43 = vld [vmem:[%s6668_s21 + $0x80] sm:$0xff]   ;;  %v6735_v48 = vld [vmem:[%s6668_s21 + $0x28] sm:$0xff]  }
  0x20   : > { %v460_v15 = vrot.slane %v458_v9, 1  ;;  %v469_v24 = vor.u32 %v467_v11, %v465_v16  ;;  %v473_v29 = vrot.slane %v471_v21, 1  ;;  %v479_v34 = vshll.u32 %v6705_v26, 16  ;;  %v6749_v60 = vld [vmem:[%s6668_s21 + $0x88] sm:$0xff]   ;;  %v6760_v9 = vld [vmem:[%s6668_s21 + $0x90] sm:$0xff]   ;;  %v6769_v21 = vld [vmem:[%s6668_s21 + $0x38] sm:$0xff]  }
  0x21   : > { %v557_v33 = vor.u32 %v555_v18, %v6702_v25  ;;  %v571_v36 = vshrl.u32 %v6700_v22, 16  ;;  %v565_v39 = vor.u32 %v563_v20, %v561_v28  ;;  %v569_v41 = vrot.slane %v567_v30, 1 }
  0x22   : > { %v461_v23 = vor.u32 %v460_v15, %v456_v8  ;;  %v474_v40 = vsel %vm454_vm0, %v469_v24, %v473_v29  ;;  %v477_v42 = vor.u32 %v475_v31, %v473_v29  ;;  %v481_v45 = vrot.slane %v479_v34, 1  ;;  %v6757_v8 = vld [vmem:[%s6668_s21 + $0x30] sm:$0xff]   ;;  %v6774_v24 = vld [vmem:[%s6668_s21 + $0x98] sm:$0xff]   ;;  %v6783_v34 = vld [vmem:[%s6668_s21 + $0x40] sm:$0xff]  }
  0x23   : > { %v562_v44 = vsel %vm454_vm0, %v557_v33, %v561_v28  ;;  %v575_v46 = vshll.u32 %v6716_v35, 16  ;;  %v483_v47 = vshrl.u32 %v6705_v26, 16  ;;  %v570_v49 = vsel %vm454_vm0, %v565_v39, %v569_v41 }
  0x24   : > { %v466_v32 = vsel %vm454_vm0, %v461_v23, %v465_v16  ;;  %5839 = vmatprep.mubr.msk.bf16.mxu1 %vm663_vm1, %v562_v44  ;;  %v573_v50 = vor.u32 %v571_v36, %v569_v41  ;;  %v487_v51 = vshll.u32 %v6720_v37, 16  ;;  %v579_v52 = vshrl.u32 %v6716_v35, 16  ;;  %v6786_v36 = vld [vmem:[%s6668_s21 + $0xa0] sm:$0xff]  }
  0x25   : > { %5815 = vmatprep.mubr.msk.bf16.mxu0 %vm663_vm1, %v466_v32  ;;  %5840 = vmatmul.mubr.msk.bf16.vlgmr.msra.gmra.mxu1 %vm663_vm1, %v570_v49  ;;  %v482_v53 = vsel %vm454_vm0, %v477_v42, %v481_v45  ;;  %v577_v54 = vrot.slane %v575_v46, 1  ;;  %v485_v55 = vor.u32 %v483_v47, %v481_v45  ;;  %v583_v56 = vshll.u32 %v6728_v43, 16  ;;  %v6794_v46 = vld [vmem:[%s6668_s21 + $0xa8] sm:$0xff]  }
  0x26   : > { %5816 = vmatmul.mubr.msk.bf16.vlgmr.msra.gmra.mxu0 %vm663_vm1, %v474_v40  ;;  %5864 = vmatpush3.bf16.msra.mxu1 %v6659_v2  ;;  %v489_v57 = vrot.slane %v487_v51, 1  ;;  %v491_v58 = vshrl.u32 %v6720_v37, 16  ;;  %v495_v59 = vshll.u32 %v6735_v48, 16  ;;  %v587_v0 = vshrl.u32 %v6728_v43, 16  ;;  %v6790_v40 = vld [vmem:[%s6668_s21 + $0x48] sm:$0xff]  }
  0x27   : > { %5916 = vmatpush3.bf16.msra.mxu0 %v6350_v3  ;;  %5819 = vmatprep.mubr.msk.bf16.mxu0 %vm663_vm1, %v482_v53  ;;  %v578_v61 = vsel %vm454_vm0, %v573_v50, %v577_v54  ;;  %v581_v62 = vor.u32 %v579_v52, %v577_v54  ;;  %v585_v63 = vrot.slane %v583_v56, 1  ;;  %v591_v4 = vshll.u32 %v6749_v60, 16 }
  0x28   : > { %5917 = vmatprep.subr.bf16.mxu0 %v6364_v27  ;;  %5865 = vmatprep.subr.bf16.mxu1 %v6361_v38  ;;  %v490_v1 = vsel %vm454_vm0, %v485_v55, %v489_v57  ;;  %v493_v2 = vor.u32 %v491_v58, %v489_v57  ;;  %v497_v3 = vrot.slane %v495_v59, 1  ;;  %v499_v15 = vshrl.u32 %v6735_v48, 16  ;;  %v6806_v57 = vld [vmem:[%s6668_s21 + $0x50] sm:$0xff]  }
  0x29   : > { %5843 = vmatprep.mubr.msk.bf16.mxu1 %vm663_vm1, %v578_v61  ;;  %v586_v10 = vsel %vm454_vm0, %v581_v62, %v585_v63  ;;  %v589_v11 = vor.u32 %v587_v0, %v585_v63  ;;  %v595_v16 = vshrl.u32 %v6749_v60, 16  ;;  %v593_v18 = vrot.slane %v591_v4, 1  ;;  %v6813_v63 = vld [vmem:[%s6668_s21 + $0xb0] sm:$0xff]  }
  0x2a   : > { %v498_v17 = vsel %vm454_vm0, %v493_v2, %v497_v3  ;;  %v503_v19 = vshll.u32 %v6757_v8, 16  ;;  %v599_v20 = vshll.u32 %v6760_v9, 16  ;;  %5866 = vmatpush3.bf16.msra.mxu1 %v6361_v38  ;;  %v507_v23 = vshrl.u32 %v6757_v8, 16 }
  0x2b   : > { %5918 = vmatpush3.bf16.msra.mxu0 %v6364_v27  ;;  %v594_v27 = vsel %vm454_vm0, %v589_v11, %v593_v18  ;;  %v501_v28 = vor.u32 %v499_v15, %v497_v3  ;;  %v511_v31 = vshll.u32 %v6769_v21, 16  ;;  %v603_v32 = vshrl.u32 %v6760_v9, 16  ;;  %v6817_v3 = vld [vmem:[%s6668_s21 + $0x58] sm:$0xff]  }
  0x2c   : > { %v505_v29 = vrot.slane %v503_v19, 1  ;;  %v601_v30 = vrot.slane %v599_v20, 1  ;;  %v607_v33 = vshll.u32 %v6774_v24, 16  ;;  %v597_v38 = vor.u32 %v595_v16, %v593_v18  ;;  %v6822_v11 = vld [vmem:[%s6668_s21 + $0xb8] sm:$0xff]  }
  0x2d   : > { %5844 = vmatmul.mubr.msk.bf16.gmra.mxu1 %vm663_vm1, %v586_v10  ;;  %v513_v41 = vrot.slane %v511_v31, 1  ;;  %v519_v45 = vshll.u32 %v6783_v34, 16  ;;  %v515_v49 = vshrl.u32 %v6769_v21, 16  ;;  %v615_v50 = vshll.u32 %v6786_v36, 16 }
  0x2e   : > { %5820 = vmatmul.mubr.msk.bf16.gmra.mxu0 %vm663_vm1, %v490_v1  ;;  %5847 = vmatprep.mubr.msk.bf16.mxu1 %vm663_vm1, %v594_v27  ;;  %v509_v39 = vor.u32 %v507_v23, %v505_v29  ;;  %v605_v42 = vor.u32 %v603_v32, %v601_v30  ;;  %v609_v44 = vrot.slane %v607_v33, 1  ;;  %v506_v47 = vsel %vm454_vm0, %v501_v28, %v505_v29 }
  0x2f   : > { %5823 = vmatprep.mubr.msk.bf16.mxu0 %vm663_vm1, %v498_v17  ;;  %v523_v52 = vshrl.u32 %v6783_v34, 16  ;;  %v527_v53 = vshll.u32 %v6790_v40, 16  ;;  %v602_v54 = vsel %vm454_vm0, %v597_v38, %v601_v30  ;;  %v611_v55 = vshrl.u32 %v6774_v24, 16  ;;  %v6827_v17 = vld [vmem:[%s8098_s1 + $0x38] sm:$0xff]   ;;  %v6374_v38 = vld [vmem:[%s8098_s1 + $0x48] sm:$0xff]  }
  0x30   : > { %v514_v51 = vsel %vm454_vm0, %v509_v39, %v513_v41  ;;  %v619_v56 = vshrl.u32 %v6786_v36, 16  ;;  %v610_v58 = vsel %vm454_vm0, %v605_v42, %v609_v44  ;;  %v521_v59 = vrot.slane %v519_v45, 1  ;;  %5967 = vmatprep.subr.bf16.mxu1 %v6827_v17  ;;  %6019 = vmatprep.subr.bf16.mxu0 %v6374_v38 }
  0x31   : > { %v623_v61 = vshll.u32 %v6794_v46, 16  ;;  %v517_v62 = vor.u32 %v515_v49, %v513_v41  ;;  %v617_v0 = vrot.slane %v615_v50, 1  ;;  %v529_v2 = vrot.slane %v527_v53, 1  ;;  %v1214_v50 = vld [vmem:[%s6668_s21] sm:$0xe] }
  0x32   : > { %v525_v1 = vor.u32 %v523_v52, %v521_v59  ;;  %v613_v4 = vor.u32 %v611_v55, %v609_v44  ;;  %v535_v10 = vshll.u32 %v6806_v57, 16  ;;  %v531_v19 = vshrl.u32 %v6790_v40, 16 }
  0x33   : > { %v621_v15 = vor.u32 %v619_v56, %v617_v0  ;;  %v625_v16 = vrot.slane %v623_v61, 1  ;;  %v522_v18 = vsel %vm454_vm0, %v517_v62, %v521_v59  ;;  %v631_v20 = vshll.u32 %v6813_v63, 16 }
  0x34   : > { %v530_v23 = vsel %vm454_vm0, %v525_v1, %v529_v2  ;;  %v627_v27 = vshrl.u32 %v6794_v46, 16  ;;  %v539_v28 = vshrl.u32 %v6806_v57, 16  ;;  %v543_v29 = vshll.u32 %v6817_v3, 16 }
  0x35   : > { %5848 = vmatmul.mubr.msk.bf16.gmra.mxu1 %vm663_vm1, %v602_v54  ;;  %v618_v30 = vsel %vm454_vm0, %v613_v4, %v617_v0  ;;  %v537_v31 = vrot.slane %v535_v10, 1  ;;  %v635_v32 = vshrl.u32 %v6813_v63, 16  ;;  %v639_v33 = vshll.u32 %v6822_v11, 16 }
  0x36   : > { %5824 = vmatmul.mubr.msk.bf16.gmra.mxu0 %vm663_vm1, %v506_v47  ;;  %5851 = vmatprep.mubr.msk.bf16.mxu1 %vm663_vm1, %v610_v58  ;;  %v626_v39 = vsel %vm454_vm0, %v621_v15, %v625_v16  ;;  %v533_v41 = vor.u32 %v531_v19, %v529_v2  ;;  %v633_v42 = vrot.slane %v631_v20, 1  ;;  %v545_v45 = vrot.slane %v543_v29, 1  ;;  %v6848_v47 = vld [vmem:[%s6668_s21 + $0xc0] ss:$0 sps:$4 sm:$0x11]   ;;  %v6893_v29 = vld [vmem:[%s8098_s1 + $0x68] sm:$0xff]  }
  0x37   : > { %5827 = vmatprep.mubr.msk.bf16.mxu0 %vm663_vm1, %v514_v51  ;;  %v541_v44 = vor.u32 %v539_v28, %v537_v31  ;;  %v629_v49 = vor.u32 %v627_v27, %v625_v16  ;;  %v641_v52 = vrot.slane %v639_v33, 1  ;;  %v547_v54 = vshrl.u32 %v6817_v3, 16  ;;  %v6375_v27 = vld [vmem:[%s8098_s1 + $0x30] sm:$0xff]  }
  0x38   : > { %v637_v51 = vor.u32 %v635_v32, %v633_v42  ;;  %v538_v53 = vsel %vm454_vm0, %v533_v41, %v537_v31  ;;  %v5183_v56 = vcombine.low %v1214_v50, %v6672_v5  ;;  %v643_v59 = vshrl.u32 %v6822_v11, 16 }
  0x39   : > { %v546_v55 = vsel %vm454_vm0, %v541_v44, %v545_v45  ;;  %v634_v58 = vsel %vm454_vm0, %v629_v49, %v633_v42  ;;  %v647_v61 = vshll.u32 %v6848_v47, 16  ;;  %v549_v0 = vor.u32 %v547_v54, %v545_v45 }
  0x3a   : > { %v642_v62 = vsel %vm454_vm0, %v637_v51, %v641_v52  ;;  %v1224_v1 = vrot.slane %v5183_v56, 1  ;;  %v1225_v2 = vrot.slane %v6678_v7, 1  ;;  %v645_v5 = vor.u32 %v643_v59, %v641_v52  ;;  %v6980_v56 = vld [vmem:[%s6668_s21 + $0x10] sm:$0xf] }
  0x3b   : > { %v649_v4 = vrot.slane %v647_v61, 1  ;;  %v554_v10 = vsel %vm454_vm0, %v549_v0, %v6702_v25  ;;  %v1229_v19 = vrot.slane %v6705_v26, 1  ;;  %v1231_v28 = vrot.slane %v6720_v37, 1 }
  0x3c   : > { %v1226_v15 = vsel %vm1223_vm2, %v1224_v1, %v1225_v2  ;;  %v1243_v41 = vrot.slane %v6806_v57, 1  ;;  %v1247_v44 = vrot.slane %v6686_v12, 1  ;;  %v1251_v49 = vrot.slane %v6700_v22, 1 }
  0x3d   : > { %5852 = vmatmul.mubr.msk.bf16.gmra.mxu1 %vm663_vm1, %v618_v30  ;;  %v650_v16 = vsel %vm454_vm0, %v645_v5, %v649_v4  ;;  %v6901_v30 = vld [vmem:[%s8098_s1 + $0x58] sm:$0xff]   ;;  %v1255_v51 = vrot.slane %v6728_v43, 1  ;;  %v1261_v54 = vrot.slane %v6774_v24, 1  ;;  %v1265_v59 = vrot.slane %v6794_v46, 1 }
  0x3e   : > { %5828 = vmatmul.mubr.msk.bf16.gmra.mxu0 %vm663_vm1, %v522_v18  ;;  %5855 = vmatprep.mubr.msk.bf16.mxu1 %vm663_vm1, %v626_v39  ;;  %v1227_v18 = vrot.slane %v6692_v14, 1  ;;  %v1267_v0 = vrot.slane %v6813_v63, 1  ;;  %v1269_v1 = vrot.slane %v6822_v11, 1 }
  0x3f   : > { %5831 = vmatprep.mubr.msk.bf16.mxu0 %vm663_vm1, %v530_v23  ;;  %v6376_v23 = vld [vmem:[%s8098_s1 + $0x40] sm:$0xff]  }
  0x40   : > { %v1228_v20 = vsel %vm1223_vm2, %v1225_v2, %v1227_v18  ;;  %v1230_v25 = vsel %vm1223_vm2, %v1227_v18, %v1229_v19  ;;  %v1268_v2 = vsel %vm1223_vm2, %v1265_v59, %v1267_v0  ;;  %v1270_v5 = vsel %vm1223_vm2, %v1267_v0, %v1269_v1  ;;  %v7015_v18 = vld [vmem:[%s6668_s21 + $0x24] sm:$0xff]  }
  0x45   : > { %5856 = vmatmul.mubr.msk.bf16.gmra.mxu1 %vm663_vm1, %v634_v58  ;;  %v1263_v58 = vrot.slane %v6786_v36, 1 }
  0x46   : > { %5832 = vmatmul.mubr.msk.bf16.gmra.mxu0 %vm663_vm1, %v538_v53  ;;  %5859 = vmatprep.mubr.msk.bf16.mxu1 %vm663_vm1, %v642_v62  ;;  %v1259_v53 = vrot.slane %v6760_v9, 1 }
  0x47   : > { %5835 = vmatprep.mubr.msk.bf16.mxu0 %vm663_vm1, %v546_v55  ;;  %v2096_v55 = vld [vmem:[%s6668_s21 + $0xc] sm:$0xf]  ;;  %v1266_v62 = vsel %vm1223_vm2, %v1263_v58, %v1265_v59 }
  0x48   : > { %v5268_v61 = vcombine.low %v2096_v55, %v6980_v56 }
  0x4a   : > { %v2274_v4 = vshrl.u32 %v5268_v61, 16 }
  0x4d   : > { %5860 = vmatmul.mubr.msk.bf16.gmra.mxu1 %vm663_vm1, %v650_v16  ;;  %v1271_v16 = vrot.slane %v6848_v47, 1 }
  0x4e   : > { %5836 = vmatmul.mubr.msk.bf16.gmra.mxu0 %vm663_vm1, %v554_v10  ;;  %5867 = vmatprep.mubr.msk.bf16.mxu1 %vm663_vm1, %v6675_v6  ;;  %v1233_v6 = vrot.slane %v6735_v48, 1 }
  0x4f   : > { %5919 = vmatprep.mubr.msk.bf16.mxu0 %vm663_vm1, %v1226_v15  ;;  %v7008_v15 = vld [vmem:[%s6668_s21 + $0x1c] sm:$0xff]  }
  0x50   : > { %v1234_v31 = vsel %vm1223_vm2, %v1231_v28, %v1233_v6  ;;  %v2293_v47 = vshrl.u32 %v7008_v15, 16 }
  0x55   : > { %5868 = vmatmul.mubr.msk.bf16.vlgmr.msra.gmra.mxu1 %vm663_vm1, %v6678_v7  ;;  %v1232_v7 = vsel %vm1223_vm2, %v1229_v19, %v1231_v28  ;;  %v2289_v19 = vshll.u32 %v7008_v15, 16 }
  0x56   : > { %5920 = vmatmul.mubr.msk.bf16.vlgmr.msra.gmra.mxu0 %vm663_vm1, %v1228_v20  ;;  %5968 = vmatpush3.bf16.msra.mxu1 %v6827_v17  ;;  %v1237_v17 = vrot.slane %v6769_v21, 1  ;;  %v1272_v20 = vsel %vm1223_vm2, %v1269_v1, %v1271_v16 }
  0x57   : > { %6020 = vmatpush3.bf16.msra.mxu0 %v6374_v38  ;;  %5923 = vmatprep.mubr.msk.bf16.mxu0 %vm663_vm1, %v1230_v25  ;;  %v1239_v38 = vrot.slane %v6783_v34, 1  ;;  %v2291_v28 = vrot.slane %v2289_v19, 1 }
  0x58   : > { %6021 = vmatprep.subr.bf16.mxu0 %v6376_v23  ;;  %5871 = vmatprep.mubr.msk.bf16.mxu1 %vm663_vm1, %v6692_v14  ;;  %v1235_v14 = vrot.slane %v6757_v8, 1 }
  0x59   : > { %5969 = vmatprep.subr.bf16.mxu1 %v6375_v27 }
  0x5a   : > { %5970 = vmatpush3.bf16.msra.mxu1 %v6375_v27  ;;  %v1236_v32 = vsel %vm1223_vm2, %v1233_v6, %v1235_v14  ;;  %v1238_v33 = vsel %vm1223_vm2, %v1235_v14, %v1237_v17  ;;  %v6377_v27 = vld [vmem:[%s6668_s21 + $0xc] sm:$0xff]   ;;  %v7034_v14 = vld [vmem:[%s6668_s21 + $0x34] sm:$0xff]  }
  0x5b   : > { %6022 = vmatpush3.bf16.msra.mxu0 %v6376_v23  ;;  %6071 = vmatprep.subr.bf16.mxu1 %v6901_v30  ;;  %v7028_v6 = vld [vmem:[%s6668_s21 + $0x2c] sm:$0xff]  }
  0x5c   : > { %6123 = vmatprep.subr.bf16.mxu0 %v6893_v29 }
  0x5d   : > { %5872 = vmatmul.mubr.msk.bf16.gmra.mxu1 %vm663_vm1, %v6705_v26  ;;  %v1241_v26 = vrot.slane %v6790_v40, 1 }
  0x5e   : > { %5924 = vmatmul.mubr.msk.bf16.gmra.mxu0 %vm663_vm1, %v1232_v7  ;;  %5875 = vmatprep.mubr.msk.bf16.mxu1 %vm663_vm1, %v6720_v37  ;;  %v1240_v37 = vsel %vm1223_vm2, %v1237_v17, %v1239_v38  ;;  %v2295_v7 = vor.u32 %v2293_v47, %v2291_v28  ;;  %v2305_v17 = vshll.u32 %v7028_v6, 16 }
  0x5f   : > { %5927 = vmatprep.mubr.msk.bf16.mxu0 %vm663_vm1, %v1234_v31  ;;  %v1242_v39 = vsel %vm1223_vm2, %v1239_v38, %v1241_v26  ;;  %v6381_v38 = vld [vmem:[%s6668_s21 + $0x14] sm:$0xff]  }
  0x65   : > { %5876 = vmatmul.mubr.msk.bf16.gmra.mxu1 %vm663_vm1, %v6735_v48  ;;  %v1245_v48 = vrot.slane %v6817_v3, 1 }
  0x66   : > { %5928 = vmatmul.mubr.msk.bf16.gmra.mxu0 %vm663_vm1, %v1236_v32  ;;  %5879 = vmatprep.mubr.msk.bf16.mxu1 %vm663_vm1, %v6757_v8  ;;  %v1244_v8 = vsel %vm1223_vm2, %v1241_v26, %v1243_v41 }
  0x67   : > { %5931 = vmatprep.mubr.msk.bf16.mxu0 %vm663_vm1, %v1238_v33  ;;  %v1246_v42 = vsel %vm1223_vm2, %v1243_v41, %v1245_v48  ;;  %v2301_v33 = vshrl.u32 %v7015_v18, 16  ;;  %v6384_v41 = vld [vmem:[%s6668_s21 + $0x1c] sm:$0xff]  }
  0x6d   : > { %5880 = vmatmul.mubr.msk.bf16.gmra.mxu1 %vm663_vm1, %v6769_v21  ;;  %v1249_v21 = vrot.slane %v6689_v13, 1 }
  0x6e   : > { %5932 = vmatmul.mubr.msk.bf16.gmra.mxu0 %vm663_vm1, %v1240_v37  ;;  %5883 = vmatprep.mubr.msk.bf16.mxu1 %vm663_vm1, %v6783_v34  ;;  %v1248_v34 = vsel %vm1223_vm2, %v1245_v48, %v1247_v44  ;;  %v2309_v37 = vshrl.u32 %v7028_v6, 16  ;;  %v2307_v48 = vrot.slane %v2305_v17, 1 }
  0x6f   : > { %5935 = vmatprep.mubr.msk.bf16.mxu0 %vm663_vm1, %v1242_v39  ;;  %v1250_v45 = vsel %vm1223_vm2, %v1247_v44, %v1249_v21  ;;  %v6409_v39 = vld [vmem:[%s8098_s1 + $0x60] sm:$0xff]  }
  0x75   : > { %5884 = vmatmul.mubr.msk.bf16.gmra.mxu1 %vm663_vm1, %v6790_v40  ;;  %v1253_v40 = vrot.slane %v6716_v35, 1 }
  0x76   : > { %5936 = vmatmul.mubr.msk.bf16.gmra.mxu0 %vm663_vm1, %v1244_v8  ;;  %5887 = vmatprep.mubr.msk.bf16.mxu1 %vm663_vm1, %v6806_v57  ;;  %v1252_v57 = vsel %vm1223_vm2, %v1249_v21, %v1251_v49  ;;  %v7050_v8 = vld [vmem:[%s6668_s21 + $0x3c] sm:$0xff]   ;;  %v2311_v21 = vor.u32 %v2309_v37, %v2307_v48  ;;  %v6398_v37 = vld [vmem:[%s6668_s21 + $0x54] sm:$0xff]  }
  0x77   : > { %5939 = vmatprep.mubr.msk.bf16.mxu0 %vm663_vm1, %v1246_v42  ;;  %v1254_v50 = vsel %vm1223_vm2, %v1251_v49, %v1253_v40  ;;  %v6406_v42 = vld [vmem:[%s8098_s1 + $0x50] sm:$0xff]   ;;  %v7064_v49 = vld [vmem:[%s8098_s1 + $0x88] sm:$0xff]  }
  0x7d   : > { %5888 = vmatmul.mubr.msk.bf16.gmra.mxu1 %vm663_vm1, %v6817_v3  ;;  %v1257_v3 = vrot.slane %v6749_v60, 1 }
  0x7e   : > { %5940 = vmatmul.mubr.msk.bf16.gmra.mxu0 %vm663_vm1, %v1248_v34  ;;  %5891 = vmatprep.mubr.msk.bf16.mxu1 %vm663_vm1, %v6686_v12  ;;  %v1256_v12 = vsel %vm1223_vm2, %v1253_v40, %v1255_v51  ;;  %v7072_v40 = vld [vmem:[%s8098_s1 + $0x78] sm:$0xff]  }
  0x7f   : > { %5943 = vmatprep.mubr.msk.bf16.mxu0 %vm663_vm1, %v1250_v45  ;;  %v1258_v52 = vsel %vm1223_vm2, %v1255_v51, %v1257_v3  ;;  %v7059_v45 = vld [vmem:[%s6668_s21 + $0x44] sm:$0xff]  }
  0x80   : > { %v6386_v51 = vld [vmem:[%s6668_s21 + $0x24] sm:$0xff]  }
  0x85   : > { %5892 = vmatmul.mubr.msk.bf16.gmra.mxu1 %vm663_vm1, %v6689_v13  ;;  %v1260_v13 = vsel %vm1223_vm2, %v1257_v3, %v1259_v53  ;;  %v2325_v3 = vshrl.u32 %v7050_v8, 16 }
  0x86   : > { %5944 = vmatmul.mubr.msk.bf16.gmra.mxu0 %vm663_vm1, %v1252_v57  ;;  %5895 = vmatprep.mubr.msk.bf16.mxu1 %vm663_vm1, %v6700_v22  ;;  %v1262_v22 = vsel %vm1223_vm2, %v1259_v53, %v1261_v54 }
  0x87   : > { %5947 = vmatprep.mubr.msk.bf16.mxu0 %vm663_vm1, %v1254_v50  ;;  %v2317_v50 = vshrl.u32 %v7034_v14, 16 }
  0x8d   : > { %5896 = vmatmul.mubr.msk.bf16.gmra.mxu1 %vm663_vm1, %v6716_v35  ;;  %v6990_v35 = vld [vmem:[%s6668_s21 + $0x14] sm:$0xff]  }
  0x8e   : > { %5948 = vmatmul.mubr.msk.bf16.gmra.mxu0 %vm663_vm1, %v1256_v12  ;;  %5899 = vmatprep.mubr.msk.bf16.mxu1 %vm663_vm1, %v6728_v43  ;;  %v1264_v43 = vsel %vm1223_vm2, %v1261_v54, %v1263_v58  ;;  %v2285_v25 = vshrl.u32 %v6990_v35, 16  ;;  %v2329_v12 = vshll.u32 %v7059_v45, 16  ;;  %v7084_v54 = vld [vmem:[%s6668_s21 + $0x4c] sm:$0xff]   ;;  %v7090_v58 = vld [vmem:[%s6668_s21 + $0x54] sm:$0xff]  }
  0x8f   : > { %5951 = vmatprep.mubr.msk.bf16.mxu0 %vm663_vm1, %v1258_v52  ;;  %v6388_v52 = vld [vmem:[%s6668_s21 + $0x2c] sm:$0xff]   ;;  %v2337_v59 = vshll.u32 %v7084_v54, 16  ;;  %v2341_v1 = vshrl.u32 %v7084_v54, 16 }
  0x90   : > { %v2331_v55 = vrot.slane %v2329_v12, 1 }
  0x95   : > { %5900 = vmatmul.mubr.msk.bf16.gmra.mxu1 %vm663_vm1, %v6749_v60  ;;  %v2276_v60 = vshll.u32 %v5268_v61, 16  ;;  %v2333_v61 = vshrl.u32 %v7059_v45, 16 }
  0x96   : > { %5952 = vmatmul.mubr.msk.bf16.gmra.mxu0 %vm663_vm1, %v1260_v13  ;;  %5903 = vmatprep.mubr.msk.bf16.mxu1 %vm663_vm1, %v6760_v9  ;;  %v2281_v9 = vshll.u32 %v6990_v35, 16 }
  0x97   : > { %5955 = vmatprep.mubr.msk.bf16.mxu0 %vm663_vm1, %v1262_v22  ;;  %v2278_v10 = vrot.slane %v2276_v60, 1  ;;  %v2345_v60 = vshll.u32 %v7090_v58, 16 }
  0x99   : > { %v2347_v16 = vrot.slane %v2345_v60, 1 }
  0x9d   : > { %5904 = vmatmul.mubr.msk.bf16.gmra.mxu1 %vm663_vm1, %v6774_v24  ;;  %v2279_v24 = vor.u32 %v2278_v10, %v2274_v4  ;;  %v2335_v4 = vor.u32 %v2333_v61, %v2331_v55 }
  0x9e   : > { %5956 = vmatmul.mubr.msk.bf16.gmra.mxu0 %vm663_vm1, %v1264_v43  ;;  %5907 = vmatprep.mubr.msk.bf16.mxu1 %vm663_vm1, %v6786_v36  ;;  %v2283_v36 = vrot.slane %v2281_v9, 1  ;;  %v6392_v9 = vld [vmem:[%s6668_s21 + $0x3c] sm:$0xff]  }
  0x9f   : > { %5959 = vmatprep.mubr.msk.bf16.mxu0 %vm663_vm1, %v1266_v62  ;;  %v6390_v62 = vld [vmem:[%s6668_s21 + $0x34] sm:$0xff]  }
  0xa0   : > { %v2284_v23 = vsel %vm454_vm0, %v2279_v24, %v2283_v36  ;;  %v7108_v24 = vld [vmem:[%s6668_s21 + $0x64] sm:$0xff]  }
  0xa5   : > { %5908 = vmatmul.mubr.msk.bf16.gmra.mxu1 %vm663_vm1, %v6794_v46  ;;  %v2297_v46 = vshll.u32 %v7015_v18, 16 }
  0xa6   : > { %5960 = vmatmul.mubr.msk.bf16.gmra.mxu0 %vm663_vm1, %v1268_v2  ;;  %5911 = vmatprep.mubr.msk.bf16.mxu1 %vm663_vm1, %v6813_v63  ;;  %v2287_v63 = vor.u32 %v2285_v25, %v2283_v36  ;;  %v2339_v2 = vrot.slane %v2337_v59, 1  ;;  %v6394_v25 = vld [vmem:[%s6668_s21 + $0x44] sm:$0xff]  }
  0xa7   : > { %5963 = vmatprep.mubr.msk.bf16.mxu0 %vm663_vm1, %v1270_v5  ;;  %v2299_v31 = vrot.slane %v2297_v46, 1  ;;  %v7103_v5 = vld [vmem:[%s6668_s21 + $0x5c] sm:$0xff]   ;;  %v2361_v46 = vshll.u32 %v7108_v24, 16 }
  0xa8   : > { %v2292_v32 = vsel %vm454_vm0, %v2287_v63, %v2291_v28  ;;  %v2343_v10 = vor.u32 %v2341_v1, %v2339_v2  ;;  %v2353_v36 = vshll.u32 %v7103_v5, 16  ;;  %v2340_v19 = vsel %vm454_vm0, %v2335_v4, %v2339_v2  ;;  %v7121_v63 = vld [vmem:[%s6668_s21 + $0x6c] sm:$0xff]  }
  0xa9   : > { %v2300_v26 = vsel %vm454_vm0, %v2295_v7, %v2299_v31  ;;  %v2303_v44 = vor.u32 %v2301_v33, %v2299_v31  ;;  %v2357_v47 = vshrl.u32 %v7103_v5, 16  ;;  %v2363_v17 = vrot.slane %v2361_v46, 1 }
  0xaa   : > { %v2355_v28 = vrot.slane %v2353_v36, 1  ;;  %v2369_v33 = vshll.u32 %v7121_v63, 16 }
  0xab   : > { %v2308_v57 = vsel %vm454_vm0, %v2303_v44, %v2307_v48  ;;  %v6400_v48 = vld [vmem:[%s6668_s21 + $0x5c] sm:$0xff]  }
  0xac   : > { %v2359_v31 = vor.u32 %v2357_v47, %v2355_v28  ;;  %v7139_v44 = vld [vmem:[%s6668_s21 + $0x7c] sm:$0xff]  }
  0xad   : > { %5912 = vmatmul.mubr.msk.bf16.gmra.mxu1 %vm663_vm1, %v6822_v11  ;;  %v2313_v11 = vshll.u32 %v7034_v14, 16 }
  0xae   : > { %5964 = vmatmul.mubr.msk.bf16.gmra.mxu0 %vm663_vm1, %v1272_v20  ;;  %5971 = vmatprep.mubr.msk.bf16.mxu1 %vm663_vm1, %v6377_v27  ;;  %v2349_v20 = vshrl.u32 %v7090_v58, 16  ;;  %v6396_v27 = vld [vmem:[%s6668_s21 + $0x4c] sm:$0xff]  }
  0xaf   : > { %6023 = vmatprep.mubr.msk.bf16.mxu0 %vm663_vm1, %v2284_v23  ;;  %v2315_v34 = vrot.slane %v2313_v11, 1  ;;  %v2348_v23 = vsel %vm454_vm0, %v2343_v10, %v2347_v16  ;;  %v2364_v11 = vsel %vm454_vm0, %v2359_v31, %v2363_v17 }
  0xb0   : > { %v2351_v7 = vor.u32 %v2349_v20, %v2347_v16  ;;  %v6410_v16 = vld [vmem:[%s6668_s21 + $0x7c] sm:$0xff]  }
  0xb1   : > { %v2319_v13 = vor.u32 %v2317_v50, %v2315_v34  ;;  %v2385_v50 = vshll.u32 %v7139_v44, 16  ;;  %v7175_v20 = vld [vmem:[%s6668_s21 + $0x9c] sm:$0xff]  }
  0xb5   : > { %5972 = vmatmul.mubr.msk.bf16.vlgmr.msra.gmra.mxu1 %vm663_vm1, %v6381_v38  ;;  %v2356_v38 = vsel %vm454_vm0, %v2351_v7, %v2355_v28  ;;  %v7182_v28 = vld [vmem:[%s6668_s21 + $0xa4] sm:$0xff]  }
  0xb6   : > { %6024 = vmatmul.mubr.msk.bf16.vlgmr.msra.gmra.mxu0 %vm663_vm1, %v2292_v32  ;;  %6072 = vmatpush3.bf16.msra.mxu1 %v6901_v30  ;;  %v2316_v30 = vsel %vm454_vm0, %v2311_v21, %v2315_v34  ;;  %v7126_v32 = vld [vmem:[%s6668_s21 + $0x74] sm:$0xff]  }
  0xb7   : > { %6124 = vmatpush3.bf16.msra.mxu0 %v6893_v29  ;;  %6027 = vmatprep.mubr.msk.bf16.mxu0 %vm663_vm1, %v2300_v26  ;;  %v2321_v29 = vshll.u32 %v7050_v8, 16  ;;  %v2365_v26 = vshrl.u32 %v7108_v24, 16 }
  0xb8   : > { %6125 = vmatprep.subr.bf16.mxu0 %v6409_v39  ;;  %5975 = vmatprep.mubr.msk.bf16.mxu1 %vm663_vm1, %v6384_v41  ;;  %v2377_v41 = vshll.u32 %v7126_v32, 16 }
  0xb9   : > { %6073 = vmatprep.subr.bf16.mxu1 %v6406_v42  ;;  %v2323_v53 = vrot.slane %v2321_v29, 1  ;;  %v2367_v21 = vor.u32 %v2365_v26, %v2363_v17  ;;  %v2417_v17 = vshll.u32 %v7175_v20, 16 }
  0xba   : > { %6074 = vmatpush3.bf16.msra.mxu1 %v6406_v42  ;;  %v2371_v42 = vrot.slane %v2369_v33, 1  ;;  %v2379_v29 = vrot.slane %v2377_v41, 1  ;;  %v2421_v41 = vshrl.u32 %v7175_v20, 16 }
  0xbb   : > { %6126 = vmatpush3.bf16.msra.mxu0 %v6409_v39  ;;  %6175 = vmatprep.subr.bf16.mxu1 %v7072_v40  ;;  %v2327_v22 = vor.u32 %v2325_v3, %v2323_v53  ;;  %v2324_v43 = vsel %vm454_vm0, %v2319_v13, %v2323_v53  ;;  %v2373_v39 = vshrl.u32 %v7121_v63, 16  ;;  %v6402_v3 = vld [vmem:[%s6668_s21 + $0x64] sm:$0xff]   ;;  %v6404_v13 = vld [vmem:[%s6668_s21 + $0x6c] sm:$0xff]  }
  0xbc   : > { %6227 = vmatprep.subr.bf16.mxu0 %v7064_v49 }
  0xbd   : > { %5976 = vmatmul.mubr.msk.bf16.gmra.mxu1 %vm663_vm1, %v6386_v51  ;;  %v2332_v0 = vsel %vm454_vm0, %v2327_v22, %v2331_v55  ;;  %v2375_v34 = vor.u32 %v2373_v39, %v2371_v42  ;;  %v2372_v51 = vsel %vm454_vm0, %v2367_v21, %v2371_v42  ;;  %v2387_v22 = vrot.slane %v2385_v50, 1  ;;  %v7157_v55 = vld [vmem:[%s6668_s21 + $0x8c] sm:$0xff]  }
  0xbe   : > { %6028 = vmatmul.mubr.msk.bf16.gmra.mxu0 %vm663_vm1, %v2308_v57  ;;  %5979 = vmatprep.mubr.msk.bf16.mxu1 %vm663_vm1, %v6388_v52  ;;  %v7144_v57 = vld [vmem:[%s6668_s21 + $0x84] sm:$0xff]   ;;  %v2389_v52 = vshrl.u32 %v7139_v44, 16  ;;  %v2405_v4 = vshrl.u32 %v7157_v55, 16  ;;  %v6414_v42 = vld [vmem:[%s6668_s21 + $0x8c] sm:$0xff]  }
  0xbf   : > { %6031 = vmatprep.mubr.msk.bf16.mxu0 %vm663_vm1, %v2316_v30  ;;  %v2381_v30 = vshrl.u32 %v7126_v32, 16  ;;  %v2380_v12 = vsel %vm454_vm0, %v2375_v34, %v2379_v29  ;;  %v2393_v53 = vshll.u32 %v7144_v57, 16  ;;  %v2397_v60 = vshrl.u32 %v7144_v57, 16  ;;  %v7207_v50 = vld [vmem:[%s6668_s21 + $0xac] sm:$0xff]  }
  0xc1   : > { %v2383_v59 = vor.u32 %v2381_v30, %v2379_v29  ;;  %v2395_v61 = vrot.slane %v2393_v53, 1  ;;  %v2419_v29 = vrot.slane %v2417_v17, 1  ;;  %v7216_v53 = vld [vmem:[%s6668_s21 + $0xb4] sm:$0xff]  }
  0xc3   : > { %v2388_v1 = vsel %vm454_vm0, %v2383_v59, %v2387_v22  ;;  %v2433_v59 = vshll.u32 %v7207_v50, 16 }
  0xc5   : > { %5980 = vmatmul.mubr.msk.bf16.gmra.mxu1 %vm663_vm1, %v6390_v62  ;;  %v7162_v62 = vld [vmem:[%s6668_s21 + $0x94] sm:$0xff]  }
  0xc6   : > { %6032 = vmatmul.mubr.msk.bf16.gmra.mxu0 %vm663_vm1, %v2324_v43  ;;  %5983 = vmatprep.mubr.msk.bf16.mxu1 %vm663_vm1, %v6392_v9  ;;  %v2391_v43 = vor.u32 %v2389_v52, %v2387_v22  ;;  %v6407_v9 = vld [vmem:[%s6668_s21 + $0x74] sm:$0xff]   ;;  %v2409_v10 = vshll.u32 %v7162_v62, 16 }
  0xc7   : > { %6035 = vmatprep.mubr.msk.bf16.mxu0 %vm663_vm1, %v2332_v0  ;;  %v2401_v0 = vshll.u32 %v7157_v55, 16 }
  0xc8   : > { %v2396_v2 = vsel %vm454_vm0, %v2391_v43, %v2395_v61 }
  0xcd   : > { %5984 = vmatmul.mubr.msk.bf16.gmra.mxu1 %vm663_vm1, %v6394_v25  ;;  %v2399_v25 = vor.u32 %v2397_v60, %v2395_v61  ;;  %v2429_v61 = vshrl.u32 %v7182_v28, 16  ;;  %v6416_v60 = vld [vmem:[%s6668_s21 + $0x94] sm:$0xff]  }
  0xce   : > { %6036 = vmatmul.mubr.msk.bf16.gmra.mxu0 %vm663_vm1, %v2340_v19  ;;  %5987 = vmatprep.mubr.msk.bf16.mxu1 %vm663_vm1, %v6396_v27  ;;  %v2403_v19 = vrot.slane %v2401_v0, 1  ;;  %v2411_v27 = vrot.slane %v2409_v10, 1  ;;  %v6418_v10 = vld [vmem:[%s6668_s21 + $0x9c] sm:$0xff]  }
  0xcf   : > { %6039 = vmatprep.mubr.msk.bf16.mxu0 %vm663_vm1, %v2348_v23 }
  0xd0   : > { %v2407_v46 = vor.u32 %v2405_v4, %v2403_v19  ;;  %v2404_v33 = vsel %vm454_vm0, %v2399_v25, %v2403_v19  ;;  %v2441_v4 = vshll.u32 %v7216_v53, 16  ;;  %v2435_v19 = vrot.slane %v2433_v59, 1  ;;  %v7237_v25 = vld [vmem:[%s6668_s21 + $0xbc] sm:$0xff]  }
  0xd1   : > { %v2453_v59 = vshrl.u32 %v7237_v25, 16 }
  0xd2   : > { %v2412_v39 = vsel %vm454_vm0, %v2407_v46, %v2411_v27 }
  0xd5   : > { %5988 = vmatmul.mubr.msk.bf16.gmra.mxu1 %vm663_vm1, %v6398_v37 }
  0xd6   : > { %6040 = vmatmul.mubr.msk.bf16.gmra.mxu0 %vm663_vm1, %v2356_v38  ;;  %5991 = vmatprep.mubr.msk.bf16.mxu1 %vm663_vm1, %v6400_v48  ;;  %v2413_v38 = vshrl.u32 %v7162_v62, 16  ;;  %v2425_v48 = vshll.u32 %v7182_v28, 16 }
  0xd7   : > { %6043 = vmatprep.mubr.msk.bf16.mxu0 %vm663_vm1, %v2364_v11  ;;  %v6412_v11 = vld [vmem:[%s6668_s21 + $0x84] sm:$0xff]  }
  0xd8   : > { %v2427_v52 = vrot.slane %v2425_v48, 1 }
  0xdd   : > { %5992 = vmatmul.mubr.msk.bf16.gmra.mxu1 %vm663_vm1, %v6402_v3 }
  0xde   : > { %6044 = vmatmul.mubr.msk.bf16.gmra.mxu0 %vm663_vm1, %v2372_v51  ;;  %5995 = vmatprep.mubr.msk.bf16.mxu1 %vm663_vm1, %v6404_v13  ;;  %v2415_v51 = vor.u32 %v2413_v38, %v2411_v27  ;;  %v7244_v38 = vld [vmem:[%s6668_s21 + $0xc4] sm:$0xff]  }
  0xdf   : > { %6047 = vmatprep.mubr.msk.bf16.mxu0 %vm663_vm1, %v2380_v12  ;;  %v2423_v12 = vor.u32 %v2421_v41, %v2419_v29  ;;  %v2449_v41 = vshll.u32 %v7237_v25, 16 }
  0xe0   : > { %v2420_v43 = vsel %vm454_vm0, %v2415_v51, %v2419_v29 }
  0xe5   : > { %v5841_v23 = vpop.f32.mrf.mxu1  ;;  %5996 = vmatmul.mubr.msk.bf16.gmra.mxu1 %vm663_vm1, %v6407_v9  ;;  %v2428_v9 = vsel %vm454_vm0, %v2423_v12, %v2427_v52  ;;  %v6420_v12 = vld [vmem:[%s6668_s21 + $0xa4] sm:$0xff]  }
  0xe6   : > { %v5817_v36 = vpop.f32.mrf.mxu0  ;;  %6048 = vmatmul.mubr.msk.bf16.gmra.mxu0 %vm663_vm1, %v2388_v1  ;;  %5999 = vmatprep.mubr.msk.bf16.mxu1 %vm663_vm1, %v6410_v16  ;;  %v2431_v23 = vor.u32 %v2429_v61, %v2427_v52  ;;  %v6422_v61 = vld [vmem:[%s6668_s21 + $0xac] sm:$0xff]  }
  0xe7   : > { %6051 = vmatprep.mubr.msk.bf16.mxu0 %vm663_vm1, %v2396_v2  ;;  %v7185_v7 = vpop.f32.mrf.mxu1  ;;  %v2437_v2 = vshrl.u32 %v7207_v50, 16 }
  0xe8   : > { %v7179_v47 = vpop.f32.mrf.mxu0  ;;  %v2436_v48 = vsel %vm454_vm0, %v2431_v23, %v2435_v19 }
  0xe9   : > { %v7192_v26 = vpop.f32.mrf.mxu1  ;;  %v2439_v17 = vor.u32 %v2437_v2, %v2435_v19 }
  0xea   : > { %v7187_v31 = vpop.f32.mrf.mxu0 }
  0xeb   : > { %v7201_v21 = vpop.f32.mrf.mxu1 }
  0xec   : > { %v7194_v37 = vpop.f32.mrf.mxu0 }
  0xed   : > { %v7210_v30 = vpop.f32.mrf.mxu1  ;;  %6000 = vmatmul.mubr.msk.bf16.gmra.mxu1 %vm663_vm1, %v6412_v11 }
  0xee   : > { %v7203_v34 = vpop.f32.mrf.mxu0  ;;  %6052 = vmatmul.mubr.msk.bf16.gmra.mxu0 %vm663_vm1, %v2404_v33  ;;  %6003 = vmatprep.mubr.msk.bf16.mxu1 %vm663_vm1, %v6414_v42  ;;  %v2443_v33 = vrot.slane %v2441_v4, 1  ;;  %v2445_v42 = vshrl.u32 %v7216_v53, 16  ;;  %v7262_v4 = vld [vmem:[%s6668_s21 + $0xcc] ss:$0 sps:$4 sm:$0x11]  }
  0xef   : > { %6055 = vmatprep.mubr.msk.bf16.mxu0 %vm663_vm1, %v2412_v39  ;;  %v7219_v13 = vpop.f32.mrf.mxu1  ;;  %8105 = vst [vmem:[#allocation5_spill] sm:$0xff] %v7262_v4 }
  0xf0   : > { %v7213_v3 = vpop.f32.mrf.mxu0  ;;  %v2444_v52 = vsel %vm454_vm0, %v2439_v17, %v2443_v33  ;;  %v2447_v2 = vor.u32 %v2445_v42, %v2443_v33 }
  0xf1   : > { %v7226_v0 = vpop.f32.mrf.mxu1 }
  0xf2   : > { %v7221_v22 = vpop.f32.mrf.mxu0 }
  0xf3   : > { %v876_v16 = vpop.f32.mrf.mxu1 }
  0xf4   : > { %v788_v1 = vpop.f32.mrf.mxu0 }
  0xf5   : > { %v7240_v46 = vpop.f32.mrf.mxu1  ;;  %6004 = vmatmul.mubr.msk.bf16.gmra.mxu1 %vm663_vm1, %v6416_v60 }
  0xf6   : > { %v7233_v36 = vpop.f32.mrf.mxu0  ;;  %6056 = vmatmul.mubr.msk.bf16.gmra.mxu0 %vm663_vm1, %v2420_v43  ;;  %6007 = vmatprep.mubr.msk.bf16.mxu1 %vm663_vm1, %v6418_v10  ;;  %v2457_v43 = vshll.u32 %v7244_v38, 16 }
  0xf7   : > { %6059 = vmatprep.mubr.msk.bf16.mxu0 %vm663_vm1, %v2428_v9  ;;  %v888_v11 = vpop.f32.mrf.mxu1  ;;  %v2451_v9 = vrot.slane %v2449_v41, 1  ;;  %v2794_v41 = vld [vmem:[%s6668_s21 + $0xc] sm:$0xe] }
  0xf8   : > { %v800_v27 = vpop.f32.mrf.mxu0  ;;  %v2459_v23 = vrot.slane %v2457_v43, 1  ;;  %v2461_v11 = vshrl.u32 %v7244_v38, 16 }
  0xf9   : > { %v5850_v29 = vpop.f32.mrf.mxu1  ;;  %v2455_v19 = vor.u32 %v2453_v59, %v2451_v9  ;;  %v2452_v33 = vsel %vm454_vm0, %v2447_v2, %v2451_v9 }
  0xfa   : > { %v5826_v39 = vpop.f32.mrf.mxu0  ;;  %v6424_v29 = vld [vmem:[%s6668_s21 + $0xb4] sm:$0xff]  }
  0xfb   : > { %v7257_v1 = vpop.f32.mrf.mxu1  ;;  %v2465_v39 = vshll.u32 %v7262_v4, 16 }
  0xfc   : > { %v7250_v51 = vpop.f32.mrf.mxu0 }
  0xfd   : > { %v5853_v10 = vpop.f32.mrf.mxu1  ;;  %6008 = vmatmul.mubr.msk.bf16.gmra.mxu1 %vm663_vm1, %v6420_v12  ;;  %v2460_v12 = vsel %vm454_vm0, %v2455_v19, %v2459_v23  ;;  %v2467_v9 = vrot.slane %v2465_v39, 1 }
  0xfe   : > { %v5829_v60 = vpop.f32.mrf.mxu0  ;;  %6060 = vmatmul.mubr.msk.bf16.gmra.mxu0 %vm663_vm1, %v2436_v48  ;;  %6011 = vmatprep.mubr.msk.bf16.mxu1 %vm663_vm1, %v6422_v61  ;;  %v5323_v61 = vcombine.low %v2794_v41, %v6980_v56  ;;  %v2804_v56 = vrot.slane %v6990_v35, 1 }
  0xff   : > { %6063 = vmatprep.mubr.msk.bf16.mxu0 %vm663_vm1, %v2444_v52  ;;  %v7268_v27 = vpop.f32.mrf.mxu1  ;;  %v6426_v52 = vld [vmem:[%s6668_s21 + $0xbc] sm:$0xff]   ;;  %v2463_v60 = vor.u32 %v2461_v11, %v2459_v23 }
 0x100   : > { %v7265_v16 = vpop.f32.mrf.mxu0  ;;  %v6431_v11 = vld [vmem:[%s6668_s21 + $0x18] sm:$0xff]  }
 0x101   : > { %v7276_v48 = vpop.f32.mrf.mxu1  ;;  %v2468_v23 = vsel %vm454_vm0, %v2463_v60, %v2467_v9  ;;  %v2806_v60 = vrot.slane %v7008_v15, 1 }
 0x102   : > { %v7270_v17 = vpop.f32.mrf.mxu0 }
 0x103   : > { %v7283_v59 = vpop.f32.mrf.mxu1 }
 0x104   : > { %v7278_v42 = vpop.f32.mrf.mxu0  ;;  %8106 = vst [vmem:[#allocation6_spill] sm:$0xff] %v7283_v59 }
 0x105   : > { %v7290_v2 = vpop.f32.mrf.mxu1  ;;  %6012 = vmatmul.mubr.msk.bf16.gmra.mxu1 %vm663_vm1, %v6424_v29  ;;  %v6428_v29 = vld [vmem:[%s6668_s21 + $0xc4] sm:$0xff]  }
 0x106   : > { %v7285_v43 = vpop.f32.mrf.mxu0  ;;  %6064 = vmatmul.mubr.msk.bf16.gmra.mxu0 %vm663_vm1, %v2452_v33  ;;  %8107 = vst [vmem:[#allocation7_spill] sm:$0xff] %v7290_v2  ;;  %6015 = vmatprep.mubr.msk.bf16.mxu1 %vm663_vm1, %v6426_v52  ;;  %v2803_v33 = vrot.slane %v5323_v61, 1 }
 0x107   : > { %6067 = vmatprep.mubr.msk.bf16.mxu0 %vm663_vm1, %v2460_v12  ;;  %v7296_v19 = vpop.f32.mrf.mxu1 }
 0x108   : > { %v7293_v10 = vpop.f32.mrf.mxu0  ;;  %8108 = vst [vmem:[#allocation8_spill] sm:$0xff] %v7296_v19  ;;  %v2805_v52 = vsel %vm1223_vm2, %v2803_v33, %v2804_v56  ;;  %v6435_v19 = vld [vmem:[%s6668_s21 + $0x28] sm:$0xff]   ;;  %v6448_v33 = vld [vmem:[%s8098_s1 + $0x80] sm:$0xff]  }
 0x109   : > { %v7303_v39 = vpop.f32.mrf.mxu1 }
 0x10a   : > { %v7298_v4 = vpop.f32.mrf.mxu0  ;;  %8109 = vst [vmem:[#allocation9_spill] sm:$0xff] %v7303_v39  ;;  %v2808_v39 = vrot.slane %v7015_v18, 1  ;;  %v6446_v18 = vld [vmem:[%s8098_s1 + $0x70] sm:$0xff]  }
 0x10b   : > { %v920_v12 = vpop.f32.mrf.mxu1 }
 0x10c   : > { %v832_v41 = vpop.f32.mrf.mxu0  ;;  %v6433_v12 = vld [vmem:[%s6668_s21 + $0x20] sm:$0xff]   ;;  %v2809_v15 = vsel %vm1223_vm2, %v2806_v60, %v2808_v39 }
 0x10d   : > { %v7311_v61 = vpop.f32.mrf.mxu1  ;;  %6016 = vmatmul.mubr.msk.bf16.gmra.mxu1 %vm663_vm1, %v6428_v29 }
 0x10e   : > { %v7306_v2 = vpop.f32.mrf.mxu0  ;;  %6068 = vmatmul.mubr.msk.bf16.gmra.mxu0 %vm663_vm1, %v2468_v23  ;;  %8110 = vst [vmem:[#allocation10_spill] sm:$0xff] %v7311_v61  ;;  %6075 = vmatprep.mubr.msk.bf16.mxu1 %vm663_vm1, %v2805_v52 }
 0x10f   : > { %6127 = vmatprep.mubr.msk.bf16.mxu0 %vm663_vm1, %v6431_v11  ;;  %v932_v9 = vpop.f32.mrf.mxu1  ;;  %v2807_v11 = vsel %vm1223_vm2, %v2804_v56, %v2806_v60  ;;  %v2810_v60 = vrot.slane %v7028_v6, 1 }
 0x110   : > { %v844_v35 = vpop.f32.mrf.mxu0 }
 0x111   : > { %v5862_v23 = vpop.f32.mrf.mxu1 }
 0x112   : > { %v5838_v41 = vpop.f32.mrf.mxu0  ;;  %v2812_v23 = vrot.slane %v7034_v14, 1 }
 0x113   : > { %v7325_v29 = vpop.f32.mrf.mxu1 }
 0x114   : > { %v7319_v59 = vpop.f32.mrf.mxu0  ;;  %8111 = vst [vmem:[#allocation11_spill] sm:$0xff] %v7325_v29  ;;  %v2813_v14 = vsel %vm1223_vm2, %v2810_v60, %v2812_v23 }
 0x115   : > { %v5869_v35 = vpop.f32.mrf.mxu1  ;;  %6076 = vmatmul.mubr.msk.bf16.vlgmr.msra.gmra.mxu1 %vm663_vm1, %v2807_v11 }
 0x116   : > { %v5921_v52 = vpop.f32.mrf.mxu0  ;;  %6128 = vmatmul.mubr.msk.bf16.vlgmr.msra.gmra.mxu0 %vm663_vm1, %v6433_v12  ;;  %6176 = vmatpush3.bf16.msra.mxu1 %v7072_v40  ;;  %v6436_v12 = vld [vmem:[%s6668_s21 + $0x30] sm:$0xff]  }
 0x117   : > { %6228 = vmatpush3.bf16.msra.mxu0 %v7064_v49  ;;  %6131 = vmatprep.mubr.msk.bf16.mxu0 %vm663_vm1, %v6435_v19  ;;  %v1039_v9 = vpop.f32.mrf.mxu1  ;;  %v6437_v19 = vld [vmem:[%s6668_s21 + $0x38] sm:$0xff]  }
 0x118   : > { %v1391_v56 = vpop.f32.mrf.mxu0  ;;  %6229 = vmatprep.subr.bf16.mxu0 %v6448_v33  ;;  %6079 = vmatprep.mubr.msk.bf16.mxu1 %vm663_vm1, %v2809_v15  ;;  %v1040_v49 = vadd.f32 %v1039_v9, %v7179_v47  ;;  %v2811_v15 = vsel %vm1223_vm2, %v2808_v39, %v2810_v60 }
 0x119   : > { %6177 = vmatprep.subr.bf16.mxu1 %v6446_v18  ;;  %v5870_v52 = vpop.f32.mrf.mxu1 }
 0x11a   : > { %v5922_v41 = vpop.f32.mrf.mxu0  ;;  %v7342_v35 = vadd.f32 %v1391_v56, %v1040_v49  ;;  %v1050_v40 = vadd.f32 %v5870_v52, %v7187_v31  ;;  %6178 = vmatpush3.bf16.msra.mxu1 %v6446_v18  ;;  %v2814_v56 = vrot.slane %v7050_v8, 1 }
 0x11b   : > { %6230 = vmatpush3.bf16.msra.mxu0 %v6448_v33  ;;  %v1042_v6 = vpop.f32.mrf.mxu1 }
 0x11c   : > { %v1394_v11 = vpop.f32.mrf.mxu0  ;;  %v7348_v61 = vadd.f32 %v5922_v41, %v1050_v40  ;;  %v1043_v47 = vadd.f32 %v1042_v6, %v7194_v37  ;;  %v6438_v41 = vld [vmem:[%s6668_s21 + $0x40] sm:$0xff]  }
 0x11d   : > { %v5873_v33 = vpop.f32.mrf.mxu1  ;;  %6080 = vmatmul.mubr.msk.bf16.gmra.mxu1 %vm663_vm1, %v2811_v15  ;;  %v2815_v15 = vsel %vm1223_vm2, %v2812_v23, %v2814_v56  ;;  %v2818_v23 = vrot.slane %v7084_v54, 1 }
 0x11e   : > { %v5925_v29 = vpop.f32.mrf.mxu0  ;;  %6132 = vmatmul.mubr.msk.bf16.gmra.mxu0 %vm663_vm1, %v6436_v12  ;;  %v7353_v39 = vadd.f32 %v1394_v11, %v1043_v47  ;;  %v1062_v18 = vadd.f32 %v5873_v33, %v7203_v34  ;;  %6083 = vmatprep.mubr.msk.bf16.mxu1 %vm663_vm1, %v2813_v14  ;;  %v2816_v12 = vrot.slane %v7059_v45, 1 }
 0x11f   : > { %6135 = vmatprep.mubr.msk.bf16.mxu0 %vm663_vm1, %v6437_v19  ;;  %v1054_v60 = vpop.f32.mrf.mxu1  ;;  %v6439_v19 = vld [vmem:[%s6668_s21 + $0x48] sm:$0xff]  }
 0x120   : > { %v1406_v31 = vpop.f32.mrf.mxu0  ;;  %v7360_v37 = vadd.f32 %v5925_v29, %v1062_v18  ;;  %v1055_v49 = vadd.f32 %v1054_v60, %v7213_v3  ;;  %v2817_v45 = vsel %vm1223_vm2, %v2814_v56, %v2816_v12  ;;  %v2820_v18 = vrot.slane %v7090_v58, 1  ;;  %v6441_v60 = vld [vmem:[%s6668_s21 + $0x58] sm:$0xff]  }
 0x121   : > { %v5874_v52 = vpop.f32.mrf.mxu1 }
 0x122   : > { %v5926_v9 = vpop.f32.mrf.mxu0  ;;  %v7364_v11 = vadd.f32 %v1406_v31, %v1055_v49  ;;  %v1065_v34 = vadd.f32 %v5874_v52, %v7221_v22  ;;  %v6440_v31 = vld [vmem:[%s6668_s21 + $0x50] sm:$0xff]   ;;  %v2819_v49 = vsel %vm1223_vm2, %v2816_v12, %v2818_v23  ;;  %v2821_v54 = vsel %vm1223_vm2, %v2818_v23, %v2820_v18 }
 0x123   : > { %v1057_v8 = vpop.f32.mrf.mxu1  ;;  %v2822_v12 = vrot.slane %v7103_v5, 1 }
 0x124   : > { %v1409_v40 = vpop.f32.mrf.mxu0  ;;  %v7370_v29 = vadd.f32 %v5926_v9, %v1065_v34 }
 0x125   : > { %v5877_v3 = vpop.f32.mrf.mxu1  ;;  %6084 = vmatmul.mubr.msk.bf16.gmra.mxu1 %vm663_vm1, %v2815_v15 }
 0x126   : > { %v5929_v6 = vpop.f32.mrf.mxu0  ;;  %6136 = vmatmul.mubr.msk.bf16.gmra.mxu0 %vm663_vm1, %v6438_v41  ;;  %v1077_v22 = vadd.f32 %v5877_v3, %v7233_v36  ;;  %6087 = vmatprep.mubr.msk.bf16.mxu1 %vm663_vm1, %v2817_v45  ;;  %v2824_v45 = vrot.slane %v7108_v24, 1 }
 0x127   : > { %6139 = vmatprep.mubr.msk.bf16.mxu0 %vm663_vm1, %v6439_v19  ;;  %v1069_v47 = vpop.f32.mrf.mxu1 }
 0x128   : > { %v1421_v14 = vpop.f32.mrf.mxu0  ;;  %v7379_v56 = vadd.f32 %v5929_v6, %v1077_v22  ;;  %v6442_v6 = vld [vmem:[%s6668_s21 + $0x60] sm:$0xff]   ;;  %v2825_v5 = vsel %vm1223_vm2, %v2822_v12, %v2824_v45 }
 0x129   : > { %v5878_v9 = vpop.f32.mrf.mxu1 }
 0x12a   : > { %v5930_v33 = vpop.f32.mrf.mxu0 }
 0x12b   : > { %v1071_v19 = vpop.f32.mrf.mxu1  ;;  %v2823_v33 = vsel %vm1223_vm2, %v2820_v18, %v2822_v12 }
 0x12c   : > { %v1423_v41 = vpop.f32.mrf.mxu0  ;;  %v1072_v36 = vadd.f32 %v1071_v19, %v7250_v51  ;;  %v6443_v51 = vld [vmem:[%s6668_s21 + $0x68] sm:$0xff]  }
 0x12d   : > { %v5881_v58 = vpop.f32.mrf.mxu1  ;;  %6088 = vmatmul.mubr.msk.bf16.gmra.mxu1 %vm663_vm1, %v2819_v49  ;;  %v2826_v49 = vrot.slane %v7121_v63, 1 }
 0x12e   : > { %v5933_v52 = vpop.f32.mrf.mxu0  ;;  %6140 = vmatmul.mubr.msk.bf16.gmra.mxu0 %vm663_vm1, %v6440_v31  ;;  %v7388_v34 = vadd.f32 %v1423_v41, %v1072_v36  ;;  %6091 = vmatprep.mubr.msk.bf16.mxu1 %vm663_vm1, %v2821_v54  ;;  %v6444_v54 = vld [vmem:[%s6668_s21 + $0x70] sm:$0xff]   ;;  %v2828_v36 = vrot.slane %v7126_v32, 1 }
 0x12f   : > { %6143 = vmatprep.mubr.msk.bf16.mxu0 %vm663_vm1, %v6441_v60  ;;  %v1083_v15 = vpop.f32.mrf.mxu1 }
 0x130   : > { %v1435_v40 = vpop.f32.mrf.mxu0  ;;  %v1084_v3 = vadd.f32 %v1083_v15, %v7265_v16  ;;  %v2829_v32 = vsel %vm1223_vm2, %v2826_v49, %v2828_v36 }
 0x131   : > { %v5882_v14 = vpop.f32.mrf.mxu1 }
 0x132   : > { %v5934_v8 = vpop.f32.mrf.mxu0  ;;  %v7396_v23 = vadd.f32 %v1435_v40, %v1084_v3  ;;  %v1094_v47 = vadd.f32 %v5882_v14, %v7270_v17  ;;  %v6445_v40 = vld [vmem:[%s6668_s21 + $0x78] sm:$0xff]  }
 0x133   : > { %v1086_v31 = vpop.f32.mrf.mxu1 }
 0x134   : > { %v1438_v22 = vpop.f32.mrf.mxu0  ;;  %v7402_v9 = vadd.f32 %v5934_v8, %v1094_v47  ;;  %v1087_v24 = vadd.f32 %v1086_v31, %v7278_v42  ;;  %v2832_v31 = vrot.slane %v7144_v57, 1 }
 0x135   : > { %v5885_v16 = vpop.f32.mrf.mxu1  ;;  %6092 = vmatmul.mubr.msk.bf16.gmra.mxu1 %vm663_vm1, %v2823_v33  ;;  %v6447_v33 = vld [vmem:[%s6668_s21 + $0x80] sm:$0xff]  }
 0x136   : > { %v5937_v60 = vpop.f32.mrf.mxu0  ;;  %6144 = vmatmul.mubr.msk.bf16.gmra.mxu0 %vm663_vm1, %v6442_v6  ;;  %v7407_v41 = vadd.f32 %v1438_v22, %v1087_v24  ;;  %v1106_v18 = vadd.f32 %v5885_v16, %v7285_v43  ;;  %6095 = vmatprep.mubr.msk.bf16.mxu1 %vm663_vm1, %v2825_v5  ;;  %v2827_v6 = vsel %vm1223_vm2, %v2824_v45, %v2826_v49  ;;  %v2830_v45 = vrot.slane %v7139_v44, 1  ;;  %v6449_v5 = vld [vmem:[%s6668_s21 + $0x88] sm:$0xff]  }
 0x137   : > { %6147 = vmatprep.mubr.msk.bf16.mxu0 %vm663_vm1, %v6443_v51  ;;  %v1098_v19 = vpop.f32.mrf.mxu1 }
 0x138   : > { %v1450_v17 = vpop.f32.mrf.mxu0  ;;  %v7414_v42 = vadd.f32 %v5937_v60, %v1106_v18  ;;  %v1099_v58 = vadd.f32 %v1098_v19, %v7293_v10  ;;  %v2833_v44 = vsel %vm1223_vm2, %v2830_v45, %v2832_v31 }
 0x139   : > { %v5886_v12 = vpop.f32.mrf.mxu1 }
 0x13a   : > { %v5938_v52 = vpop.f32.mrf.mxu0  ;;  %v7418_v8 = vadd.f32 %v1450_v17, %v1099_v58  ;;  %v1109_v43 = vadd.f32 %v5886_v12, %v7298_v4  ;;  %v2831_v17 = vsel %vm1223_vm2, %v2828_v36, %v2830_v45  ;;  %v2836_v12 = vrot.slane %v7162_v62, 1 }
 0x13b   : > { %v1101_v63 = vpop.f32.mrf.mxu1 }
 0x13c   : > { %v1453_v15 = vpop.f32.mrf.mxu0  ;;  %v7424_v51 = vadd.f32 %v5938_v52, %v1109_v43 }
 0x13d   : > { %v5889_v10 = vpop.f32.mrf.mxu1  ;;  %6096 = vmatmul.mubr.msk.bf16.gmra.mxu1 %vm663_vm1, %v2827_v6 }
 0x13e   : > { %v5941_v3 = vpop.f32.mrf.mxu0  ;;  %6148 = vmatmul.mubr.msk.bf16.gmra.mxu0 %vm663_vm1, %v6444_v54  ;;  %v1121_v4 = vadd.f32 %v5889_v10, %v7306_v2  ;;  %6099 = vmatprep.mubr.msk.bf16.mxu1 %vm663_vm1, %v2829_v32  ;;  %v2834_v54 = vrot.slane %v7157_v55, 1 }
 0x13f   : > { %6151 = vmatprep.mubr.msk.bf16.mxu0 %vm663_vm1, %v6445_v40  ;;  %v1113_v22 = vpop.f32.mrf.mxu1  ;;  %v6450_v40 = vld [vmem:[%s6668_s21 + $0x90] sm:$0xff]  }
 0x140   : > { %v1465_v14 = vpop.f32.mrf.mxu0  ;;  %v7433_v60 = vadd.f32 %v5941_v3, %v1121_v4  ;;  %v2835_v32 = vsel %vm1223_vm2, %v2832_v31, %v2834_v54  ;;  %v2837_v55 = vsel %vm1223_vm2, %v2834_v54, %v2836_v12 }
 0x141   : > { %v5890_v24 = vpop.f32.mrf.mxu1 }
 0x142   : > { %v5942_v47 = vpop.f32.mrf.mxu0  ;;  %v2840_v24 = vrot.slane %v7182_v28, 1 }
 0x143   : > { %v1115_v18 = vpop.f32.mrf.mxu1  ;;  %v2838_v47 = vrot.slane %v7175_v20, 1 }
 0x144   : > { %v1467_v16 = vpop.f32.mrf.mxu0  ;;  %v1116_v2 = vadd.f32 %v1115_v18, %v7319_v59  ;;  %v6451_v59 = vld [vmem:[%s6668_s21 + $0x98] sm:$0xff]  }
 0x145   : > { %v5893_v57 = vpop.f32.mrf.mxu1  ;;  %6100 = vmatmul.mubr.msk.bf16.gmra.mxu1 %vm663_vm1, %v2831_v17  ;;  %v6453_v17 = vld [vmem:[%s6668_s21 + $0xa8] sm:$0xff]   ;;  %v2841_v28 = vsel %vm1223_vm2, %v2838_v47, %v2840_v24 }
 0x146   : > { %v5945_v49 = vpop.f32.mrf.mxu0  ;;  %6152 = vmatmul.mubr.msk.bf16.gmra.mxu0 %vm663_vm1, %v6447_v33  ;;  %v7442_v52 = vadd.f32 %v1467_v16, %v1116_v2  ;;  %6103 = vmatprep.mubr.msk.bf16.mxu1 %vm663_vm1, %v2833_v44  ;;  %v2839_v2 = vsel %vm1223_vm2, %v2836_v12, %v2838_v47  ;;  %v6454_v12 = vld [vmem:[%s6668_s21 + $0xb0] sm:$0xff]   ;;  %v2846_v47 = vrot.slane %v7237_v25, 1 }
 0x147   : > { %6155 = vmatprep.mubr.msk.bf16.mxu0 %vm663_vm1, %v6449_v5  ;;  %v1127_v36 = vpop.f32.mrf.mxu1  ;;  %v6452_v5 = vld [vmem:[%s6668_s21 + $0xa0] sm:$0xff]  }
 0x148   : > { %v1479_v19 = vpop.f32.mrf.mxu0  ;;  %v1128_v15 = vadd.f32 %v1127_v36, %v7185_v7  ;;  %v2842_v36 = vrot.slane %v7207_v50, 1 }
 0x149   : > { %v5894_v43 = vpop.f32.mrf.mxu1 }
 0x14a   : > { %v5946_v58 = vpop.f32.mrf.mxu0  ;;  %v7450_v63 = vadd.f32 %v1479_v19, %v1128_v15  ;;  %v1138_v3 = vadd.f32 %v5894_v43, %v7192_v26  ;;  %v2844_v15 = vrot.slane %v7216_v53, 1  ;;  %v6455_v43 = vld [vmem:[%s6668_s21 + $0xb8] sm:$0xff]  }
 0x14b   : > { %v1130_v10 = vpop.f32.mrf.mxu1 }
 0x14c   : > { %v1482_v6 = vpop.f32.mrf.mxu0  ;;  %v7456_v4 = vadd.f32 %v5946_v58, %v1138_v3  ;;  %v1131_v62 = vadd.f32 %v1130_v10, %v7201_v21  ;;  %v3676_v3 = vld [vmem:[%s6668_s21 + $0x1c] sm:$0xf]  ;;  %v2845_v50 = vsel %vm1223_vm2, %v2842_v36, %v2844_v15  ;;  %v2847_v25 = vsel %vm1223_vm2, %v2844_v15, %v2846_v47 }
 0x14d   : > { %v5897_v7 = vpop.f32.mrf.mxu1  ;;  %6104 = vmatmul.mubr.msk.bf16.gmra.mxu1 %vm663_vm1, %v2835_v32 }
 0x14e   : > { %v5949_v14 = vpop.f32.mrf.mxu0  ;;  %6156 = vmatmul.mubr.msk.bf16.gmra.mxu0 %vm663_vm1, %v6450_v40  ;;  %v7461_v45 = vadd.f32 %v1482_v6, %v1131_v62  ;;  %v1150_v22 = vadd.f32 %v5897_v7, %v7210_v30  ;;  %6107 = vmatprep.mubr.msk.bf16.mxu1 %vm663_vm1, %v2837_v55  ;;  %v3675_v6 = vld [vmem:[%s6668_s21 + $0x18] sm:$0xf] }
 0x14f   : > { %6159 = vmatprep.mubr.msk.bf16.mxu0 %vm663_vm1, %v6451_v59  ;;  %v1142_v33 = vpop.f32.mrf.mxu1  ;;  %v5408_v62 = vcombine.low %v3675_v6, %v3676_v3 }
 0x150   : > { %v1494_v26 = vpop.f32.mrf.mxu0  ;;  %v7468_v21 = vadd.f32 %v5949_v14, %v1150_v22  ;;  %v1143_v16 = vadd.f32 %v1142_v33, %v7219_v13  ;;  %v2843_v14 = vsel %vm1223_vm2, %v2840_v24, %v2842_v36  ;;  %v4373_v33 = vld [vmem:[%s6668_s21 + $0x18] sm:$0xe]  ;;  %v6456_v24 = vld [vmem:[%s6668_s21 + $0xc0] sm:$0xff]  }
 0x151   : > { %v5898_v18 = vpop.f32.mrf.mxu1 }
 0x152   : > { %v5950_v31 = vpop.f32.mrf.mxu0  ;;  %v7472_v44 = vadd.f32 %v1494_v26, %v1143_v16  ;;  %v1153_v30 = vadd.f32 %v5898_v18, %v7226_v0  ;;  %v2848_v16 = vrot.slane %v7244_v38, 1 }
 0x153   : > { %v1145_v20 = vpop.f32.mrf.mxu1 }
 0x154   : > { %v1497_v49 = vpop.f32.mrf.mxu0  ;;  %v7478_v13 = vadd.f32 %v5950_v31, %v1153_v30  ;;  %v5463_v20 = vcombine.low %v4373_v33, %v3676_v3  ;;  %v2849_v38 = vsel %vm1223_vm2, %v2846_v47, %v2848_v16  ;;  %v6462_v3 = vld [vmem:[%s6668_s21 + $0x28] sm:$0xff]   ;;  %v7531_v47 = vld [vmem:[%s6668_s21 + $0x30] sm:$0xff]  }
 0x155   : > { %v5901_v19 = vpop.f32.mrf.mxu1  ;;  %6108 = vmatmul.mubr.msk.bf16.gmra.mxu1 %vm663_vm1, %v2839_v2  ;;  %v6457_v49 = vld [vmem:[%s6668_s21 + $0xc8] sm:$0xff]  }
 0x156   : > { %v5953_v57 = vpop.f32.mrf.mxu0  ;;  %6160 = vmatmul.mubr.msk.bf16.gmra.mxu0 %vm663_vm1, %v6452_v5  ;;  %v1165_v54 = vadd.f32 %v5901_v19, %v7240_v46  ;;  %6111 = vmatprep.mubr.msk.bf16.mxu1 %vm663_vm1, %v2841_v28 }
 0x157   : > { %6163 = vmatprep.mubr.msk.bf16.mxu0 %vm663_vm1, %v6453_v17  ;;  %v1157_v58 = vpop.f32.mrf.mxu1  ;;  %v3855_v17 = vshll.u32 %v5408_v62, 16 }
 0x158   : > { %v1509_v0 = vpop.f32.mrf.mxu0  ;;  %v7487_v59 = vadd.f32 %v5953_v57, %v1165_v54  ;;  %v3853_v54 = vshrl.u32 %v5408_v62, 16 }
 0x159   : > { %v5902_v32 = vpop.f32.mrf.mxu1  ;;  %v3857_v36 = vrot.slane %v3855_v17, 1 }
 0x15a   : > { %v5954_v40 = vpop.f32.mrf.mxu0 }
 0x15b   : > { %v1159_v46 = vpop.f32.mrf.mxu1  ;;  %v8112_v40 = vld [vmem:[#allocation6_spill] sm:$0xff] }
 0x15c   : > { %v1511_v10 = vpop.f32.mrf.mxu0  ;;  %v1160_v53 = vadd.f32 %v1159_v46, %v7257_v1  ;;  %v7506_v1 = vld [vmem:[%s6668_s21 + $0x20] sm:$0xff]  }
 0x15d   : > { %v5905_v7 = vpop.f32.mrf.mxu1  ;;  %6112 = vmatmul.mubr.msk.bf16.gmra.mxu1 %vm663_vm1, %v2843_v14  ;;  %v4383_v6 = vrot.slane %v7506_v1, 1  ;;  %v8114_v46 = vld [vmem:[#allocation5_spill] sm:$0xff] }
 0x15e   : > { %v5957_v55 = vpop.f32.mrf.mxu0  ;;  %6164 = vmatmul.mubr.msk.bf16.gmra.mxu0 %vm663_vm1, %v6454_v12  ;;  %v7498_v22 = vadd.f32 %v1511_v10, %v1160_v53  ;;  %6115 = vmatprep.mubr.msk.bf16.mxu1 %vm663_vm1, %v2845_v50  ;;  %v8113_v10 = vld [vmem:[#allocation7_spill] sm:$0xff]  ;;  %v3858_v7 = vor.u32 %v3857_v36, %v3853_v54  ;;  %v3872_v54 = vshrl.u32 %v6462_v3, 16  ;;  %v3876_v36 = vshll.u32 %v7531_v47, 16 }
 0x15f   : > { %6167 = vmatprep.mubr.msk.bf16.mxu0 %vm663_vm1, %v6455_v43  ;;  %v1171_v31 = vpop.f32.mrf.mxu1  ;;  %v4382_v43 = vrot.slane %v5463_v20, 1  ;;  %v2850_v55 = vrot.slane %v8114_v46, 1  ;;  %v6458_v53 = vld [vmem:[%s6668_s21 + $0xd0] sm:$0xff]  }
 0x160   : > { %v1523_v26 = vpop.f32.mrf.mxu0  ;;  %v1172_v18 = vadd.f32 %v1171_v31, %v7268_v27  ;;  %v3860_v27 = vshll.u32 %v7506_v1, 16  ;;  %v8115_v31 = vld [vmem:[#allocation8_spill] sm:$0xff] }
 0x161   : > { %v5906_v30 = vpop.f32.mrf.mxu1 }
 0x162   : > { %v5958_v5 = vpop.f32.mrf.mxu0  ;;  %v7510_v57 = vadd.f32 %v1523_v26, %v1172_v18  ;;  %v1182_v28 = vadd.f32 %v5906_v30, %v7276_v48  ;;  %v3862_v26 = vrot.slane %v3860_v27, 1  ;;  %v4384_v18 = vsel %vm1223_vm2, %v4382_v43, %v4383_v6  ;;  %v8117_v43 = vld [vmem:[#allocation10_spill] sm:$0xff] }
 0x163   : > { %v1174_v19 = vpop.f32.mrf.mxu1 }
 0x164   : > { %v1526_v2 = vpop.f32.mrf.mxu0  ;;  %v7517_v58 = vadd.f32 %v5958_v5, %v1182_v28  ;;  %v1175_v12 = vadd.f32 %v1174_v19, %v8112_v40  ;;  %v2851_v28 = vsel %vm1223_vm2, %v2848_v16, %v2850_v55  ;;  %v4385_v40 = vrot.slane %v6462_v3, 1 }
 0x165   : > { %v5909_v48 = vpop.f32.mrf.mxu1  ;;  %6116 = vmatmul.mubr.msk.bf16.gmra.mxu1 %vm663_vm1, %v2847_v25  ;;  %v3864_v25 = vshrl.u32 %v7506_v1, 16 }
 0x166   : > { %v5961_v0 = vpop.f32.mrf.mxu0  ;;  %6168 = vmatmul.mubr.msk.bf16.gmra.mxu0 %vm663_vm1, %v6456_v24  ;;  %v7524_v32 = vadd.f32 %v1526_v2, %v1175_v12  ;;  %v1194_v14 = vadd.f32 %v5909_v48, %v8113_v10  ;;  %6119 = vmatprep.mubr.msk.bf16.mxu1 %vm663_vm1, %v2849_v38  ;;  %v8116_v2 = vld [vmem:[#allocation9_spill] sm:$0xff]  ;;  %v4387_v48 = vrot.slane %v7531_v47, 1 }
 0x167   : > { %6171 = vmatprep.mubr.msk.bf16.mxu0 %vm663_vm1, %v6457_v49  ;;  %v1186_v50 = vpop.f32.mrf.mxu1  ;;  %v3868_v49 = vshll.u32 %v6462_v3, 16 }
 0x168   : > { %v1538_v15 = vpop.f32.mrf.mxu0  ;;  %v7533_v33 = vadd.f32 %v5961_v0, %v1194_v14  ;;  %v1187_v5 = vadd.f32 %v1186_v50, %v8115_v31  ;;  %v3863_v0 = vsel %vm454_vm0, %v3858_v7, %v3862_v26  ;;  %v3866_v14 = vor.u32 %v3864_v25, %v3862_v26 }
 0x169   : > { %v5910_v24 = vpop.f32.mrf.mxu1  ;;  %v3870_v1 = vrot.slane %v3868_v49, 1  ;;  %v4386_v7 = vsel %vm1223_vm2, %v4383_v6, %v4385_v40  ;;  %v3880_v26 = vshrl.u32 %v7531_v47, 16  ;;  %v8118_v6 = vld [vmem:[#allocation11_spill] sm:$0xff] }
 0x16a   : > { %v5962_v62 = vpop.f32.mrf.mxu0  ;;  %v7537_v30 = vadd.f32 %v1538_v15, %v1187_v5  ;;  %v1197_v20 = vadd.f32 %v5910_v24, %v8116_v2  ;;  %v6464_v15 = vld [vmem:[%s6668_s21 + $0x38] sm:$0xff]   ;;  %v4388_v24 = vsel %vm1223_vm2, %v4385_v40, %v4387_v48  ;;  %v6466_v40 = vld [vmem:[%s6668_s21 + $0x48] sm:$0xff]  }
 0x16b   : > { %v1189_v19 = vpop.f32.mrf.mxu1  ;;  %v3874_v50 = vor.u32 %v3872_v54, %v3870_v1 }
 0x16c   : > { %v1541_v17 = vpop.f32.mrf.mxu0  ;;  %v7545_v27 = vadd.f32 %v5962_v62, %v1197_v20  ;;  %v3878_v62 = vrot.slane %v3876_v36, 1 }
 0x16d   : > { %v5913_v12 = vpop.f32.mrf.mxu1  ;;  %6120 = vmatmul.mubr.msk.bf16.gmra.mxu1 %vm663_vm1, %v2851_v28  ;;  %v3884_v17 = vshll.u32 %v6464_v15, 16  ;;  %v3888_v28 = vshrl.u32 %v6464_v15, 16 }
 0x16e   : > { %v5965_v38 = vpop.f32.mrf.mxu0  ;;  %6172 = vmatmul.mubr.msk.bf16.gmra.mxu0 %vm663_vm1, %v6458_v53  ;;  %v1209_v10 = vadd.f32 %v5913_v12, %v8117_v43  ;;  %6179 = vmatprep.mubr.msk.bf16.mxu1 %vm663_vm1, %v3863_v0  ;;  %v7554_v53 = vld [vmem:[%s6668_s21 + $0x40] sm:$0xff]   ;;  %v3879_v20 = vsel %vm454_vm0, %v3874_v50, %v3878_v62 }
 0x16f   : > { %6231 = vmatprep.mubr.msk.bf16.mxu0 %vm663_vm1, %v4384_v18  ;;  %v1201_v46 = vpop.f32.mrf.mxu1  ;;  %v3871_v18 = vsel %vm454_vm0, %v3866_v14, %v3870_v1  ;;  %v3892_v25 = vshll.u32 %v7554_v53, 16  ;;  %v3886_v47 = vrot.slane %v3884_v17, 1  ;;  %v4391_v36 = vrot.slane %v7554_v53, 1 }
 0x170   : > { %v1553_v16 = vpop.f32.mrf.mxu0  ;;  %v7556_v3 = vadd.f32 %v5965_v38, %v1209_v10  ;;  %v4389_v38 = vrot.slane %v6464_v15, 1  ;;  %v7574_v46 = vld [vmem:[%s6668_s21 + $0x50] sm:$0xff]  }
 0x171   : > { %v5914_v31 = vpop.f32.mrf.mxu1  ;;  %v3882_v16 = vor.u32 %v3880_v26, %v3878_v62  ;;  %v3890_v10 = vor.u32 %v3888_v28, %v3886_v47  ;;  %v3894_v14 = vrot.slane %v3892_v25, 1 }
 0x172   : > { %v5966_v55 = vpop.f32.mrf.mxu0  ;;  %v4392_v31 = vsel %vm1223_vm2, %v4389_v38, %v4391_v36 }
 0x173   : > { %v1203_v49 = vpop.f32.mrf.mxu1  ;;  %v4390_v55 = vsel %vm1223_vm2, %v4387_v48, %v4389_v38  ;;  %v3887_v17 = vsel %vm454_vm0, %v3882_v16, %v3886_v47  ;;  %v3904_v48 = vshrl.u32 %v6466_v40, 16  ;;  %v6468_v38 = vld [vmem:[%s6668_s21 + $0x58] sm:$0xff]  }
 0x174   : > { %v1555_v5 = vpop.f32.mrf.mxu0  ;;  %v1204_v19 = vadd.f32 %v1203_v49, %v8118_v6 }
 0x175   : > { %v5973_v0 = vpop.f32.mrf.mxu1  ;;  %6180 = vmatmul.mubr.msk.bf16.vlgmr.msra.gmra.mxu1 %vm663_vm1, %v3871_v18  ;;  %v3896_v18 = vshrl.u32 %v7554_v53, 16 }
 0x176   : > { %v6025_v2 = vpop.f32.mrf.mxu0  ;;  %6232 = vmatmul.mubr.msk.bf16.vlgmr.msra.gmra.mxu0 %vm663_vm1, %v4386_v7  ;;  %v7570_v12 = vadd.f32 %v1555_v5, %v1204_v19  ;;  %6183 = vmatprep.mubr.msk.bf16.mxu1 %vm663_vm1, %v3879_v20  ;;  %v4395_v19 = vrot.slane %v7574_v46, 1 }
 0x177   : > { %6235 = vmatprep.mubr.msk.bf16.mxu0 %vm663_vm1, %v4388_v24  ;;  %v1889_v1 = vpop.f32.mrf.mxu1  ;;  %v3900_v24 = vshll.u32 %v6466_v40, 16  ;;  %v3908_v2 = vshll.u32 %v7574_v46, 16  ;;  %v3898_v47 = vor.u32 %v3896_v18, %v3894_v14 }
 0x178   : > { %v2587_v54 = vpop.f32.mrf.mxu0  ;;  %v2064_v15 = vadd.f32 %v1889_v1, %v7342_v35  ;;  %v3895_v35 = vsel %vm454_vm0, %v3890_v10, %v3894_v14 }
 0x179   : > { %v5974_v50 = vpop.f32.mrf.mxu1  ;;  %v3902_v6 = vrot.slane %v3900_v24, 1 }
 0x17a   : > { %v6026_v43 = vpop.f32.mrf.mxu0  ;;  %v7579_v5 = vadd.f32 %v2587_v54, %v2064_v15  ;;  %v2066_v62 = vadd.f32 %v5974_v50, %v7348_v61  ;;  %v4393_v61 = vrot.slane %v6466_v40, 1  ;;  %v7599_v40 = vld [vmem:[%s6668_s21 + $0x60] sm:$0xff]  }
 0x17b   : > { %v1892_v26 = vpop.f32.mrf.mxu1  ;;  %v3906_v1 = vor.u32 %v3904_v48, %v3902_v6 }
 0x17c   : > { %v2590_v7 = vpop.f32.mrf.mxu0  ;;  %v7587_v20 = vadd.f32 %v6026_v43, %v2066_v62  ;;  %v2065_v28 = vadd.f32 %v1892_v26, %v7353_v39  ;;  %v3910_v43 = vrot.slane %v3908_v2, 1  ;;  %v3903_v62 = vsel %vm454_vm0, %v3898_v47, %v3902_v6 }
 0x17d   : > { %v5977_v25 = vpop.f32.mrf.mxu1  ;;  %6184 = vmatmul.mubr.msk.bf16.gmra.mxu1 %vm663_vm1, %v3887_v17  ;;  %v3912_v17 = vshrl.u32 %v7574_v46, 16 }
 0x17e   : > { %v6029_v49 = vpop.f32.mrf.mxu0  ;;  %6236 = vmatmul.mubr.msk.bf16.gmra.mxu0 %vm663_vm1, %v4390_v55  ;;  %v7594_v0 = vadd.f32 %v2590_v7, %v2065_v28  ;;  %v2068_v54 = vadd.f32 %v5977_v25, %v7360_v37  ;;  %6187 = vmatprep.mubr.msk.bf16.mxu1 %vm663_vm1, %v3895_v35  ;;  %v4394_v55 = vsel %vm1223_vm2, %v4391_v36, %v4393_v61  ;;  %v3916_v37 = vshll.u32 %v6468_v38, 16 }
 0x17f   : > { %6239 = vmatprep.mubr.msk.bf16.mxu0 %vm663_vm1, %v4392_v31  ;;  %v1904_v39 = vpop.f32.mrf.mxu1  ;;  %v4396_v31 = vsel %vm1223_vm2, %v4393_v61, %v4395_v19  ;;  %v3920_v36 = vshrl.u32 %v6468_v38, 16  ;;  %v4399_v28 = vrot.slane %v7599_v40, 1  ;;  %v6470_v61 = vld [vmem:[%s6668_s21 + $0x68] sm:$0xff]  }
 0x180   : > { %v2602_v53 = vpop.f32.mrf.mxu0  ;;  %v7601_v10 = vadd.f32 %v6029_v49, %v2068_v54  ;;  %v2067_v15 = vadd.f32 %v1904_v39, %v7364_v11  ;;  %v3911_v11 = vsel %vm454_vm0, %v3906_v1, %v3910_v43  ;;  %v3924_v49 = vshll.u32 %v7599_v40, 16 }
 0x181   : > { %v5978_v50 = vpop.f32.mrf.mxu1  ;;  %v3918_v46 = vrot.slane %v3916_v37, 1 }
 0x182   : > { %v6030_v16 = vpop.f32.mrf.mxu0  ;;  %v7606_v14 = vadd.f32 %v2602_v53, %v2067_v15  ;;  %v2069_v24 = vadd.f32 %v5978_v50, %v7370_v29  ;;  %v4397_v29 = vrot.slane %v6468_v38, 1  ;;  %v3914_v53 = vor.u32 %v3912_v17, %v3910_v43 }
 0x183   : > { %v1907_v18 = vpop.f32.mrf.mxu1  ;;  %v3922_v47 = vor.u32 %v3920_v36, %v3918_v46  ;;  %v3926_v39 = vrot.slane %v3924_v49, 1  ;;  %v3928_v43 = vshrl.u32 %v7599_v40, 16  ;;  %v6472_v49 = vld [vmem:[%s6668_s21 + $0x78] sm:$0xff]  }
 0x184   : > { %v2605_v7 = vpop.f32.mrf.mxu0  ;;  %v7614_v35 = vadd.f32 %v6030_v16, %v2069_v24  ;;  %v7623_v16 = vld [vmem:[%s6668_s21 + $0x70] sm:$0xff]   ;;  %v4398_v1 = vsel %vm1223_vm2, %v4395_v19, %v4397_v29  ;;  %v4400_v50 = vsel %vm1223_vm2, %v4397_v29, %v4399_v28  ;;  %v4401_v18 = vrot.slane %v6470_v61, 1 }
 0x185   : > { %v5981_v48 = vpop.f32.mrf.mxu1  ;;  %6188 = vmatmul.mubr.msk.bf16.gmra.mxu1 %vm663_vm1, %v3903_v62  ;;  %v3932_v7 = vshll.u32 %v6470_v61, 16  ;;  %v3927_v24 = vsel %vm454_vm0, %v3922_v47, %v3926_v39  ;;  %v3936_v62 = vshrl.u32 %v6470_v61, 16  ;;  %v3940_v17 = vshll.u32 %v7623_v16, 16 }
 0x186   : > { %v6033_v26 = vpop.f32.mrf.mxu0  ;;  %6240 = vmatmul.mubr.msk.bf16.gmra.mxu0 %vm663_vm1, %v4394_v55  ;;  %v2071_v25 = vadd.f32 %v5981_v48, %v7379_v56  ;;  %6191 = vmatprep.mubr.msk.bf16.mxu1 %vm663_vm1, %v3911_v11  ;;  %v3919_v56 = vsel %vm454_vm0, %v3914_v53, %v3918_v46  ;;  %v4403_v36 = vrot.slane %v7623_v16, 1  ;;  %v3930_v48 = vor.u32 %v3928_v43, %v3926_v39  ;;  %v7643_v53 = vld [vmem:[%s6668_s21 + $0x80] sm:$0xff]  }
 0x187   : > { %6243 = vmatprep.mubr.msk.bf16.mxu0 %vm663_vm1, %v4396_v31  ;;  %v1919_v6 = vpop.f32.mrf.mxu1  ;;  %v3934_v40 = vrot.slane %v3932_v7, 1  ;;  %v3944_v7 = vshrl.u32 %v7623_v16, 16 }
 0x188   : > { %v2617_v2 = vpop.f32.mrf.mxu0  ;;  %v7625_v38 = vadd.f32 %v6033_v26, %v2071_v25  ;;  %v3942_v25 = vrot.slane %v3940_v17, 1  ;;  %v4402_v6 = vsel %vm1223_vm2, %v4399_v28, %v4401_v18  ;;  %v3952_v28 = vshrl.u32 %v6472_v49, 16 }
 0x189   : > { %v5982_v15 = vpop.f32.mrf.mxu1 }
 0x18a   : > { %v6034_v54 = vpop.f32.mrf.mxu0  ;;  %v3948_v15 = vshll.u32 %v6472_v49, 16 }
 0x18b   : > { %v1921_v31 = vpop.f32.mrf.mxu1 }
 0x18c   : > { %v2619_v55 = vpop.f32.mrf.mxu0  ;;  %v2070_v19 = vadd.f32 %v1921_v31, %v7388_v34  ;;  %v3938_v34 = vor.u32 %v3936_v62, %v3934_v40  ;;  %v3956_v31 = vshll.u32 %v7643_v53, 16  ;;  %v3950_v17 = vrot.slane %v3948_v15, 1 }
 0x18d   : > { %v5985_v26 = vpop.f32.mrf.mxu1  ;;  %6192 = vmatmul.mubr.msk.bf16.gmra.mxu1 %vm663_vm1, %v3919_v56 }
 0x18e   : > { %v6037_v37 = vpop.f32.mrf.mxu0  ;;  %6244 = vmatmul.mubr.msk.bf16.gmra.mxu0 %vm663_vm1, %v4398_v1  ;;  %v7639_v29 = vadd.f32 %v2619_v55, %v2070_v19  ;;  %6195 = vmatprep.mubr.msk.bf16.mxu1 %vm663_vm1, %v3927_v24  ;;  %v4404_v1 = vsel %vm1223_vm2, %v4401_v18, %v4403_v36  ;;  %v4407_v19 = vrot.slane %v7643_v53, 1  ;;  %v6474_v18 = vld [vmem:[%s6668_s21 + $0x88] sm:$0xff]  }
 0x18f   : > { %6247 = vmatprep.mubr.msk.bf16.mxu0 %vm663_vm1, %v4400_v50  ;;  %v1933_v2 = vpop.f32.mrf.mxu1  ;;  %v3935_v50 = vsel %vm454_vm0, %v3930_v48, %v3934_v40  ;;  %v3946_v40 = vor.u32 %v3944_v7, %v3942_v25 }
 0x190   : > { %v2631_v11 = vpop.f32.mrf.mxu0  ;;  %v2072_v61 = vadd.f32 %v1933_v2, %v7396_v23  ;;  %v3943_v23 = vsel %vm454_vm0, %v3938_v34, %v3942_v25  ;;  %v3954_v2 = vor.u32 %v3952_v28, %v3950_v17 }
 0x191   : > { %v5986_v54 = vpop.f32.mrf.mxu1 }
 0x192   : > { %v6038_v46 = vpop.f32.mrf.mxu0  ;;  %v7648_v55 = vadd.f32 %v2631_v11, %v2072_v61  ;;  %v2074_v39 = vadd.f32 %v5986_v54, %v7402_v9  ;;  %v4405_v9 = vrot.slane %v6472_v49, 1  ;;  %v7668_v49 = vld [vmem:[%s6668_s21 + $0x90] sm:$0xff]  }
 0x193   : > { %v1936_v56 = vpop.f32.mrf.mxu1 }
 0x194   : > { %v2634_v47 = vpop.f32.mrf.mxu0  ;;  %v7656_v37 = vadd.f32 %v6038_v46, %v2074_v39  ;;  %v2073_v24 = vadd.f32 %v1936_v56, %v7407_v41  ;;  %v3958_v46 = vrot.slane %v3956_v31, 1  ;;  %v3951_v39 = vsel %vm454_vm0, %v3946_v40, %v3950_v17 }
 0x195   : > { %v5989_v62 = vpop.f32.mrf.mxu1  ;;  %6196 = vmatmul.mubr.msk.bf16.gmra.mxu1 %vm663_vm1, %v3935_v50  ;;  %v3960_v50 = vshrl.u32 %v7643_v53, 16 }
 0x196   : > { %v6041_v43 = vpop.f32.mrf.mxu0  ;;  %6248 = vmatmul.mubr.msk.bf16.gmra.mxu0 %vm663_vm1, %v4402_v6  ;;  %v7663_v26 = vadd.f32 %v2634_v47, %v2073_v24  ;;  %v2076_v11 = vadd.f32 %v5989_v62, %v7414_v42  ;;  %6199 = vmatprep.mubr.msk.bf16.mxu1 %vm663_vm1, %v3943_v23  ;;  %v4406_v6 = vsel %vm1223_vm2, %v4403_v36, %v4405_v9  ;;  %v3964_v42 = vshll.u32 %v6474_v18, 16 }
 0x197   : > { %6251 = vmatprep.mubr.msk.bf16.mxu0 %vm663_vm1, %v4404_v1  ;;  %v1948_v41 = vpop.f32.mrf.mxu1  ;;  %v4408_v1 = vsel %vm1223_vm2, %v4405_v9, %v4407_v19  ;;  %v3968_v36 = vshrl.u32 %v6474_v18, 16  ;;  %v4411_v24 = vrot.slane %v7668_v49, 1  ;;  %v6476_v9 = vld [vmem:[%s6668_s21 + $0x98] sm:$0xff]  }
 0x198   : > { %v2646_v16 = vpop.f32.mrf.mxu0  ;;  %v7670_v34 = vadd.f32 %v6041_v43, %v2076_v11  ;;  %v2075_v61 = vadd.f32 %v1948_v41, %v7418_v8  ;;  %v3959_v8 = vsel %vm454_vm0, %v3954_v2, %v3958_v46  ;;  %v3972_v43 = vshll.u32 %v7668_v49, 16 }
 0x199   : > { %v5990_v54 = vpop.f32.mrf.mxu1  ;;  %v3966_v53 = vrot.slane %v3964_v42, 1 }
 0x19a   : > { %v6042_v48 = vpop.f32.mrf.mxu0  ;;  %v7675_v25 = vadd.f32 %v2646_v16, %v2075_v61  ;;  %v2077_v15 = vadd.f32 %v5990_v54, %v7424_v51  ;;  %v4409_v51 = vrot.slane %v6474_v18, 1  ;;  %v3962_v16 = vor.u32 %v3960_v50, %v3958_v46 }
 0x19b   : > { %v1951_v7 = vpop.f32.mrf.mxu1  ;;  %v3970_v40 = vor.u32 %v3968_v36, %v3966_v53  ;;  %v3974_v41 = vrot.slane %v3972_v43, 1  ;;  %v3976_v46 = vshrl.u32 %v7668_v49, 16  ;;  %v6478_v43 = vld [vmem:[%s6668_s21 + $0xa8] sm:$0xff]  }
 0x19c   : > { %v2649_v47 = vpop.f32.mrf.mxu0  ;;  %v7683_v23 = vadd.f32 %v6042_v48, %v2077_v15  ;;  %v7692_v48 = vld [vmem:[%s6668_s21 + $0xa0] sm:$0xff]   ;;  %v4410_v2 = vsel %vm1223_vm2, %v4407_v19, %v4409_v51  ;;  %v4412_v54 = vsel %vm1223_vm2, %v4409_v51, %v4411_v24  ;;  %v4413_v7 = vrot.slane %v6476_v9, 1 }
 0x19d   : > { %v5993_v28 = vpop.f32.mrf.mxu1  ;;  %6200 = vmatmul.mubr.msk.bf16.gmra.mxu1 %vm663_vm1, %v3951_v39  ;;  %v3980_v47 = vshll.u32 %v6476_v9, 16  ;;  %v3975_v15 = vsel %vm454_vm0, %v3970_v40, %v3974_v41  ;;  %v3984_v39 = vshrl.u32 %v6476_v9, 16  ;;  %v3988_v50 = vshll.u32 %v7692_v48, 16 }
 0x19e   : > { %v6045_v56 = vpop.f32.mrf.mxu0  ;;  %6252 = vmatmul.mubr.msk.bf16.gmra.mxu0 %vm663_vm1, %v4406_v6  ;;  %v2079_v62 = vadd.f32 %v5993_v28, %v7433_v60  ;;  %6203 = vmatprep.mubr.msk.bf16.mxu1 %vm663_vm1, %v3959_v8  ;;  %v3967_v60 = vsel %vm454_vm0, %v3962_v16, %v3966_v53  ;;  %v4415_v36 = vrot.slane %v7692_v48, 1  ;;  %v3978_v28 = vor.u32 %v3976_v46, %v3974_v41  ;;  %v7712_v16 = vld [vmem:[%s6668_s21 + $0xb0] sm:$0xff]  }
 0x19f   : > { %6255 = vmatprep.mubr.msk.bf16.mxu0 %vm663_vm1, %v4408_v1  ;;  %v1963_v17 = vpop.f32.mrf.mxu1  ;;  %v3982_v49 = vrot.slane %v3980_v47, 1  ;;  %v3992_v47 = vshrl.u32 %v7692_v48, 16 }
 0x1a0   : > { %v2661_v31 = vpop.f32.mrf.mxu0  ;;  %v7694_v18 = vadd.f32 %v6045_v56, %v2079_v62  ;;  %v3990_v62 = vrot.slane %v3988_v50, 1  ;;  %v4414_v17 = vsel %vm1223_vm2, %v4411_v24, %v4413_v7  ;;  %v4000_v24 = vshrl.u32 %v6478_v43, 16 }
 0x1a1   : > { %v5994_v61 = vpop.f32.mrf.mxu1 }
 0x1a2   : > { %v6046_v11 = vpop.f32.mrf.mxu0  ;;  %v3996_v61 = vshll.u32 %v6478_v43, 16 }
 0x1a3   : > { %v1965_v1 = vpop.f32.mrf.mxu1 }
 0x1a4   : > { %v2663_v6 = vpop.f32.mrf.mxu0  ;;  %v2078_v19 = vadd.f32 %v1965_v1, %v7442_v52  ;;  %v3986_v52 = vor.u32 %v3984_v39, %v3982_v49  ;;  %v4004_v1 = vshll.u32 %v7712_v16, 16  ;;  %v3998_v50 = vrot.slane %v3996_v61, 1 }
 0x1a5   : > { %v5997_v56 = vpop.f32.mrf.mxu1  ;;  %6204 = vmatmul.mubr.msk.bf16.gmra.mxu1 %vm663_vm1, %v3967_v60 }
 0x1a6   : > { %v6049_v42 = vpop.f32.mrf.mxu0  ;;  %6256 = vmatmul.mubr.msk.bf16.gmra.mxu0 %vm663_vm1, %v4410_v2  ;;  %v7708_v51 = vadd.f32 %v2663_v6, %v2078_v19  ;;  %6207 = vmatprep.mubr.msk.bf16.mxu1 %vm663_vm1, %v3975_v15  ;;  %v4416_v2 = vsel %vm1223_vm2, %v4413_v7, %v4415_v36  ;;  %v4419_v19 = vrot.slane %v7712_v16, 1  ;;  %v6480_v7 = vld [vmem:[%s6668_s21 + $0xb8] sm:$0xff]  }
 0x1a7   : > { %6259 = vmatprep.mubr.msk.bf16.mxu0 %vm663_vm1, %v4412_v54  ;;  %v1977_v31 = vpop.f32.mrf.mxu1  ;;  %v3983_v54 = vsel %vm454_vm0, %v3978_v28, %v3982_v49  ;;  %v3994_v49 = vor.u32 %v3992_v47, %v3990_v62 }
 0x1a8   : > { %v2675_v8 = vpop.f32.mrf.mxu0  ;;  %v2080_v9 = vadd.f32 %v1977_v31, %v7450_v63  ;;  %v3991_v63 = vsel %vm454_vm0, %v3986_v52, %v3990_v62  ;;  %v4002_v31 = vor.u32 %v4000_v24, %v3998_v50 }
 0x1a9   : > { %v5998_v11 = vpop.f32.mrf.mxu1 }
 0x1aa   : > { %v6050_v53 = vpop.f32.mrf.mxu0  ;;  %v7717_v6 = vadd.f32 %v2675_v8, %v2080_v9  ;;  %v2082_v41 = vadd.f32 %v5998_v11, %v7456_v4  ;;  %v4417_v4 = vrot.slane %v6478_v43, 1  ;;  %v7737_v43 = vld [vmem:[%s6668_s21 + $0xc0] sm:$0xff]  }
 0x1ab   : > { %v1980_v60 = vpop.f32.mrf.mxu1 }
 0x1ac   : > { %v2678_v40 = vpop.f32.mrf.mxu0  ;;  %v7725_v42 = vadd.f32 %v6050_v53, %v2082_v41  ;;  %v2081_v15 = vadd.f32 %v1980_v60, %v7461_v45  ;;  %v4006_v53 = vrot.slane %v4004_v1, 1  ;;  %v3999_v41 = vsel %vm454_vm0, %v3994_v49, %v3998_v50 }
 0x1ad   : > { %v6001_v39 = vpop.f32.mrf.mxu1  ;;  %6208 = vmatmul.mubr.msk.bf16.gmra.mxu1 %vm663_vm1, %v3983_v54  ;;  %v4008_v54 = vshrl.u32 %v7712_v16, 16 }
 0x1ae   : > { %v6053_v46 = vpop.f32.mrf.mxu0  ;;  %6260 = vmatmul.mubr.msk.bf16.gmra.mxu0 %vm663_vm1, %v4414_v17  ;;  %v7732_v56 = vadd.f32 %v2678_v40, %v2081_v15  ;;  %v2084_v8 = vadd.f32 %v6001_v39, %v7468_v21  ;;  %6211 = vmatprep.mubr.msk.bf16.mxu1 %vm663_vm1, %v3991_v63  ;;  %v4418_v17 = vsel %vm1223_vm2, %v4415_v36, %v4417_v4  ;;  %v4012_v21 = vshll.u32 %v6480_v7, 16 }
 0x1af   : > { %6263 = vmatprep.mubr.msk.bf16.mxu0 %vm663_vm1, %v4416_v2  ;;  %v1992_v45 = vpop.f32.mrf.mxu1  ;;  %v4420_v2 = vsel %vm1223_vm2, %v4417_v4, %v4419_v19  ;;  %v4016_v36 = vshrl.u32 %v6480_v7, 16  ;;  %v4423_v15 = vrot.slane %v7737_v43, 1  ;;  %v6482_v4 = vld [vmem:[%s6668_s21 + $0xc8] sm:$0xff]  }
 0x1b0   : > { %v2690_v48 = vpop.f32.mrf.mxu0  ;;  %v7739_v52 = vadd.f32 %v6053_v46, %v2084_v8  ;;  %v2083_v9 = vadd.f32 %v1992_v45, %v7472_v44  ;;  %v4007_v44 = vsel %vm454_vm0, %v4002_v31, %v4006_v53  ;;  %v4020_v46 = vshll.u32 %v7737_v43, 16 }
 0x1b1   : > { %v6002_v11 = vpop.f32.mrf.mxu1  ;;  %v4014_v16 = vrot.slane %v4012_v21, 1 }
 0x1b2   : > { %v6054_v28 = vpop.f32.mrf.mxu0  ;;  %v7744_v62 = vadd.f32 %v2690_v48, %v2083_v9  ;;  %v2085_v61 = vadd.f32 %v6002_v11, %v7478_v13  ;;  %v4421_v13 = vrot.slane %v6480_v7, 1  ;;  %v4010_v48 = vor.u32 %v4008_v54, %v4006_v53 }
 0x1b3   : > { %v1995_v47 = vpop.f32.mrf.mxu1  ;;  %v4018_v49 = vor.u32 %v4016_v36, %v4014_v16  ;;  %v4022_v45 = vrot.slane %v4020_v46, 1  ;;  %v4024_v11 = vshrl.u32 %v7737_v43, 16  ;;  %v4425_v43 = vrot.slane %v6482_v4, 1 }
 0x1b4   : > { %v2693_v40 = vpop.f32.mrf.mxu0  ;;  %v7752_v63 = vadd.f32 %v6054_v28, %v2085_v61  ;;  %v7761_v28 = vld [vmem:[%s6668_s21 + $0xd0] sm:$0xff]   ;;  %v4422_v31 = vsel %vm1223_vm2, %v4419_v19, %v4421_v13  ;;  %v4015_v53 = vsel %vm454_vm0, %v4010_v48, %v4014_v16 }
 0x1b5   : > { %v6005_v24 = vpop.f32.mrf.mxu1  ;;  %6212 = vmatmul.mubr.msk.bf16.gmra.mxu1 %vm663_vm1, %v3999_v41  ;;  %v4424_v40 = vsel %vm1223_vm2, %v4421_v13, %v4423_v15  ;;  %v4023_v61 = vsel %vm454_vm0, %v4018_v49, %v4022_v45  ;;  %v4032_v41 = vshrl.u32 %v6482_v4, 16  ;;  %v4036_v54 = vshll.u32 %v7761_v28, 16 }
 0x1b6   : > { %v6057_v60 = vpop.f32.mrf.mxu0  ;;  %6264 = vmatmul.mubr.msk.bf16.gmra.mxu0 %vm663_vm1, %v4418_v17  ;;  %v2087_v39 = vadd.f32 %v6005_v24, %v7487_v59  ;;  %6215 = vmatprep.mubr.msk.bf16.mxu1 %vm663_vm1, %v4007_v44  ;;  %v4028_v59 = vshll.u32 %v6482_v4, 16  ;;  %v4026_v44 = vor.u32 %v4024_v11, %v4022_v45  ;;  %v4427_v46 = vrot.slane %v7761_v28, 1  ;;  %v6484_v24 = vld [vmem:[%s6668_s21 + $0xd8] ss:$0 sps:$4 sm:$0x11]   ;;  %s5496_s21 = sshll.u32 %s6654_s7, 7 }
 0x1b7   : > { %6267 = vmatprep.mubr.msk.bf16.mxu0 %vm663_vm1, %v4420_v2  ;;  %v2007_v50 = vpop.f32.mrf.mxu1  ;;  %v4426_v4 = vsel %vm1223_vm2, %v4423_v15, %v4425_v43  ;;  %v4044_v11 = vshll.u32 %v6484_v24, 16  ;;  %s7915_s26 = scalar_lea.vmem %s8100_s3, %s5496_s21  ;;  %s249_s7 = sand.u32 1, %s6545_s16  }
 0x1b8   : > { %v2705_v1 = vpop.f32.mrf.mxu0  ;;  %v7763_v7 = vadd.f32 %v6057_v60, %v2087_v39  ;;  %v4030_v36 = vrot.slane %v4028_v59, 1  ;;  %v4428_v45 = vsel %vm1223_vm2, %v4425_v43, %v4427_v46  ;;  %s5094_s5 = sshll.u32 %s249_s7, 8  ;;  %s8052_s13 = scalar_lea.sflag [#allocation3], %s249_s7 }
 0x1b9   : > { %v6006_v9 = vpop.f32.mrf.mxu1  ;;  %s7938_s6 = scalar_lea.vmem [#allocation2], %s5094_s5  ;;  %s6489_s21 = sshll.u32 %s6563_s18, 4  ;;  %s6490_s21 = int_to_ptr.vmem [resolvable:$false] %s6489_s21 }
 0x1ba   : > { %v6058_v8 = vpop.f32.mrf.mxu0  ;;  %v4034_v39 = vor.u32 %v4032_v41, %v4030_v36  ;;  %v4031_v49 = vsel %vm454_vm0, %v4026_v44, %v4030_v36  ;;  %s4970_s9 = sshll.u32 %s7938_s6, 4  ;;  %s6491_s22 = scalar_lea.vmem %s6490_s21, 8192  ;;  %s8047_s9 = int_to_ptr.vmem [resolvable:$true] %s4970_s9 }
 0x1bb   : > { %v2009_v2 = vpop.f32.mrf.mxu1  ;;  %s6485_s14 = scalar_lea.vmem %s8047_s9, 4096  ;;  %p6492_p1 = scmp.lt.s32.totalorder %s8047_s9, %s6490_s21 }
 0x1bc   : > { %v2707_v17 = vpop.f32.mrf.mxu0  ;;  %v2086_v19 = vadd.f32 %v2009_v2, %v7498_v22  ;;  %v4038_v22 = vrot.slane %v4036_v54, 1  ;;  %v4429_v2 = vrot.slane %v6484_v24, 1  ;;  %v4046_v54 = vrot.slane %v4044_v11, 1  ;;  %p6486_p12 = scmp.ne.s32.totalorder %s8047_s9, %s6485_s14  ;;  %p6493_p2 = scmp.lt.s32.totalorder %s6491_s22, %s6485_s14 }
 0x1bd   : > { %v6009_v47 = vpop.f32.mrf.mxu1  ;;  %6216 = vmatmul.mubr.msk.bf16.gmra.mxu1 %vm663_vm1, %v4015_v53 }
 0x1be   : > { %v6061_v21 = vpop.f32.mrf.mxu0  ;;  %6268 = vmatmul.mubr.msk.bf16.gmra.mxu0 %vm663_vm1, %v4422_v31  ;;  %v7776_v13 = vadd.f32 %v2707_v17, %v2086_v19  ;;  %6219 = vmatprep.mubr.msk.bf16.mxu1 %vm663_vm1, %v4023_v61  ;;  %v4040_v17 = vshrl.u32 %v7761_v28, 16  ;;  %p6487_p13 = pnand %p6486_p12, %p6631_p4  ;;  %p6494_p3 = por %p6493_p2, %p6492_p1 }
 0x1bf   : > { %6271 = vmatprep.mubr.msk.bf16.mxu0 %vm663_vm1, %v4424_v40  ;;  %v2021_v1 = vpop.f32.mrf.mxu1 }
 0x1c0   : > { %v2719_v60 = vpop.f32.mrf.mxu0  ;;  %v2088_v48 = vadd.f32 %v2021_v1, %v7510_v57  ;;  %v4039_v57 = vsel %vm454_vm0, %v4034_v39, %v4038_v22  ;;  %v4042_v41 = vor.u32 %v4040_v17, %v4038_v22  ;;  %p6488_p0 = pneg %p6487_p13 }
 0x1c1   : > { %v6010_v50 = vpop.f32.mrf.mxu1 }
 0x1c2   : > { %v6062_v16 = vpop.f32.mrf.mxu0  ;;  %v7784_v31 = vadd.f32 %v2719_v60, %v2088_v48  ;;  %v2090_v9 = vadd.f32 %v6010_v50, %v7517_v58  ;;  %v4430_v60 = vsel %vm1223_vm2, %v4427_v46, %v4429_v2  ;;  %p6495_p5 = pnand %p6494_p3, %p6488_p0 }
 0x1c3   : > { %v2024_v40 = vpop.f32.mrf.mxu1 }
 0x1c4   : > { %v2722_v8 = vpop.f32.mrf.mxu0  ;;  %v7790_v15 = vadd.f32 %v6062_v16, %v2090_v9  ;;  %v2089_v53 = vadd.f32 %v2024_v40, %v7524_v32 }
 0x1c5   : > { %v6013_v21 = vpop.f32.mrf.mxu1  ;;  %6220 = vmatmul.mubr.msk.bf16.gmra.mxu1 %vm663_vm1, %v4031_v49 }
 0x1c6   : > { %v6065_v59 = vpop.f32.mrf.mxu0  ;;  %6272 = vmatmul.mubr.msk.bf16.gmra.mxu0 %vm663_vm1, %v4426_v4  ;;  %v7795_v61 = vadd.f32 %v2722_v8, %v2089_v53  ;;  %v2092_v28 = vadd.f32 %v6013_v21, %v7533_v33  ;;  %6223 = vmatprep.mubr.msk.bf16.mxu1 %vm663_vm1, %v4039_v57  ;;  %v4047_v33 = vsel %vm454_vm0, %v4042_v41, %v4046_v54 }
 0x1c7   : > { %6275 = vmatprep.mubr.msk.bf16.mxu0 %vm663_vm1, %v4428_v45  ;;  %v2036_v19 = vpop.f32.mrf.mxu1 }
 0x1c8   : > { %v2734_v58 = vpop.f32.mrf.mxu0  ;;  %v7799_v47 = vadd.f32 %v6065_v59, %v2092_v28  ;;  %v2091_v32 = vadd.f32 %v2036_v19, %v7537_v30 }
 0x1c9   : > { %v6014_v44 = vpop.f32.mrf.mxu1 }
 0x1ca   : > { %v6066_v43 = vpop.f32.mrf.mxu0  ;;  %v7803_v24 = vadd.f32 %v2734_v58, %v2091_v32  ;;  %v2093_v1 = vadd.f32 %v6014_v44, %v7545_v27 }
 0x1cb   : > { %v2039_v16 = vpop.f32.mrf.mxu1 }
 0x1cc   : > { %v2737_v36 = vpop.f32.mrf.mxu0  ;;  %v7808_v22 = vadd.f32 %v6066_v43, %v2093_v1 }
 0x1cd   : > { %v6017_v48 = vpop.f32.mrf.mxu1  ;;  %6224 = vmatmul.mubr.msk.bf16.gmra.mxu1 %vm663_vm1, %v4047_v33 }
 0x1ce   : > { %v6069_v39 = vpop.f32.mrf.mxu0  ;;  %6276 = vmatmul.mubr.msk.bf16.gmra.mxu0 %vm663_vm1, %v4430_v60  ;;  %v2095_v46 = vadd.f32 %v6017_v48, %v7556_v3 }
 0x1cf   : > { %v2051_v4 = vpop.f32.mrf.mxu1 }
 0x1d0   : > { %v2749_v30 = vpop.f32.mrf.mxu0  ;;  %v7812_v8 = vadd.f32 %v6069_v39, %v2095_v46 }
 0x1d1   : > { %v6018_v49 = vpop.f32.mrf.mxu1 }
 0x1d2   : > { %v6070_v50 = vpop.f32.mrf.mxu0 }
 0x1d3   : > { %v2053_v45 = vpop.f32.mrf.mxu1 }
 0x1d4   : > { %v2751_v27 = vpop.f32.mrf.mxu0  ;;  %v2094_v17 = vadd.f32 %v2053_v45, %v7570_v12 }
 0x1d5   : > { %v6077_v11 = vpop.f32.mrf.mxu1 }
 0x1d6   : > { %v6129_v9 = vpop.f32.mrf.mxu0  ;;  %v7815_v59 = vadd.f32 %v2751_v27, %v2094_v17 }
 0x1d7   : > { %v2970_v57 = vpop.f32.mrf.mxu1 }
 0x1d8   : > { %v3468_v40 = vpop.f32.mrf.mxu0  ;;  %v3145_v2 = vadd.f32 %v2970_v57, %v7579_v5 }
 0x1d9   : > { %v6078_v21 = vpop.f32.mrf.mxu1 }
 0x1da   : > { %v6130_v53 = vpop.f32.mrf.mxu0  ;;  %v7818_v58 = vadd.f32 %v3468_v40, %v3145_v2  ;;  %v3147_v28 = vadd.f32 %v6078_v21, %v7587_v20 }
 0x1db   : > { %v2973_v41 = vpop.f32.mrf.mxu1 }
 0x1dc   : > { %v3471_v3 = vpop.f32.mrf.mxu0  ;;  %v7821_v19 = vadd.f32 %v6130_v53, %v3147_v28  ;;  %v3146_v12 = vadd.f32 %v2973_v41, %v7594_v0 }
 0x1dd   : > { %v6081_v43 = vpop.f32.mrf.mxu1 }
 0x1de   : > { %v6133_v54 = vpop.f32.mrf.mxu0  ;;  %v7824_v60 = vadd.f32 %v3471_v3, %v3146_v12  ;;  %v3149_v44 = vadd.f32 %v6081_v43, %v7601_v10 }
 0x1df   : > { %v2985_v36 = vpop.f32.mrf.mxu1 }
 0x1e0   : > { %v3483_v32 = vpop.f32.mrf.mxu0  ;;  %v7827_v1 = vadd.f32 %v6133_v54, %v3149_v44  ;;  %v3148_v33 = vadd.f32 %v2985_v36, %v7606_v14 }
 0x1e1   : > { %v6082_v16 = vpop.f32.mrf.mxu1 }
 0x1e2   : > { %v6134_v5 = vpop.f32.mrf.mxu0  ;;  %v7830_v39 = vadd.f32 %v3483_v32, %v3148_v33  ;;  %v3150_v48 = vadd.f32 %v6082_v16, %v7614_v35 }
 0x1e3   : > { %v2988_v30 = vpop.f32.mrf.mxu1 }
 0x1e4   : > { %v3486_v20 = vpop.f32.mrf.mxu0  ;;  %v7833_v46 = vadd.f32 %v6134_v5, %v3150_v48 }
 0x1e5   : > { %v6085_v4 = vpop.f32.mrf.mxu1 }
 0x1e6   : > { %v6137_v0 = vpop.f32.mrf.mxu0  ;;  %v3152_v10 = vadd.f32 %v6085_v4, %v7625_v38 }
 0x1e7   : > { %v3000_v49 = vpop.f32.mrf.mxu1 }
 0x1e8   : > { %v3498_v50 = vpop.f32.mrf.mxu0  ;;  %v7836_v45 = vadd.f32 %v6137_v0, %v3152_v10 }
 0x1e9   : > { %v6086_v9 = vpop.f32.mrf.mxu1 }
 0x1ea   : > { %v6138_v27 = vpop.f32.mrf.mxu0 }
 0x1eb   : > { %v3002_v17 = vpop.f32.mrf.mxu1 }
 0x1ec   : > { %v3500_v14 = vpop.f32.mrf.mxu0  ;;  %v3151_v40 = vadd.f32 %v3002_v17, %v7639_v29 }
 0x1ed   : > { %v6089_v57 = vpop.f32.mrf.mxu1 }
 0x1ee   : > { %v6141_v11 = vpop.f32.mrf.mxu0  ;;  %v7839_v53 = vadd.f32 %v3500_v14, %v3151_v40 }
 0x1ef   : > { %v3014_v2 = vpop.f32.mrf.mxu1 }
 0x1f0   : > { %v3512_v35 = vpop.f32.mrf.mxu0  ;;  %v3153_v3 = vadd.f32 %v3014_v2, %v7648_v55 }
 0x1f1   : > { %v6090_v28 = vpop.f32.mrf.mxu1 }
 0x1f2   : > { %v6142_v21 = vpop.f32.mrf.mxu0  ;;  %v7842_v41 = vadd.f32 %v3512_v35, %v3153_v3  ;;  %v3155_v54 = vadd.f32 %v6090_v28, %v7656_v37 }
 0x1f3   : > { %v3017_v12 = vpop.f32.mrf.mxu1 }
 0x1f4   : > { %v3515_v38 = vpop.f32.mrf.mxu0  ;;  %v7845_v32 = vadd.f32 %v6142_v21, %v3155_v54  ;;  %v3154_v29 = vadd.f32 %v3017_v12, %v7663_v26 }
 0x1f5   : > { %v6093_v44 = vpop.f32.mrf.mxu1 }
 0x1f6   : > { %v6145_v43 = vpop.f32.mrf.mxu0  ;;  %v7848_v5 = vadd.f32 %v3515_v38, %v3154_v29  ;;  %v3157_v33 = vadd.f32 %v6093_v44, %v7670_v34 }
 0x1f7   : > { %v3029_v16 = vpop.f32.mrf.mxu1 }
 0x1f8   : > { %v3527_v36 = vpop.f32.mrf.mxu0  ;;  %v7851_v20 = vadd.f32 %v6145_v43, %v3157_v33  ;;  %v3156_v48 = vadd.f32 %v3029_v16, %v7675_v25 }
 0x1f9   : > { %v6094_v30 = vpop.f32.mrf.mxu1 }
 0x1fa   : > { %v6146_v55 = vpop.f32.mrf.mxu0  ;;  %v7854_v0 = vadd.f32 %v3527_v36, %v3156_v48  ;;  %v3158_v4 = vadd.f32 %v6094_v30, %v7683_v23 }
 0x1fb   : > { %v3032_v50 = vpop.f32.mrf.mxu1 }
 0x1fc   : > { %v3530_v37 = vpop.f32.mrf.mxu0  ;;  %v7857_v10 = vadd.f32 %v6146_v55, %v3158_v4 }
 0x1fd   : > { %v6097_v49 = vpop.f32.mrf.mxu1 }
 0x1fe   : > { %v6149_v26 = vpop.f32.mrf.mxu0  ;;  %v3160_v34 = vadd.f32 %v6097_v49, %v7694_v18 }
 0x1ff   : > { %v3044_v9 = vpop.f32.mrf.mxu1 }
 0x200   : > { %v3542_v27 = vpop.f32.mrf.mxu0  ;;  %v7860_v17 = vadd.f32 %v6149_v26, %v3160_v34 }
 0x201   : > { %v6098_v11 = vpop.f32.mrf.mxu1 }
 0x202   : > { %v6150_v14 = vpop.f32.mrf.mxu0 }
 0x203   : > { %v3046_v40 = vpop.f32.mrf.mxu1 }
 0x204   : > { %v3544_v25 = vpop.f32.mrf.mxu0  ;;  %v3159_v35 = vadd.f32 %v3046_v40, %v7708_v51 }
 0x205   : > { %v6101_v2 = vpop.f32.mrf.mxu1 }
 0x206   : > { %v6153_v57 = vpop.f32.mrf.mxu0  ;;  %v7863_v21 = vadd.f32 %v3544_v25, %v3159_v35 }
 0x207   : > { %v3058_v3 = vpop.f32.mrf.mxu1 }
 0x208   : > { %v3556_v23 = vpop.f32.mrf.mxu0  ;;  %v3161_v38 = vadd.f32 %v3058_v3, %v7717_v6 }
 0x209   : > { %v6102_v54 = vpop.f32.mrf.mxu1 }
 0x20a   : > { %v6154_v28 = vpop.f32.mrf.mxu0  ;;  %v7866_v12 = vadd.f32 %v3556_v23, %v3161_v38  ;;  %v3163_v43 = vadd.f32 %v6102_v54, %v7725_v42 }
 0x20b   : > { %v3061_v29 = vpop.f32.mrf.mxu1 }
 0x20c   : > { %v3559_v18 = vpop.f32.mrf.mxu0  ;;  %v7869_v36 = vadd.f32 %v6154_v28, %v3163_v43  ;;  %v3162_v51 = vadd.f32 %v3061_v29, %v7732_v56 }
 0x20d   : > { %v6105_v33 = vpop.f32.mrf.mxu1 }
 0x20e   : > { %v6157_v44 = vpop.f32.mrf.mxu0  ;;  %v7872_v55 = vadd.f32 %v3559_v18, %v3162_v51  ;;  %v3165_v48 = vadd.f32 %v6105_v33, %v7739_v52 }
 0x20f   : > { %v3073_v30 = vpop.f32.mrf.mxu1 }
 0x210   : > { %v3571_v16 = vpop.f32.mrf.mxu0  ;;  %v7875_v37 = vadd.f32 %v6157_v44, %v3165_v48  ;;  %v3164_v4 = vadd.f32 %v3073_v30, %v7744_v62 }
 0x211   : > { %v6106_v50 = vpop.f32.mrf.mxu1 }
 0x212   : > { %v6158_v6 = vpop.f32.mrf.mxu0  ;;  %v7878_v26 = vadd.f32 %v3571_v16, %v3164_v4  ;;  %v3166_v49 = vadd.f32 %v6106_v50, %v7752_v63 }
 0x213   : > { %v3076_v27 = vpop.f32.mrf.mxu1 }
 0x214   : > { %v3574_v42 = vpop.f32.mrf.mxu0  ;;  %v7881_v34 = vadd.f32 %v6158_v6, %v3166_v49 }
 0x215   : > { %v6109_v9 = vpop.f32.mrf.mxu1 }
 0x216   : > { %v6161_v56 = vpop.f32.mrf.mxu0  ;;  %v3168_v52 = vadd.f32 %v6109_v9, %v7763_v7 }
 0x217   : > { %v3088_v11 = vpop.f32.mrf.mxu1 }
 0x218   : > { %v3586_v14 = vpop.f32.mrf.mxu0  ;;  %v7884_v40 = vadd.f32 %v6161_v56, %v3168_v52 }
 0x219   : > { %v6110_v57 = vpop.f32.mrf.mxu1 }
 0x21a   : > { %v6162_v25 = vpop.f32.mrf.mxu0 }
 0x21b   : > { %v3090_v35 = vpop.f32.mrf.mxu1 }
 0x21c   : > { %v3588_v62 = vpop.f32.mrf.mxu0  ;;  %v3167_v23 = vadd.f32 %v3090_v35, %v7776_v13 }
 0x21d   : > { %v6113_v3 = vpop.f32.mrf.mxu1 }
 0x21e   : > { %v6165_v2 = vpop.f32.mrf.mxu0  ;;  %v7887_v28 = vadd.f32 %v3588_v62, %v3167_v23 }
 0x21f   : > { %v3102_v38 = vpop.f32.mrf.mxu1 }
 0x220   : > { %v3600_v63 = vpop.f32.mrf.mxu0  ;;  %v3169_v18 = vadd.f32 %v3102_v38, %v7784_v31 }
 0x221   : > { %v6114_v43 = vpop.f32.mrf.mxu1 }
 0x222   : > { %v6166_v54 = vpop.f32.mrf.mxu0  ;;  %v7890_v29 = vadd.f32 %v3600_v63, %v3169_v18  ;;  %v3171_v44 = vadd.f32 %v6114_v43, %v7790_v15  ;;  %v5499_v18 = vld [vmem:[%s7915_s26] sm:$0xff]  }
 0x223   : > { %v3105_v51 = vpop.f32.mrf.mxu1 }
 0x224   : > { %v3603_v7 = vpop.f32.mrf.mxu0  ;;  %v7893_v16 = vadd.f32 %v6166_v54, %v3171_v44  ;;  %v3170_v13 = vadd.f32 %v3105_v51, %v7795_v61  ;;  %v5562_v51 = vld [vmem:[%s7915_s26 + $0x8] sm:$0xff]  }
 0x225   : > { %v6117_v48 = vpop.f32.mrf.mxu1 }
 0x226   : > { %v6169_v33 = vpop.f32.mrf.mxu0  ;;  %v7896_v6 = vadd.f32 %v3603_v7, %v3170_v13  ;;  %v3173_v4 = vadd.f32 %v6117_v48, %v7799_v47  ;;  %v5500_v48 = vunpack.c.l.bf16 %v5499_v18 }
 0x227   : > { %v3117_v50 = vpop.f32.mrf.mxu1 }
 0x228   : > { %v3615_v30 = vpop.f32.mrf.mxu0  ;;  %v7899_v42 = vadd.f32 %v6169_v33, %v3173_v4  ;;  %v3172_v49 = vadd.f32 %v3117_v50, %v7803_v24 }
 0x229   : > { %v6118_v15 = vpop.f32.mrf.mxu1 }
 0x22a   : > { %v6170_v31 = vpop.f32.mrf.mxu0  ;;  %v7902_v56 = vadd.f32 %v3615_v30, %v3172_v49  ;;  %v3174_v9 = vadd.f32 %v6118_v15, %v7808_v22  ;;  %v5504_v49 = vunpack.c.l.bf16 %v5562_v51 }
 0x22b   : > { %v3120_v61 = vpop.f32.mrf.mxu1 }
 0x22c   : > { %v3618_v27 = vpop.f32.mrf.mxu0  ;;  %v7905_v52 = vadd.f32 %v6170_v31, %v3174_v9  ;;  %v5501_v9 = vunpack.c.h.bf16 %v5499_v18 }
 0x22d   : > { %v6121_v11 = vpop.f32.mrf.mxu1  ;;  %v5563_v27 = vld [vmem:[%s7915_s26 + $0x10] sm:$0xff]  }
 0x22e   : > { %v6173_v14 = vpop.f32.mrf.mxu0  ;;  %v3176_v47 = vadd.f32 %v6121_v11, %v7812_v8 }
 0x22f   : > { %v3132_v57 = vpop.f32.mrf.mxu1 }
 0x230   : > { %v3630_v25 = vpop.f32.mrf.mxu0  ;;  %v7908_v35 = vadd.f32 %v6173_v14, %v3176_v47  ;;  %v5508_v57 = vunpack.c.l.bf16 %v5563_v27 }
 0x231   : > { %v6122_v24 = vpop.f32.mrf.mxu1 }
 0x232   : > { %v6174_v62 = vpop.f32.mrf.mxu0 }
 0x233   : > { %v3134_v23 = vpop.f32.mrf.mxu1 }
 0x234   : > { %v3632_v2 = vpop.f32.mrf.mxu0  ;;  %v3175_v22 = vadd.f32 %v3134_v23, %v7815_v59  ;;  %v7925_v59 = vld [vmem:[%s8099_s2] ss:$0 sm:$0xff] }
 0x235   : > { %v6181_v8 = vpop.f32.mrf.mxu1 }
 0x236   : > { %v6233_v3 = vpop.f32.mrf.mxu0  ;;  %v7917_v38 = vadd.f32 %v3632_v2, %v3175_v22 }
 0x237   : > { %v4166_v54 = vpop.f32.mrf.mxu1 }
 0x238   : > { %v4549_v63 = vpop.f32.mrf.mxu0  ;;  %v4341_v7 = vadd.f32 %v4166_v54, %v7818_v58 }
 0x239   : > { %v6182_v44 = vpop.f32.mrf.mxu1 }
 0x23a   : > { %v6234_v43 = vpop.f32.mrf.mxu0  ;;  %v4724_v13 = vadd.f32 %v4549_v63, %v4341_v7  ;;  %v4343_v30 = vadd.f32 %v6182_v44, %v7821_v19  ;;  %v5505_v44 = vunpack.c.h.bf16 %v5562_v51 }
 0x23b   : > { %v4169_v4 = vpop.f32.mrf.mxu1 }
 0x23c   : > { %v4552_v33 = vpop.f32.mrf.mxu0  ;;  %v4763_v58 = vadd.f32 %v7925_v59, %v4724_v13  ;;  %v4726_v31 = vadd.f32 %v6234_v43, %v4343_v30  ;;  %v4342_v15 = vadd.f32 %v4169_v4, %v7824_v60  ;;  %v5509_v4 = vunpack.c.h.bf16 %v5563_v27 }
 0x23d   : > { %v6185_v61 = vpop.f32.mrf.mxu1 }
 0x23e   : > { %v6237_v50 = vpop.f32.mrf.mxu0  ;;  %v4859_v11 = vadd.f32 %v5500_v48, %v4763_v58  ;;  %v4765_v25 = vadd.f32 %v7925_v59, %v4726_v31  ;;  %v4725_v47 = vadd.f32 %v4552_v33, %v4342_v15  ;;  %v4345_v19 = vadd.f32 %v6185_v61, %v7827_v1  ;;  %v5564_v31 = vld [vmem:[%s7915_s26 + $0x18] sm:$0xff]  }
 0x23f   : > { %v4181_v62 = vpop.f32.mrf.mxu1  ;;  %v5513_v27 = vunpack.c.h.bf16 %v5564_v31 }
 0x240   : > { %v4564_v14 = vpop.f32.mrf.mxu0  ;;  %v4891_v2 = vmax.f32 %v4859_v11, 0.0  ;;  %v4861_v23 = vadd.f32 %v5504_v49, %v4765_v25  ;;  %v4764_v3 = vadd.f32 %v7925_v59, %v4725_v47  ;;  %v4728_v22 = vadd.f32 %v6237_v50, %v4345_v19 }
 0x241   : > { %v4344_v60 = vadd.f32 %v4181_v62, %v7830_v39  ;;  %v6186_v8 = vpop.f32.mrf.mxu1 }
 0x242   : > { %v6238_v24 = vpop.f32.mrf.mxu0  ;;  %4923 = vst [vmem:[%s7938_s6] sm:$0xff] %v4891_v2  ;;  %v4893_v54 = vmax.f32 %v4861_v23, 0.0  ;;  %v4860_v1 = vadd.f32 %v5501_v9, %v4764_v3  ;;  %v4767_v18 = vadd.f32 %v7925_v59, %v4728_v22  ;;  %v4346_v43 = vadd.f32 %v6186_v8, %v7833_v46 }
 0x243   : > { %v4727_v7 = vadd.f32 %v4564_v14, %v4344_v60  ;;  %v4184_v33 = vpop.f32.mrf.mxu1 }
 0x244   : > { %v4567_v63 = vpop.f32.mrf.mxu0  ;;  %4925 = vst [vmem:[%s7938_s6 + $0x10] sm:$0xff] %v4893_v54  ;;  %v4892_v39 = vmax.f32 %v4860_v1, 0.0  ;;  %v4863_v48 = vadd.f32 %v5508_v57, %v4767_v18  ;;  %v4729_v30 = vadd.f32 %v6238_v24, %v4346_v43  ;;  %v5512_v54 = vunpack.c.l.bf16 %v5564_v31  ;;  %v5565_v18 = vld [vmem:[%s7915_s26 + $0x20] sm:$0xff]   ;;  %v5566_v33 = vld [vmem:[%s7915_s26 + $0x28] sm:$0xff]  }
 0x245   : > { %v4766_v50 = vadd.f32 %v7925_v59, %v4727_v7  ;;  %v6189_v58 = vpop.f32.mrf.mxu1 }
 0x246   : > { %v6241_v13 = vpop.f32.mrf.mxu0  ;;  %4924 = vst [vmem:[%s7938_s6 + $0x8] sm:$0xff] %v4892_v39  ;;  %v4895_v15 = vmax.f32 %v4863_v48, 0.0  ;;  %v4768_v46 = vadd.f32 %v7925_v59, %v4729_v30  ;;  %v4348_v51 = vadd.f32 %v6189_v58, %v7836_v45  ;;  %v5516_v30 = vunpack.c.l.bf16 %v5565_v18 }
 0x247   : > { %v4862_v9 = vadd.f32 %v5505_v44, %v4766_v50  ;;  %v4196_v61 = vpop.f32.mrf.mxu1  ;;  %v5520_v50 = vunpack.c.l.bf16 %v5566_v33 }
 0x248   : > { %v4579_v49 = vpop.f32.mrf.mxu0  ;;  %4927 = vst [vmem:[%s7938_s6 + $0x20] sm:$0xff] %v4895_v15  ;;  %v4864_v11 = vadd.f32 %v5509_v4, %v4768_v46  ;;  %v4731_v25 = vadd.f32 %v6241_v13, %v4348_v51 }
 0x249   : > { %v4894_v47 = vmax.f32 %v4862_v9, 0.0  ;;  %v6190_v19 = vpop.f32.mrf.mxu1  ;;  %v5567_v9 = vld [vmem:[%s7915_s26 + $0x30] sm:$0xff]  }
 0x24a   : > { %v6242_v14 = vpop.f32.mrf.mxu0  ;;  %v4896_v62 = vmax.f32 %v4864_v11, 0.0  ;;  %v4770_v24 = vadd.f32 %v7925_v59, %v4731_v25 }
 0x24b   : > { %4926 = vst [vmem:[%s7938_s6 + $0x18] sm:$0xff] %v4894_v47  ;;  %v4198_v2 = vpop.f32.mrf.mxu1  ;;  %v5524_v47 = vunpack.c.l.bf16 %v5567_v9 }
 0x24c   : > { %v4581_v57 = vpop.f32.mrf.mxu0  ;;  %4928 = vst [vmem:[%s7938_s6 + $0x28] sm:$0xff] %v4896_v62  ;;  %v4866_v23 = vadd.f32 %v5513_v27, %v4770_v24  ;;  %v4347_v3 = vadd.f32 %v4198_v2, %v7839_v53 }
 0x24d   : > { %v6193_v22 = vpop.f32.mrf.mxu1 }
 0x24e   : > { %v6245_v45 = vpop.f32.mrf.mxu0  ;;  %v4898_v8 = vmax.f32 %v4866_v23, 0.0  ;;  %v4730_v63 = vadd.f32 %v4581_v57, %v4347_v3 }
 0x24f   : > { %v4210_v1 = vpop.f32.mrf.mxu1 }
 0x250   : > { %v4593_v60 = vpop.f32.mrf.mxu0  ;;  %4930 = vst [vmem:[%s7938_s6 + $0x38] sm:$0xff] %v4898_v8  ;;  %v4769_v7 = vadd.f32 %v7925_v59, %v4730_v63  ;;  %v4349_v44 = vadd.f32 %v4210_v1, %v7842_v41  ;;  %v5517_v41 = vunpack.c.h.bf16 %v5565_v18 }
 0x251   : > { %v6194_v13 = vpop.f32.mrf.mxu1 }
 0x252   : > { %v6246_v43 = vpop.f32.mrf.mxu0  ;;  %v4865_v48 = vadd.f32 %v5512_v54, %v4769_v7  ;;  %v4732_v53 = vadd.f32 %v4593_v60, %v4349_v44  ;;  %v4351_v4 = vadd.f32 %v6194_v13, %v7845_v32  ;;  %v5521_v54 = vunpack.c.h.bf16 %v5566_v33 }
 0x253   : > { %v4213_v58 = vpop.f32.mrf.mxu1  ;;  %v5525_v44 = vunpack.c.h.bf16 %v5567_v9 }
 0x254   : > { %v4596_v39 = vpop.f32.mrf.mxu0  ;;  %v4897_v49 = vmax.f32 %v4865_v48, 0.0  ;;  %v4771_v15 = vadd.f32 %v7925_v59, %v4732_v53  ;;  %v4734_v46 = vadd.f32 %v6246_v43, %v4351_v4  ;;  %v4350_v51 = vadd.f32 %v4213_v58, %v7848_v5  ;;  %v5568_v48 = vld [vmem:[%s7915_s26 + $0x38] sm:$0xff]  }
 0x255   : > { %v6197_v61 = vpop.f32.mrf.mxu1 }
 0x256   : > { %v6249_v31 = vpop.f32.mrf.mxu0  ;;  %4929 = vst [vmem:[%s7938_s6 + $0x30] sm:$0xff] %v4897_v49  ;;  %v4867_v11 = vadd.f32 %v5516_v30, %v4771_v15  ;;  %v4773_v25 = vadd.f32 %v7925_v59, %v4734_v46  ;;  %v4733_v27 = vadd.f32 %v4596_v39, %v4350_v51  ;;  %v4353_v32 = vadd.f32 %v6197_v61, %v7851_v20 }
 0x257   : > { %v4225_v19 = vpop.f32.mrf.mxu1  ;;  %v5529_v15 = vunpack.c.h.bf16 %v5568_v48 }
 0x258   : > { %v4608_v14 = vpop.f32.mrf.mxu0  ;;  %v4899_v62 = vmax.f32 %v4867_v11, 0.0  ;;  %v4869_v24 = vadd.f32 %v5520_v50, %v4773_v25  ;;  %v4772_v5 = vadd.f32 %v7925_v59, %v4733_v27  ;;  %v4736_v2 = vadd.f32 %v6249_v31, %v4353_v32 }
 0x259   : > { %v4352_v45 = vadd.f32 %v4225_v19, %v7854_v0  ;;  %v6198_v23 = vpop.f32.mrf.mxu1 }
 0x25a   : > { %v6250_v57 = vpop.f32.mrf.mxu0  ;;  %4931 = vst [vmem:[%s7938_s6 + $0x40] sm:$0xff] %v4899_v62  ;;  %v4901_v22 = vmax.f32 %v4869_v24, 0.0  ;;  %v4868_v60 = vadd.f32 %v5517_v41, %v4772_v5  ;;  %v4775_v20 = vadd.f32 %v7925_v59, %v4736_v2  ;;  %v4354_v8 = vadd.f32 %v6198_v23, %v7857_v10  ;;  %v5569_v24 = vld [vmem:[%s7915_s26 + $0x40] sm:$0xff]   ;;  %v5570_v23 = vld [vmem:[%s7915_s26 + $0x48] sm:$0xff]  }
 0x25b   : > { %v4735_v63 = vadd.f32 %v4608_v14, %v4352_v45  ;;  %v4228_v1 = vpop.f32.mrf.mxu1 }
 0x25c   : > { %v4611_v3 = vpop.f32.mrf.mxu0  ;;  %4933 = vst [vmem:[%s7938_s6 + $0x50] sm:$0xff] %v4901_v22  ;;  %v4900_v43 = vmax.f32 %v4868_v60, 0.0  ;;  %v4871_v7 = vadd.f32 %v5524_v47, %v4775_v20  ;;  %v4737_v0 = vadd.f32 %v6250_v57, %v4354_v8  ;;  %v5528_v57 = vunpack.c.l.bf16 %v5568_v48 }
 0x25d   : > { %v4774_v13 = vadd.f32 %v7925_v59, %v4735_v63  ;;  %v6201_v39 = vpop.f32.mrf.mxu1  ;;  %v5532_v20 = vunpack.c.l.bf16 %v5569_v24  ;;  %v5536_v63 = vunpack.c.l.bf16 %v5570_v23 }
 0x25e   : > { %v6253_v18 = vpop.f32.mrf.mxu0  ;;  %4932 = vst [vmem:[%s7938_s6 + $0x48] sm:$0xff] %v4900_v43  ;;  %v4903_v30 = vmax.f32 %v4871_v7, 0.0  ;;  %v4776_v10 = vadd.f32 %v7925_v59, %v4737_v0  ;;  %v4356_v33 = vadd.f32 %v6201_v39, %v7860_v17 }
 0x25f   : > { %v4870_v4 = vadd.f32 %v5521_v54, %v4774_v13  ;;  %v4240_v50 = vpop.f32.mrf.mxu1 }
 0x260   : > { %v4623_v53 = vpop.f32.mrf.mxu0  ;;  %4935 = vst [vmem:[%s7938_s6 + $0x60] sm:$0xff] %v4903_v30  ;;  %v4872_v31 = vadd.f32 %v5525_v44, %v4776_v10  ;;  %v4739_v49 = vadd.f32 %v6253_v18, %v4356_v33  ;;  %v5571_v44 = vld [vmem:[%s7915_s26 + $0x50] sm:$0xff]  }
 0x261   : > { %v4902_v46 = vmax.f32 %v4870_v4, 0.0  ;;  %v6202_v51 = vpop.f32.mrf.mxu1  ;;  %v5540_v10 = vunpack.c.l.bf16 %v5571_v44 }
 0x262   : > { %v6254_v58 = vpop.f32.mrf.mxu0  ;;  %v4904_v41 = vmax.f32 %v4872_v31, 0.0  ;;  %v4778_v61 = vadd.f32 %v7925_v59, %v4739_v49 }
 0x263   : > { %4934 = vst [vmem:[%s7938_s6 + $0x58] sm:$0xff] %v4902_v46  ;;  %v4242_v14 = vpop.f32.mrf.mxu1 }
 0x264   : > { %v4625_v9 = vpop.f32.mrf.mxu0  ;;  %4936 = vst [vmem:[%s7938_s6 + $0x68] sm:$0xff] %v4904_v41  ;;  %v4874_v11 = vadd.f32 %v5529_v15, %v4778_v61  ;;  %v4355_v25 = vadd.f32 %v4242_v14, %v7863_v21  ;;  %v5537_v14 = vunpack.c.h.bf16 %v5570_v23 }
 0x265   : > { %v6205_v27 = vpop.f32.mrf.mxu1 }
 0x266   : > { %v6257_v17 = vpop.f32.mrf.mxu0  ;;  %v4906_v47 = vmax.f32 %v4874_v11, 0.0  ;;  %v4738_v19 = vadd.f32 %v4625_v9, %v4355_v25 }
 0x267   : > { %v4254_v62 = vpop.f32.mrf.mxu1 }
 0x268   : > { %v4637_v32 = vpop.f32.mrf.mxu0  ;;  %4938 = vst [vmem:[%s7938_s6 + $0x78] sm:$0xff] %v4906_v47  ;;  %v4777_v2 = vadd.f32 %v7925_v59, %v4738_v19  ;;  %v4357_v45 = vadd.f32 %v4254_v62, %v7866_v12  ;;  %v5533_v12 = vunpack.c.h.bf16 %v5569_v24 }
 0x269   : > { %v6206_v3 = vpop.f32.mrf.mxu1 }
 0x26a   : > { %v6258_v5 = vpop.f32.mrf.mxu0  ;;  %v4873_v60 = vadd.f32 %v5528_v57, %v4777_v2  ;;  %v4740_v21 = vadd.f32 %v4637_v32, %v4357_v45  ;;  %v4359_v8 = vadd.f32 %v6206_v3, %v7869_v36  ;;  %v5541_v32 = vunpack.c.h.bf16 %v5571_v44  ;;  %v5572_v57 = vld [vmem:[%s7915_s26 + $0x58] sm:$0xff]  }
 0x26b   : > { %v4257_v54 = vpop.f32.mrf.mxu1 }
 0x26c   : > { %v4640_v22 = vpop.f32.mrf.mxu0  ;;  %v4905_v18 = vmax.f32 %v4873_v60, 0.0  ;;  %v4779_v43 = vadd.f32 %v7925_v59, %v4740_v21  ;;  %v4742_v7 = vadd.f32 %v6258_v5, %v4359_v8  ;;  %v4358_v0 = vadd.f32 %v4257_v54, %v7872_v55 }
 0x26d   : > { %v6209_v13 = vpop.f32.mrf.mxu1  ;;  %v5545_v60 = vunpack.c.h.bf16 %v5572_v57 }
 0x26e   : > { %v6261_v1 = vpop.f32.mrf.mxu0  ;;  %4937 = vst [vmem:[%s7938_s6 + $0x70] sm:$0xff] %v4905_v18  ;;  %v4875_v48 = vadd.f32 %v5532_v20, %v4779_v43  ;;  %v4781_v53 = vadd.f32 %v7925_v59, %v4742_v7  ;;  %v4741_v30 = vadd.f32 %v4640_v22, %v4358_v0  ;;  %v4361_v36 = vadd.f32 %v6209_v13, %v7875_v37 }
 0x26f   : > { %v4269_v33 = vpop.f32.mrf.mxu1  ;;  %v5544_v13 = vunpack.c.l.bf16 %v5572_v57 }
 0x270   : > { %v4652_v39 = vpop.f32.mrf.mxu0  ;;  %v4907_v50 = vmax.f32 %v4875_v48, 0.0  ;;  %v4877_v58 = vadd.f32 %v5536_v63, %v4781_v53  ;;  %v4780_v55 = vadd.f32 %v7925_v59, %v4741_v30  ;;  %v4744_v31 = vadd.f32 %v6261_v1, %v4361_v36  ;;  %v5573_v48 = vld [vmem:[%s7915_s26 + $0x60] sm:$0xff]  }
 0x271   : > { %v4360_v49 = vadd.f32 %v4269_v33, %v7878_v26  ;;  %v6210_v15 = vpop.f32.mrf.mxu1 }
 0x272   : > { %v6262_v4 = vpop.f32.mrf.mxu0  ;;  %4939 = vst [vmem:[%s7938_s6 + $0x80] sm:$0xff] %v4907_v50  ;;  %v4909_v51 = vmax.f32 %v4877_v58, 0.0  ;;  %v4876_v9 = vadd.f32 %v5533_v12, %v4780_v55  ;;  %v4783_v37 = vadd.f32 %v7925_v59, %v4744_v31  ;;  %v4362_v41 = vadd.f32 %v6210_v15, %v7881_v34 }
 0x273   : > { %v4743_v61 = vadd.f32 %v4652_v39, %v4360_v49  ;;  %v4272_v17 = vpop.f32.mrf.mxu1  ;;  %v5548_v58 = vunpack.c.l.bf16 %v5573_v48 }
 0x274   : > { %v4655_v46 = vpop.f32.mrf.mxu0  ;;  %4941 = vst [vmem:[%s7938_s6 + $0x90] sm:$0xff] %v4909_v51  ;;  %v4908_v25 = vmax.f32 %v4876_v9, 0.0  ;;  %v4879_v27 = vadd.f32 %v5540_v10, %v4783_v37  ;;  %v4745_v26 = vadd.f32 %v6262_v4, %v4362_v41  ;;  %v5574_v10 = vld [vmem:[%s7915_s26 + $0x68] sm:$0xff]   ;;  %v5575_v41 = vld [vmem:[%s7915_s26 + $0x70] sm:$0xff]  }
 0x275   : > { %v4782_v47 = vadd.f32 %v7925_v59, %v4743_v61  ;;  %v6213_v19 = vpop.f32.mrf.mxu1  ;;  %v5552_v31 = vunpack.c.l.bf16 %v5574_v10 }
 0x276   : > { %v6265_v11 = vpop.f32.mrf.mxu0  ;;  %4940 = vst [vmem:[%s7938_s6 + $0x88] sm:$0xff] %v4908_v25  ;;  %v4911_v24 = vmax.f32 %v4879_v27, 0.0  ;;  %v4784_v34 = vadd.f32 %v7925_v59, %v4745_v26  ;;  %v4364_v5 = vadd.f32 %v6213_v19, %v7884_v40  ;;  %v5556_v27 = vunpack.c.l.bf16 %v5575_v41 }
 0x277   : > { %v4878_v2 = vadd.f32 %v5537_v14, %v4782_v47  ;;  %v4284_v45 = vpop.f32.mrf.mxu1 }
 0x278   : > { %v4667_v62 = vpop.f32.mrf.mxu0  ;;  %4943 = vst [vmem:[%s7938_s6 + $0xa0] sm:$0xff] %v4911_v24  ;;  %v4880_v3 = vadd.f32 %v5541_v32, %v4784_v34  ;;  %v4747_v22 = vadd.f32 %v6265_v11, %v4364_v5 }
 0x279   : > { %v4910_v21 = vmax.f32 %v4878_v2, 0.0  ;;  %v6214_v20 = vpop.f32.mrf.mxu1 }
 0x27a   : > { %v6266_v23 = vpop.f32.mrf.mxu0  ;;  %v4912_v63 = vmax.f32 %v4880_v3, 0.0  ;;  %v4786_v54 = vadd.f32 %v7925_v59, %v4747_v22  ;;  %v5553_v3 = vunpack.c.h.bf16 %v5574_v10 }
 0x27b   : > { %4942 = vst [vmem:[%s7938_s6 + $0x98] sm:$0xff] %v4910_v21  ;;  %v4286_v1 = vpop.f32.mrf.mxu1 }
 0x27c   : > { %v4669_v8 = vpop.f32.mrf.mxu0  ;;  %4944 = vst [vmem:[%s7938_s6 + $0xa8] sm:$0xff] %v4912_v63  ;;  %v4882_v18 = vadd.f32 %v5545_v60, %v4786_v54  ;;  %v4363_v43 = vadd.f32 %v4286_v1, %v7887_v28  ;;  %v5576_v1 = vld [vmem:[%s7915_s26 + $0x78] sm:$0xff]  }
 0x27d   : > { %v6217_v7 = vpop.f32.mrf.mxu1 }
 0x27e   : > { %v6269_v40 = vpop.f32.mrf.mxu0  ;;  %v4914_v44 = vmax.f32 %v4882_v18, 0.0  ;;  %v4746_v12 = vadd.f32 %v4669_v8, %v4363_v43  ;;  %v5557_v8 = vunpack.c.h.bf16 %v5575_v41 }
 0x27f   : > { %v4298_v39 = vpop.f32.mrf.mxu1 }
 0x280   : > { %v4681_v0 = vpop.f32.mrf.mxu0  ;;  %4946 = vst [vmem:[%s7938_s6 + $0xb8] sm:$0xff] %v4914_v44  ;;  %v4785_v30 = vadd.f32 %v7925_v59, %v4746_v12  ;;  %v4365_v36 = vadd.f32 %v4298_v39, %v7890_v29  ;;  %v5549_v29 = vunpack.c.h.bf16 %v5573_v48  ;;  %v5561_v39 = vunpack.c.h.bf16 %v5576_v1 }
 0x281   : > { %v6218_v33 = vpop.f32.mrf.mxu1 }
 0x282   : > { %v6270_v53 = vpop.f32.mrf.mxu0  ;;  %v4881_v50 = vadd.f32 %v5544_v13, %v4785_v30  ;;  %v4748_v28 = vadd.f32 %v4681_v0, %v4365_v36  ;;  %v4367_v55 = vadd.f32 %v6218_v33, %v7893_v16 }
 0x283   : > { %v4301_v49 = vpop.f32.mrf.mxu1 }
 0x284   : > { %v4684_v4 = vpop.f32.mrf.mxu0  ;;  %v4913_v46 = vmax.f32 %v4881_v50, 0.0  ;;  %v4787_v51 = vadd.f32 %v7925_v59, %v4748_v28  ;;  %v4750_v9 = vadd.f32 %v6270_v53, %v4367_v55  ;;  %v4366_v37 = vadd.f32 %v4301_v49, %v7896_v6 }
 0x285   : > { %v6221_v61 = vpop.f32.mrf.mxu1 }
 0x286   : > { %v6273_v15 = vpop.f32.mrf.mxu0  ;;  %4945 = vst [vmem:[%s7938_s6 + $0xb0] sm:$0xff] %v4913_v46  ;;  %v4883_v17 = vadd.f32 %v5548_v58, %v4787_v51  ;;  %v4789_v11 = vadd.f32 %v7925_v59, %v4750_v9  ;;  %v4749_v25 = vadd.f32 %v4684_v4, %v4366_v37  ;;  %v4369_v16 = vadd.f32 %v6221_v61, %v7899_v42 }
 0x287   : > { %v4313_v26 = vpop.f32.mrf.mxu1  ;;  %v5560_v58 = vunpack.c.l.bf16 %v5576_v1 }
 0x288   : > { %v4696_v14 = vpop.f32.mrf.mxu0  ;;  %v4915_v47 = vmax.f32 %v4883_v17, 0.0  ;;  %v4885_v19 = vadd.f32 %v5552_v31, %v4789_v11  ;;  %v4788_v6 = vadd.f32 %v7925_v59, %v4749_v25  ;;  %v4752_v57 = vadd.f32 %v6273_v15, %v4369_v16 }
 0x289   : > { %v4368_v62 = vadd.f32 %v4313_v26, %v7902_v56  ;;  %v6222_v24 = vpop.f32.mrf.mxu1 }
 0x28a   : > { %v6274_v32 = vpop.f32.mrf.mxu0  ;;  %4947 = vst [vmem:[%s7938_s6 + $0xc0] sm:$0xff] %v4915_v47  ;;  %v4917_v5 = vmax.f32 %v4885_v19, 0.0  ;;  %v4884_v2 = vadd.f32 %v5549_v29, %v4788_v6  ;;  %v4791_v42 = vadd.f32 %v7925_v59, %v4752_v57  ;;  %v4370_v45 = vadd.f32 %v6222_v24, %v7905_v52 }
 0x28b   : > { %v4751_v23 = vadd.f32 %v4696_v14, %v4368_v62  ;;  %v4316_v22 = vpop.f32.mrf.mxu1 }
 0x28c   : > { %v4699_v34 = vpop.f32.mrf.mxu0  ;;  %4949 = vst [vmem:[%s7938_s6 + $0xd0] sm:$0xff] %v4917_v5  ;;  %v4916_v21 = vmax.f32 %v4884_v2, 0.0  ;;  %v4887_v20 = vadd.f32 %v5556_v27, %v4791_v42  ;;  %v4753_v56 = vadd.f32 %v6274_v32, %v4370_v45 }
 0x28d   : > { %v4790_v63 = vadd.f32 %v7925_v59, %v4751_v23  ;;  %v6225_v54 = vpop.f32.mrf.mxu1 }
 0x28e   : > { %v6277_v60 = vpop.f32.mrf.mxu0  ;;  %4948 = vst [vmem:[%s7938_s6 + $0xc8] sm:$0xff] %v4916_v21  ;;  %v4919_v18 = vmax.f32 %v4887_v20, 0.0  ;;  %v4792_v52 = vadd.f32 %v7925_v59, %v4753_v56  ;;  %v4372_v43 = vadd.f32 %v6225_v54, %v7908_v35 }
 0x28f   : > { %v4886_v7 = vadd.f32 %v5553_v3, %v4790_v63  ;;  %v4328_v0 = vpop.f32.mrf.mxu1 }
 0x290   : > { %v4711_v40 = vpop.f32.mrf.mxu0  ;;  %4951 = vst [vmem:[%s7938_s6 + $0xe0] sm:$0xff] %v4919_v18  ;;  %v4888_v12 = vadd.f32 %v5557_v8, %v4792_v52  ;;  %v4755_v13 = vadd.f32 %v6277_v60, %v4372_v43 }
 0x291   : > { %v4918_v48 = vmax.f32 %v4886_v7, 0.0  ;;  %v6226_v53 = vpop.f32.mrf.mxu1 }
 0x292   : > { %v6278_v44 = vpop.f32.mrf.mxu0  ;;  %v4920_v30 = vmax.f32 %v4888_v12, 0.0  ;;  %v4794_v36 = vadd.f32 %v7925_v59, %v4755_v13 }
 0x293   : > { %4950 = vst [vmem:[%s7938_s6 + $0xd8] sm:$0xff] %v4918_v48  ;;  %v4330_v10 = vpop.f32.mrf.mxu1 }
 0x294   : > { %v4713_v33 = vpop.f32.mrf.mxu0  ;;  %4952 = vst [vmem:[%s7938_s6 + $0xe8] sm:$0xff] %v4920_v30  ;;  %v4890_v35 = vadd.f32 %v5561_v39, %v4794_v36  ;;  %v4371_v4 = vadd.f32 %v4330_v10, %v7917_v38 }
 0x296   : > { %v4922_v50 = vmax.f32 %v4890_v35, 0.0  ;;  %v4754_v28 = vadd.f32 %v4713_v33, %v4371_v4 }
 0x298   : > { %4954 = vst [vmem:[%s7938_s6 + $0xf8] sm:$0xff] %v4922_v50  ;;  %v4793_v55 = vadd.f32 %v7925_v59, %v4754_v28 }
 0x29a   : > { %v4889_v31 = vadd.f32 %v5560_v58, %v4793_v55 }
 0x29c   : > { %v4921_v38 = vmax.f32 %v4889_v31, 0.0 }
 0x29e   : > { %4953 = vst [vmem:[%s7938_s6 + $0xf0] sm:$0xff] %v4921_v38 }
 0x29f   : > { %6498 = shalt.err (!%p6495_p5)
}
 0x2a0   : > { %s6499_s24 = scalar_lea.hbm %s8045_s12, 4096  ;;  %s6503_s29 = scalar_lea.hbm %s8101_s4, 8192 }
 0x2a1   : > { %p6500_p6 = scmp.ne.s32.totalorder %s8045_s12, %s6499_s24  ;;  %p6504_p10 = scmp.lt.s32.totalorder %s8045_s12, %s8101_s4 }
 0x2a2   : > { %p6505_p11 = scmp.lt.s32.totalorder %s6503_s29, %s6499_s24 }
 0x2a3   : > { %p6501_p7 = pnand %p6500_p6, %p6631_p4 }
 0x2a4   : > { %p6506_p12 = por %p6505_p11, %p6504_p10 }
 0x2a5   : > { %p6502_p9 = pneg %p6501_p7 }
 0x2a7   : > { %p6507_p13 = pnand %p6506_p12, %p6502_p9 }
 0x2a9   : > { %6510 = shalt.err (!%p6507_p13)
}
 0x2aa   : > { %s6564_s6 = smov 128   ;;  %s6565_s8 = smov 8  }
 0x2ab   : > { %6284 = dma.vmem_to_hbm [thread:$0]  (%p6631_p4), %s8047_s9, 4096, %s8045_s12, %s8052_s13, %s6564_s6, %s6564_s6, %s6565_s8  }
 0x2ac PF: > { %p6290_p0 = scmp.ge.s32.totalorder %s6561_s20, 2  ;;  %s4985_s10 = sand.u32 1, %s6541_s15  }
 0x2ad   : > { %s4986_s11 = scalar_lea.sflag [#allocation3], %s4985_s10 }
 0x2ae   : > { %p6287_p1 = pnand %p6290_p0, %p6638_p8 }
 0x2b0   : > { %p6288_p2 = pneg %p6287_p1 }
 0x2b2   : > { %6536 = dma.done.wait (%p6288_p2), %s4986_s11, 4096  }
 0x2b3   : > { %6538 = vsyncadd (%p6288_p2), %s4986_s11, 4294963200  ;;  %s17_s20 = sadd.s32 1, %s6561_s20   ;;  %s8119_s15 = smov %s6545_s16 }
 0x2b4   : > { %p14_p3 = scmp.ge.s32.totalorder %s17_s20, 4   ;;  %s8120_s16 = smov %s6549_s17 }
 0x2b5   : > { %s8121_s17 = smov %s6644_s28  ;;  %s8122_s18 = smov %s6557_s19 }
 0x2b6   : > { %s8123_s19 = smov %s8125_s23  ;;  %16 = sbr.rel (!%p14_p3) target bundleno = 4 (0x4), region = 88 }
 0x2bb   :  { %4991 = vsyncpa [#allocation3], 1 }
 0x2bc   :  { %4993 = vsyncpa [#allocation3 + $0x1], 1 }

</bundles_post_ra>
